<compile_context>
chip_gen: v7x
topology: tpu7x:2x2x1
jax: 0.10.0
libtpu: 0.0.40
codegen_flags: <defaults>
</compile_context>

<pallas_src>
import jax
import jax.numpy as jnp
from jax.experimental import pallas as pl
from jax.experimental.pallas import tpu as pltpu

EPS = 1e-5


def _default_vmem_limit():
    """~80% of this generation's physical VMEM (v5e/v6e ~102 MiB, v7x ~51 MiB)."""
    try:
        info = pltpu.get_tpu_info()
        cap = getattr(info, "vmem_capacity_bytes", None)
        if cap:
            return int(cap * 0.8)
    except Exception:
        pass
    return 48 * 1024 * 1024


# ----------------------------------------------------------------------------
# Fused kernel builder (static configuration closed over)
# ----------------------------------------------------------------------------
def _make_fused_kernel(n, ho, wo, cin, planes, stride, has_sc, is_last, ch_major):
    m = n * ho * wo
    inv_m = 1.0 / float(m)

    def bn_fold(x, gamma, beta):
        # Single-pass batch stats (biased var via E[x^2]-E[x]^2), affine folded
        # into one scale/shift so applying BN is a single x*scale+shift pass.
        s1 = jnp.sum(x, axis=0, keepdims=True)
        s2 = jnp.sum(x * x, axis=0, keepdims=True)
        mean = s1 * inv_m
        var = jnp.maximum(s2 * inv_m - mean * mean, 0.0)
        scale = gamma * jax.lax.rsqrt(var + EPS)
        shift = beta - mean * scale
        return scale, shift

    def tap(ref, dy, dx, c):
        # 3x3 tap (dy, dx) of the stride-phase-split, zero-padded input: a
        # contiguous VMEM window slice.  (All needed rows provably exist:
        # max padded row read = dy + (ho-1)*stride <= h+1 for any H/W/stride.)
        py, px = dy % stride, dx % stride
        base = (py * stride + px) * n
        hy, wx = dy // stride, dx // stride
        return ref[base:base + n, hy:hy + ho, wx:wx + wo, :].reshape(m, c)

    def kernel(*refs):
        xph_ref, w1_ref, w2_ref, g1_ref, b1_ref, g2_ref, b2_ref = refs[:7]
        i = 7
        if has_sc:
            ws_ref, gs_ref, bs_ref = refs[i], refs[i + 1], refs[i + 2]
            i += 3
        out_ref = refs[i]
        i += 1
        if is_last:
            pre_ref = refs[i]
            i += 1
        o1pad_ref = refs[i]  # VMEM scratch: zero-haloed conv1 activation (bf16)

        # ---- conv1: one K-fused [M, 9*Cin] x [9*Cin, P] bf16 matmul ----------
        slab1 = jnp.concatenate(
            [tap(xph_ref, dy, dx, cin) for dy in range(3) for dx in range(3)],
            axis=1)
        acc1 = jnp.dot(slab1, w1_ref[...], preferred_element_type=jnp.float32)

        # ---- BN1 (single pass, folded affine) + ReLU -------------------------
        sc1, sh1 = bn_fold(acc1, g1_ref[...], b1_ref[...])
        y1 = jnp.maximum(acc1 * sc1 + sh1, 0.0)

        # ---- stage conv1 activation in VMEM (bf16); zero only the halo -------
        zrow = jnp.zeros((n, 1, wo + 2, planes), jnp.bfloat16)
        zcol = jnp.zeros((n, ho + 2, 1, planes), jnp.bfloat16)
        o1pad_ref[:, 0:1, :, :] = zrow
        o1pad_ref[:, ho + 1:ho + 2, :, :] = zrow
        o1pad_ref[:, :, 0:1, :] = zcol
        o1pad_ref[:, :, wo + 1:wo + 2, :] = zcol
        o1pad_ref[:, 1:1 + ho, 1:1 + wo, :] = (
            y1.astype(jnp.bfloat16).reshape(n, ho, wo, planes))

        # ---- conv2: one K-fused [M, 9*P] x [9*P, P] bf16 matmul --------------
        slab2 = jnp.concatenate(
            [o1pad_ref[:, dy:dy + ho, dx:dx + wo, :].reshape(m, planes)
             for dy in range(3) for dx in range(3)],
            axis=1)
        acc2 = jnp.dot(slab2, w2_ref[...], preferred_element_type=jnp.float32)
        sc2, sh2 = bn_fold(acc2, g2_ref[...], b2_ref[...])

        # ---- shortcut: re-slice the center tap (nothing kept live) -----------
        center = tap(xph_ref, 1, 1, cin)            # bf16 [M, Cin]
        if has_sc:
            accs = jnp.dot(center, ws_ref[...], preferred_element_type=jnp.float32)
            scs, shs = bn_fold(accs, gs_ref[...], bs_ref[...])
            # BN2 + shortcut-BN + residual add fused into one pass.
            pre = acc2 * sc2 + accs * scs + (sh2 + shs)
        else:
            pre = acc2 * sc2 + sh2 + center.astype(jnp.float32)

        # ---- ReLU + lane-dense stores -----------------------------------------
        out = jnp.maximum(pre, 0.0)
        if ch_major:                     # planes < 128: channel-major [P, M]
            out_ref[...] = out.T
            if is_last:
                pre_ref[...] = pre.T
        else:                            # planes >= 128: [M, P] already dense
            out_ref[...] = out
            if is_last:
                pre_ref[...] = pre

    return kernel


# ----------------------------------------------------------------------------
# XLA-side glue (cheap, bf16 end-to-end)
# ----------------------------------------------------------------------------
def _make_phases(x_pad, s):
    """Stack stride-phases of the padded NHWC input so every 3x3 tap becomes a
    contiguous in-VMEM slice.  Total size == input size (no 9x im2col blow-up)."""
    n, hp, wp, c = x_pad.shape
    hph, wph = -(-hp // s), -(-wp // s)
    phases = []
    for py in range(s):
        for px in range(s):
            ph = x_pad[:, py::s, px::s, :]
            ph = jnp.pad(ph, ((0, 0), (0, hph - ph.shape[1]),
                              (0, wph - ph.shape[2]), (0, 0)))
            phases.append(ph)
    return jnp.concatenate(phases, axis=0)  # [s*s*N, hph, wph, C]


class BasicBlockPallas:
    expansion = 1

    def __init__(self, in_planes, planes, stride=1, is_last=False, key=None):
        self.in_planes = in_planes
        self.planes = planes
        self.stride = stride
        self.is_last = is_last
        self.has_sc = (stride != 1) or (in_planes != self.expansion * planes)
        self.vmem_limit = _default_vmem_limit()

        k1, k2, k3 = jax.random.split(key, 3)
        # f32 master weights (OIHW, PyTorch layout) -- kept for the reference.
        self.w1 = 0.1 * jax.random.normal(k1, (planes, in_planes, 3, 3), jnp.float32)
        self.w2 = 0.1 * jax.random.normal(k2, (planes, planes, 3, 3), jnp.float32)
        # Hoisted K-fused bf16 matmul weights; rows ordered (ky, kx, cin) to
        # match the in-kernel im2col slab column order.
        self.w1_cat = jnp.transpose(self.w1, (2, 3, 1, 0)).reshape(
            9 * in_planes, planes).astype(jnp.bfloat16)
        self.w2_cat = jnp.transpose(self.w2, (2, 3, 1, 0)).reshape(
            9 * planes, planes).astype(jnp.bfloat16)
        # BN affine params (gamma=1, beta=0 like nn.BatchNorm2d init), pre-shaped.
        self.g1 = jnp.ones((1, planes), jnp.float32)
        self.b1 = jnp.zeros((1, planes), jnp.float32)
        self.g2 = jnp.ones((1, planes), jnp.float32)
        self.b2 = jnp.zeros((1, planes), jnp.float32)
        if self.has_sc:
            self.ws = 0.1 * jax.random.normal(
                k3, (self.expansion * planes, in_planes, 1, 1), jnp.float32)
            self.ws_mat = jnp.transpose(self.ws[:, :, 0, 0], (1, 0)).astype(jnp.bfloat16)
            self.gs = jnp.ones((1, self.expansion * planes), jnp.float32)
            self.bs = jnp.zeros((1, self.expansion * planes), jnp.float32)

        self._forward = jax.jit(self._forward_impl)

    def _forward_impl(self, x_nchw):
        n, c, h, w = x_nchw.shape
        s = self.stride
        ho = (h + 2 - 3) // s + 1
        wo = (w + 2 - 3) // s + 1
        m = n * ho * wo
        p = self.planes
        ch_major = p < 128  # store [P, M] only when [M, P] would not be lane-dense

        # bf16 once, before transpose/pad/phase-split (halves wrapper HBM passes
        # and the HBM->VMEM DMA of the kernel input).
        x = jnp.transpose(x_nchw.astype(jnp.bfloat16), (0, 2, 3, 1))  # NHWC bf16
        x_pad = jnp.pad(x, ((0, 0), (1, 1), (1, 1), (0, 0)))
        xph = _make_phases(x_pad, s)

        inputs = [xph, self.w1_cat, self.w2_cat,
                  self.g1, self.b1, self.g2, self.b2]
        if self.has_sc:
            inputs += [self.ws_mat, self.gs, self.bs]

        vspec = pl.BlockSpec(memory_space=pltpu.MemorySpace.VMEM)
        out_sd = jax.ShapeDtypeStruct((p, m) if ch_major else (m, p), jnp.float32)
        if self.is_last:
            out_shape = (out_sd, out_sd)
            out_specs = (vspec, vspec)
        else:
            out_shape = out_sd
            out_specs = vspec

        kernel = _make_fused_kernel(n, ho, wo, c, p, s,
                                    self.has_sc, self.is_last, ch_major)
        res = pl.pallas_call(
            kernel,
            out_shape=out_shape,
            in_specs=[vspec] * len(inputs),
            out_specs=out_specs,
            scratch_shapes=[pltpu.VMEM((n, ho + 2, wo + 2, p), jnp.bfloat16)],
            compiler_params=pltpu.CompilerParams(vmem_limit_bytes=self.vmem_limit),
        )(*inputs)

        def to_nchw(y2d):
            if ch_major:   # [P, N*Ho*Wo] -> [N, P, Ho, Wo]
                return jnp.transpose(y2d.reshape(p, n, ho, wo), (1, 0, 2, 3))
            return jnp.transpose(y2d.reshape(n, ho, wo, p), (0, 3, 1, 2))

        if self.is_last:
            out2d, pre2d = res
            return to_nchw(out2d), to_nchw(pre2d)
        return to_nchw(res)

    def __call__(self, x_nchw):
        return self._forward(x_nchw)


# ----------------------------------------------------------------------------
# Pure-JAX reference (f32, two-pass BN) for correctness checking
# ----------------------------------------------------------------------------
def _reference_forward(block, x):
    def conv(x, w, stride, pad):
        return jax.lax.conv_general_dilated(
            x, w, window_strides=(stride, stride),
            padding=((pad, pad), (pad, pad)),
            dimension_numbers=("NCHW", "OIHW", "NCHW"))

    def bn(x, g, b):
        mean = jnp.mean(x, axis=(0, 2, 3), keepdims=True)
        var = jnp.mean((x - mean) ** 2, axis=(0, 2, 3), keepdims=True)
        xn = (x - mean) * jax.lax.rsqrt(var + EPS)
        return xn * g.reshape(1, -1, 1, 1) + b.reshape(1, -1, 1, 1)

    out = jax.nn.relu(bn(conv(x, block.w1, block.stride, 1),
                         block.g1.ravel(), block.b1.ravel()))
    out = bn(conv(out, block.w2, 1, 1), block.g2.ravel(), block.b2.ravel())
    if block.has_sc:
        sc = bn(conv(x, block.ws, block.stride, 0),
                block.gs.ravel(), block.bs.ravel())
    else:
        sc = x
    pre = out + sc
    return jax.nn.relu(pre), pre


if __name__ == "__main__":
    key = jax.random.PRNGKey(0)
    kx, kp, kx2, kp2 = jax.random.split(key, 4)

    # Tolerances: bf16 MXU operands + single-pass (E[x^2]-E[x]^2) BatchNorm.
    ATOL, RTOL = 6e-2, 5e-2

    # --- Config 1: downsampling block with conv shortcut (stride=2, 4 -> 8) ---
    x = jax.random.normal(kx, (2, 4, 16, 16), jnp.float32)            # NCHW
    block = BasicBlockPallas(in_planes=4, planes=8, stride=2, is_last=True, key=kp)
    out, preact = block(x)
    jax.block_until_ready(out)
    jax.block_until_ready(preact)

    assert out.shape == (2, 8, 8, 8) and preact.shape == (2, 8, 8, 8)
    assert bool(jnp.all(out >= 0.0))
    assert bool(jnp.all(jnp.isfinite(out))) and bool(jnp.all(jnp.isfinite(preact)))
    assert bool(jnp.allclose(out, jnp.maximum(preact, 0.0)))

    ref_out, ref_pre = _reference_forward(block, x)
    assert bool(jnp.allclose(out, ref_out, atol=ATOL, rtol=RTOL))
    assert bool(jnp.allclose(preact, ref_pre, atol=ATOL, rtol=RTOL))

    # --- Config 2: identity-shortcut block (stride=1, 8 -> 8, is_last=False) ---
    x2 = jax.random.normal(kx2, (2, 8, 16, 16), jnp.float32)
    block2 = BasicBlockPallas(in_planes=8, planes=8, stride=1, is_last=False, key=kp2)
    out2 = block2(x2)
    jax.block_until_ready(out2)

    assert out2.shape == (2, 8, 16, 16)
    assert bool(jnp.all(out2 >= 0.0)) and bool(jnp.all(jnp.isfinite(out2)))
    ref_out2, _ = _reference_forward(block2, x2)
    assert bool(jnp.allclose(out2, ref_out2, atol=ATOL, rtol=RTOL))

    print("KERNEL_OK")
</pallas_src>

<mosaic_0001>
module attributes {stable_mosaic.version = 11 : i64} {
  func.func @kernel(%arg0: memref<8x9x9x4xbf16, #tpu.memory_space<vmem>>, %arg1: memref<36x8xbf16, #tpu.memory_space<vmem>>, %arg2: memref<72x8xbf16, #tpu.memory_space<vmem>>, %arg3: memref<1x8xf32, #tpu.memory_space<vmem>>, %arg4: memref<1x8xf32, #tpu.memory_space<vmem>>, %arg5: memref<1x8xf32, #tpu.memory_space<vmem>>, %arg6: memref<1x8xf32, #tpu.memory_space<vmem>>, %arg7: memref<4x8xbf16, #tpu.memory_space<vmem>>, %arg8: memref<1x8xf32, #tpu.memory_space<vmem>>, %arg9: memref<1x8xf32, #tpu.memory_space<vmem>>, %arg10: memref<8x128xf32, #tpu.memory_space<vmem>>, %arg11: memref<8x128xf32, #tpu.memory_space<vmem>>, %arg12: memref<2x10x10x8xbf16, #tpu.memory_space<vmem>>) attributes {dimension_semantics = [], scalar_prefetch = 0 : i64, scratch_operands = 1 : i64, tpu.core_type = #tpu.core_type<tc>} {
    %c0 = arith.constant 0 : index
    %c0_0 = arith.constant 0 : index
    %c0_1 = arith.constant 0 : index
    %c0_2 = arith.constant 0 : index
    %0 = vector.load %arg0[%c0, %c0_0, %c0_1, %c0_2] : memref<8x9x9x4xbf16, #tpu.memory_space<vmem>>, vector<2x8x8x4xbf16>
    %1 = vector.shape_cast %0 : vector<2x8x8x4xbf16> to vector<128x4xbf16>
    %c2 = arith.constant 2 : index
    %c0_3 = arith.constant 0 : index
    %c0_4 = arith.constant 0 : index
    %c0_5 = arith.constant 0 : index
    %2 = vector.load %arg0[%c2, %c0_3, %c0_4, %c0_5] : memref<8x9x9x4xbf16, #tpu.memory_space<vmem>>, vector<2x8x8x4xbf16>
    %3 = vector.shape_cast %2 : vector<2x8x8x4xbf16> to vector<128x4xbf16>
    %c0_6 = arith.constant 0 : index
    %c0_7 = arith.constant 0 : index
    %c1 = arith.constant 1 : index
    %c0_8 = arith.constant 0 : index
    %4 = vector.load %arg0[%c0_6, %c0_7, %c1, %c0_8] : memref<8x9x9x4xbf16, #tpu.memory_space<vmem>>, vector<2x8x8x4xbf16>
    %5 = vector.shape_cast %4 : vector<2x8x8x4xbf16> to vector<128x4xbf16>
    %c4 = arith.constant 4 : index
    %c0_9 = arith.constant 0 : index
    %c0_10 = arith.constant 0 : index
    %c0_11 = arith.constant 0 : index
    %6 = vector.load %arg0[%c4, %c0_9, %c0_10, %c0_11] : memref<8x9x9x4xbf16, #tpu.memory_space<vmem>>, vector<2x8x8x4xbf16>
    %7 = vector.shape_cast %6 : vector<2x8x8x4xbf16> to vector<128x4xbf16>
    %c6 = arith.constant 6 : index
    %c0_12 = arith.constant 0 : index
    %c0_13 = arith.constant 0 : index
    %c0_14 = arith.constant 0 : index
    %8 = vector.load %arg0[%c6, %c0_12, %c0_13, %c0_14] : memref<8x9x9x4xbf16, #tpu.memory_space<vmem>>, vector<2x8x8x4xbf16>
    %9 = vector.shape_cast %8 : vector<2x8x8x4xbf16> to vector<128x4xbf16>
    %c4_15 = arith.constant 4 : index
    %c0_16 = arith.constant 0 : index
    %c1_17 = arith.constant 1 : index
    %c0_18 = arith.constant 0 : index
    %10 = vector.load %arg0[%c4_15, %c0_16, %c1_17, %c0_18] : memref<8x9x9x4xbf16, #tpu.memory_space<vmem>>, vector<2x8x8x4xbf16>
    %11 = vector.shape_cast %10 : vector<2x8x8x4xbf16> to vector<128x4xbf16>
    %c0_19 = arith.constant 0 : index
    %c1_20 = arith.constant 1 : index
    %c0_21 = arith.constant 0 : index
    %c0_22 = arith.constant 0 : index
    %12 = vector.load %arg0[%c0_19, %c1_20, %c0_21, %c0_22] : memref<8x9x9x4xbf16, #tpu.memory_space<vmem>>, vector<2x8x8x4xbf16>
    %13 = vector.shape_cast %12 : vector<2x8x8x4xbf16> to vector<128x4xbf16>
    %c2_23 = arith.constant 2 : index
    %c1_24 = arith.constant 1 : index
    %c0_25 = arith.constant 0 : index
    %c0_26 = arith.constant 0 : index
    %14 = vector.load %arg0[%c2_23, %c1_24, %c0_25, %c0_26] : memref<8x9x9x4xbf16, #tpu.memory_space<vmem>>, vector<2x8x8x4xbf16>
    %15 = vector.shape_cast %14 : vector<2x8x8x4xbf16> to vector<128x4xbf16>
    %c0_27 = arith.constant 0 : index
    %c1_28 = arith.constant 1 : index
    %c1_29 = arith.constant 1 : index
    %c0_30 = arith.constant 0 : index
    %16 = vector.load %arg0[%c0_27, %c1_28, %c1_29, %c0_30] : memref<8x9x9x4xbf16, #tpu.memory_space<vmem>>, vector<2x8x8x4xbf16>
    %17 = vector.shape_cast %16 : vector<2x8x8x4xbf16> to vector<128x4xbf16>
    %18 = tpu.concatenate %1, %3, %5, %7, %9, %11, %13, %15, %17 in 1 : vector<128x4xbf16>, vector<128x4xbf16>, vector<128x4xbf16>, vector<128x4xbf16>, vector<128x4xbf16>, vector<128x4xbf16>, vector<128x4xbf16>, vector<128x4xbf16>, vector<128x4xbf16> -> vector<128x36xbf16>
    %c0_31 = arith.constant 0 : index
    %c0_32 = arith.constant 0 : index
    %19 = vector.load %arg1[%c0_31, %c0_32] : memref<36x8xbf16, #tpu.memory_space<vmem>>, vector<36x8xbf16>
    %cst = arith.constant dense<0.000000e+00> : vector<128x8xf32>
    %20 = tpu.matmul %18, %19, %cst {dimension_numbers = #tpu.dot_dimension_numbers<[1], [0], [0], [1], [0, 0, 1, 1], [], []>} : vector<128x36xbf16>, vector<36x8xbf16>, vector<128x8xf32> -> vector<128x8xf32>
    %c0_33 = arith.constant 0 : index
    %c0_34 = arith.constant 0 : index
    %21 = vector.load %arg3[%c0_33, %c0_34] : memref<1x8xf32, #tpu.memory_space<vmem>>, vector<1x8xf32>
    %c0_35 = arith.constant 0 : index
    %c0_36 = arith.constant 0 : index
    %22 = vector.load %arg4[%c0_35, %c0_36] : memref<1x8xf32, #tpu.memory_space<vmem>>, vector<1x8xf32>
    %cst_37 = arith.constant dense<0.000000e+00> : vector<8xf32>
    %23 = vector.multi_reduction <add>, %20, %cst_37 [0] : vector<128x8xf32> to vector<8xf32>
    %24 = vector.shape_cast %23 : vector<8xf32> to vector<1x8xf32>
    %25 = arith.mulf %20, %20 : vector<128x8xf32>
    %cst_38 = arith.constant dense<0.000000e+00> : vector<8xf32>
    %26 = vector.multi_reduction <add>, %25, %cst_38 [0] : vector<128x8xf32> to vector<8xf32>
    %27 = vector.shape_cast %26 : vector<8xf32> to vector<1x8xf32>
    %cst_39 = arith.constant 7.812500e-03 : f32
    %28 = vector.broadcast %cst_39 : f32 to vector<1x8xf32>
    %29 = arith.mulf %24, %28 : vector<1x8xf32>
    %cst_40 = arith.constant 7.812500e-03 : f32
    %30 = vector.broadcast %cst_40 : f32 to vector<1x8xf32>
    %31 = arith.mulf %27, %30 : vector<1x8xf32>
    %32 = arith.mulf %29, %29 : vector<1x8xf32>
    %33 = arith.subf %31, %32 : vector<1x8xf32>
    %cst_41 = arith.constant 0.000000e+00 : f32
    %34 = vector.broadcast %cst_41 : f32 to vector<1x8xf32>
    %35 = arith.maximumf %33, %34 : vector<1x8xf32>
    %cst_42 = arith.constant 9.99999974E-6 : f32
    %36 = vector.broadcast %cst_42 : f32 to vector<1x8xf32>
    %37 = arith.addf %35, %36 : vector<1x8xf32>
    %38 = math.rsqrt %37 : vector<1x8xf32>
    %39 = arith.mulf %21, %38 : vector<1x8xf32>
    %40 = arith.mulf %29, %39 : vector<1x8xf32>
    %41 = arith.subf %22, %40 : vector<1x8xf32>
    %42 = vector.broadcast %39 : vector<1x8xf32> to vector<128x8xf32>
    %43 = arith.mulf %20, %42 : vector<128x8xf32>
    %44 = vector.broadcast %41 : vector<1x8xf32> to vector<128x8xf32>
    %45 = arith.addf %43, %44 : vector<128x8xf32>
    %cst_43 = arith.constant 0.000000e+00 : f32
    %46 = vector.broadcast %cst_43 : f32 to vector<128x8xf32>
    %47 = arith.maximumf %45, %46 : vector<128x8xf32>
    %cst_44 = arith.constant 0.000000e+00 : bf16
    %48 = vector.broadcast %cst_44 : bf16 to vector<2x1x10x8xbf16>
    %cst_45 = arith.constant 0.000000e+00 : bf16
    %49 = vector.broadcast %cst_45 : bf16 to vector<2x10x1x8xbf16>
    %c0_46 = arith.constant 0 : index
    %c0_47 = arith.constant 0 : index
    %c0_48 = arith.constant 0 : index
    %c0_49 = arith.constant 0 : index
    %50 = vector.load %arg12[%c0_46, %c0_47, %c0_48, %c0_49] : memref<2x10x10x8xbf16, #tpu.memory_space<vmem>>, vector<2x1x10x8xbf16>
    tpu.vector_store %arg12[%c0_46, %c0_47, %c0_48, %c0_49], %48 {strides = array<i32>} : memref<2x10x10x8xbf16, #tpu.memory_space<vmem>>, vector<2x1x10x8xbf16>,
    %c0_50 = arith.constant 0 : index
    %c9 = arith.constant 9 : index
    %c0_51 = arith.constant 0 : index
    %c0_52 = arith.constant 0 : index
    %51 = vector.load %arg12[%c0_50, %c9, %c0_51, %c0_52] : memref<2x10x10x8xbf16, #tpu.memory_space<vmem>>, vector<2x1x10x8xbf16>
    tpu.vector_store %arg12[%c0_50, %c9, %c0_51, %c0_52], %48 {strides = array<i32>} : memref<2x10x10x8xbf16, #tpu.memory_space<vmem>>, vector<2x1x10x8xbf16>,
    %c0_53 = arith.constant 0 : index
    %c0_54 = arith.constant 0 : index
    %c0_55 = arith.constant 0 : index
    %c0_56 = arith.constant 0 : index
    %52 = vector.load %arg12[%c0_53, %c0_54, %c0_55, %c0_56] : memref<2x10x10x8xbf16, #tpu.memory_space<vmem>>, vector<2x10x1x8xbf16>
    tpu.vector_store %arg12[%c0_53, %c0_54, %c0_55, %c0_56], %49 {strides = array<i32>} : memref<2x10x10x8xbf16, #tpu.memory_space<vmem>>, vector<2x10x1x8xbf16>,
    %c0_57 = arith.constant 0 : index
    %c0_58 = arith.constant 0 : index
    %c9_59 = arith.constant 9 : index
    %c0_60 = arith.constant 0 : index
    %53 = vector.load %arg12[%c0_57, %c0_58, %c9_59, %c0_60] : memref<2x10x10x8xbf16, #tpu.memory_space<vmem>>, vector<2x10x1x8xbf16>
    tpu.vector_store %arg12[%c0_57, %c0_58, %c9_59, %c0_60], %49 {strides = array<i32>} : memref<2x10x10x8xbf16, #tpu.memory_space<vmem>>, vector<2x10x1x8xbf16>,
    %54 = arith.truncf %47 : vector<128x8xf32> to vector<128x8xbf16>
    %55 = vector.shape_cast %54 : vector<128x8xbf16> to vector<2x8x8x8xbf16>
    %c0_61 = arith.constant 0 : index
    %c1_62 = arith.constant 1 : index
    %c1_63 = arith.constant 1 : index
    %c0_64 = arith.constant 0 : index
    %56 = vector.load %arg12[%c0_61, %c1_62, %c1_63, %c0_64] : memref<2x10x10x8xbf16, #tpu.memory_space<vmem>>, vector<2x8x8x8xbf16>
    tpu.vector_store %arg12[%c0_61, %c1_62, %c1_63, %c0_64], %55 {strides = array<i32>} : memref<2x10x10x8xbf16, #tpu.memory_space<vmem>>, vector<2x8x8x8xbf16>,
    %c0_65 = arith.constant 0 : index
    %c0_66 = arith.constant 0 : index
    %c0_67 = arith.constant 0 : index
    %c0_68 = arith.constant 0 : index
    %57 = vector.load %arg12[%c0_65, %c0_66, %c0_67, %c0_68] : memref<2x10x10x8xbf16, #tpu.memory_space<vmem>>, vector<2x8x8x8xbf16>
    %58 = vector.shape_cast %57 : vector<2x8x8x8xbf16> to vector<128x8xbf16>
    %c0_69 = arith.constant 0 : index
    %c0_70 = arith.constant 0 : index
    %c1_71 = arith.constant 1 : index
    %c0_72 = arith.constant 0 : index
    %59 = vector.load %arg12[%c0_69, %c0_70, %c1_71, %c0_72] : memref<2x10x10x8xbf16, #tpu.memory_space<vmem>>, vector<2x8x8x8xbf16>
    %60 = vector.shape_cast %59 : vector<2x8x8x8xbf16> to vector<128x8xbf16>
    %c0_73 = arith.constant 0 : index
    %c0_74 = arith.constant 0 : index
    %c2_75 = arith.constant 2 : index
    %c0_76 = arith.constant 0 : index
    %61 = vector.load %arg12[%c0_73, %c0_74, %c2_75, %c0_76] : memref<2x10x10x8xbf16, #tpu.memory_space<vmem>>, vector<2x8x8x8xbf16>
    %62 = vector.shape_cast %61 : vector<2x8x8x8xbf16> to vector<128x8xbf16>
    %c0_77 = arith.constant 0 : index
    %c1_78 = arith.constant 1 : index
    %c0_79 = arith.constant 0 : index
    %c0_80 = arith.constant 0 : index
    %63 = vector.load %arg12[%c0_77, %c1_78, %c0_79, %c0_80] : memref<2x10x10x8xbf16, #tpu.memory_space<vmem>>, vector<2x8x8x8xbf16>
    %64 = vector.shape_cast %63 : vector<2x8x8x8xbf16> to vector<128x8xbf16>
    %c0_81 = arith.constant 0 : index
    %c1_82 = arith.constant 1 : index
    %c1_83 = arith.constant 1 : index
    %c0_84 = arith.constant 0 : index
    %65 = vector.load %arg12[%c0_81, %c1_82, %c1_83, %c0_84] : memref<2x10x10x8xbf16, #tpu.memory_space<vmem>>, vector<2x8x8x8xbf16>
    %66 = vector.shape_cast %65 : vector<2x8x8x8xbf16> to vector<128x8xbf16>
    %c0_85 = arith.constant 0 : index
    %c1_86 = arith.constant 1 : index
    %c2_87 = arith.constant 2 : index
    %c0_88 = arith.constant 0 : index
    %67 = vector.load %arg12[%c0_85, %c1_86, %c2_87, %c0_88] : memref<2x10x10x8xbf16, #tpu.memory_space<vmem>>, vector<2x8x8x8xbf16>
    %68 = vector.shape_cast %67 : vector<2x8x8x8xbf16> to vector<128x8xbf16>
    %c0_89 = arith.constant 0 : index
    %c2_90 = arith.constant 2 : index
    %c0_91 = arith.constant 0 : index
    %c0_92 = arith.constant 0 : index
    %69 = vector.load %arg12[%c0_89, %c2_90, %c0_91, %c0_92] : memref<2x10x10x8xbf16, #tpu.memory_space<vmem>>, vector<2x8x8x8xbf16>
    %70 = vector.shape_cast %69 : vector<2x8x8x8xbf16> to vector<128x8xbf16>
    %c0_93 = arith.constant 0 : index
    %c2_94 = arith.constant 2 : index
    %c1_95 = arith.constant 1 : index
    %c0_96 = arith.constant 0 : index
    %71 = vector.load %arg12[%c0_93, %c2_94, %c1_95, %c0_96] : memref<2x10x10x8xbf16, #tpu.memory_space<vmem>>, vector<2x8x8x8xbf16>
    %72 = vector.shape_cast %71 : vector<2x8x8x8xbf16> to vector<128x8xbf16>
    %c0_97 = arith.constant 0 : index
    %c2_98 = arith.constant 2 : index
    %c2_99 = arith.constant 2 : index
    %c0_100 = arith.constant 0 : index
    %73 = vector.load %arg12[%c0_97, %c2_98, %c2_99, %c0_100] : memref<2x10x10x8xbf16, #tpu.memory_space<vmem>>, vector<2x8x8x8xbf16>
    %74 = vector.shape_cast %73 : vector<2x8x8x8xbf16> to vector<128x8xbf16>
    %75 = tpu.concatenate %58, %60, %62, %64, %66, %68, %70, %72, %74 in 1 : vector<128x8xbf16>, vector<128x8xbf16>, vector<128x8xbf16>, vector<128x8xbf16>, vector<128x8xbf16>, vector<128x8xbf16>, vector<128x8xbf16>, vector<128x8xbf16>, vector<128x8xbf16> -> vector<128x72xbf16>
    %c0_101 = arith.constant 0 : index
    %c0_102 = arith.constant 0 : index
    %76 = vector.load %arg2[%c0_101, %c0_102] : memref<72x8xbf16, #tpu.memory_space<vmem>>, vector<72x8xbf16>
    %cst_103 = arith.constant dense<0.000000e+00> : vector<128x8xf32>
    %77 = tpu.matmul %75, %76, %cst_103 {dimension_numbers = #tpu.dot_dimension_numbers<[1], [0], [0], [1], [0, 0, 1, 1], [], []>} : vector<128x72xbf16>, vector<72x8xbf16>, vector<128x8xf32> -> vector<128x8xf32>
    %c0_104 = arith.constant 0 : index
    %c0_105 = arith.constant 0 : index
    %78 = vector.load %arg5[%c0_104, %c0_105] : memref<1x8xf32, #tpu.memory_space<vmem>>, vector<1x8xf32>
    %c0_106 = arith.constant 0 : index
    %c0_107 = arith.constant 0 : index
    %79 = vector.load %arg6[%c0_106, %c0_107] : memref<1x8xf32, #tpu.memory_space<vmem>>, vector<1x8xf32>
    %cst_108 = arith.constant dense<0.000000e+00> : vector<8xf32>
    %80 = vector.multi_reduction <add>, %77, %cst_108 [0] : vector<128x8xf32> to vector<8xf32>
    %81 = vector.shape_cast %80 : vector<8xf32> to vector<1x8xf32>
    %82 = arith.mulf %77, %77 : vector<128x8xf32>
    %cst_109 = arith.constant dense<0.000000e+00> : vector<8xf32>
    %83 = vector.multi_reduction <add>, %82, %cst_109 [0] : vector<128x8xf32> to vector<8xf32>
    %84 = vector.shape_cast %83 : vector<8xf32> to vector<1x8xf32>
    %cst_110 = arith.constant 7.812500e-03 : f32
    %85 = vector.broadcast %cst_110 : f32 to vector<1x8xf32>
    %86 = arith.mulf %81, %85 : vector<1x8xf32>
    %cst_111 = arith.constant 7.812500e-03 : f32
    %87 = vector.broadcast %cst_111 : f32 to vector<1x8xf32>
    %88 = arith.mulf %84, %87 : vector<1x8xf32>
    %89 = arith.mulf %86, %86 : vector<1x8xf32>
    %90 = arith.subf %88, %89 : vector<1x8xf32>
    %cst_112 = arith.constant 0.000000e+00 : f32
    %91 = vector.broadcast %cst_112 : f32 to vector<1x8xf32>
    %92 = arith.maximumf %90, %91 : vector<1x8xf32>
    %cst_113 = arith.constant 9.99999974E-6 : f32
    %93 = vector.broadcast %cst_113 : f32 to vector<1x8xf32>
    %94 = arith.addf %92, %93 : vector<1x8xf32>
    %95 = math.rsqrt %94 : vector<1x8xf32>
    %96 = arith.mulf %78, %95 : vector<1x8xf32>
    %97 = arith.mulf %86, %96 : vector<1x8xf32>
    %98 = arith.subf %79, %97 : vector<1x8xf32>
    %c6_114 = arith.constant 6 : index
    %c0_115 = arith.constant 0 : index
    %c0_116 = arith.constant 0 : index
    %c0_117 = arith.constant 0 : index
    %99 = vector.load %arg0[%c6_114, %c0_115, %c0_116, %c0_117] : memref<8x9x9x4xbf16, #tpu.memory_space<vmem>>, vector<2x8x8x4xbf16>
    %100 = vector.shape_cast %99 : vector<2x8x8x4xbf16> to vector<128x4xbf16>
    %c0_118 = arith.constant 0 : index
    %c0_119 = arith.constant 0 : index
    %101 = vector.load %arg7[%c0_118, %c0_119] : memref<4x8xbf16, #tpu.memory_space<vmem>>, vector<4x8xbf16>
    %cst_120 = arith.constant dense<0.000000e+00> : vector<128x8xf32>
    %102 = tpu.matmul %100, %101, %cst_120 {dimension_numbers = #tpu.dot_dimension_numbers<[1], [0], [0], [1], [0, 0, 1, 1], [], []>} : vector<128x4xbf16>, vector<4x8xbf16>, vector<128x8xf32> -> vector<128x8xf32>
    %c0_121 = arith.constant 0 : index
    %c0_122 = arith.constant 0 : index
    %103 = vector.load %arg8[%c0_121, %c0_122] : memref<1x8xf32, #tpu.memory_space<vmem>>, vector<1x8xf32>
    %c0_123 = arith.constant 0 : index
    %c0_124 = arith.constant 0 : index
    %104 = vector.load %arg9[%c0_123, %c0_124] : memref<1x8xf32, #tpu.memory_space<vmem>>, vector<1x8xf32>
    %cst_125 = arith.constant dense<0.000000e+00> : vector<8xf32>
    %105 = vector.multi_reduction <add>, %102, %cst_125 [0] : vector<128x8xf32> to vector<8xf32>
    %106 = vector.shape_cast %105 : vector<8xf32> to vector<1x8xf32>
    %107 = arith.mulf %102, %102 : vector<128x8xf32>
    %cst_126 = arith.constant dense<0.000000e+00> : vector<8xf32>
    %108 = vector.multi_reduction <add>, %107, %cst_126 [0] : vector<128x8xf32> to vector<8xf32>
    %109 = vector.shape_cast %108 : vector<8xf32> to vector<1x8xf32>
    %cst_127 = arith.constant 7.812500e-03 : f32
    %110 = vector.broadcast %cst_127 : f32 to vector<1x8xf32>
    %111 = arith.mulf %106, %110 : vector<1x8xf32>
    %cst_128 = arith.constant 7.812500e-03 : f32
    %112 = vector.broadcast %cst_128 : f32 to vector<1x8xf32>
    %113 = arith.mulf %109, %112 : vector<1x8xf32>
    %114 = arith.mulf %111, %111 : vector<1x8xf32>
    %115 = arith.subf %113, %114 : vector<1x8xf32>
    %cst_129 = arith.constant 0.000000e+00 : f32
    %116 = vector.broadcast %cst_129 : f32 to vector<1x8xf32>
    %117 = arith.maximumf %115, %116 : vector<1x8xf32>
    %cst_130 = arith.constant 9.99999974E-6 : f32
    %118 = vector.broadcast %cst_130 : f32 to vector<1x8xf32>
    %119 = arith.addf %117, %118 : vector<1x8xf32>
    %120 = math.rsqrt %119 : vector<1x8xf32>
    %121 = arith.mulf %103, %120 : vector<1x8xf32>
    %122 = arith.mulf %111, %121 : vector<1x8xf32>
    %123 = arith.subf %104, %122 : vector<1x8xf32>
    %124 = vector.broadcast %96 : vector<1x8xf32> to vector<128x8xf32>
    %125 = arith.mulf %77, %124 : vector<128x8xf32>
    %126 = vector.broadcast %121 : vector<1x8xf32> to vector<128x8xf32>
    %127 = arith.mulf %102, %126 : vector<128x8xf32>
    %128 = arith.addf %125, %127 : vector<128x8xf32>
    %129 = arith.addf %98, %123 : vector<1x8xf32>
    %130 = vector.broadcast %129 : vector<1x8xf32> to vector<128x8xf32>
    %131 = arith.addf %128, %130 : vector<128x8xf32>
    %cst_131 = arith.constant 0.000000e+00 : f32
    %132 = vector.broadcast %cst_131 : f32 to vector<128x8xf32>
    %133 = arith.maximumf %131, %132 : vector<128x8xf32>
    %134 = tpu.transpose %133, [1, 0] : vector<128x8xf32> -> vector<8x128xf32>
    %c0_132 = arith.constant 0 : index
    %c0_133 = arith.constant 0 : index
    %135 = vector.load %arg10[%c0_132, %c0_133] : memref<8x128xf32, #tpu.memory_space<vmem>>, vector<8x128xf32>
    tpu.vector_store %arg10[%c0_132, %c0_133], %134 {strides = array<i32>} : memref<8x128xf32, #tpu.memory_space<vmem>>, vector<8x128xf32>,
    %136 = tpu.transpose %131, [1, 0] : vector<128x8xf32> -> vector<8x128xf32>
    %c0_134 = arith.constant 0 : index
    %c0_135 = arith.constant 0 : index
    %137 = vector.load %arg11[%c0_134, %c0_135] : memref<8x128xf32, #tpu.memory_space<vmem>>, vector<8x128xf32>
    tpu.vector_store %arg11[%c0_134, %c0_135], %136 {strides = array<i32>} : memref<8x128xf32, #tpu.memory_space<vmem>>, vector<8x128xf32>,
    return
  }
}

</mosaic_0001>

<bundles_post_ra>
// kernel: _forward_impl.1
= control target key start
LH: loop header
LB: loop body
LE: loop exit
PB: predicated region body
PF: predicated region fallthrough
CT: control target
= control target key end

     0   :  { %s5151_s23 = smov 4   ;;  %vm87_vm0 = vsmask.f32 3328  ;;  %vm88_vm1 = vsmask.f32 7440  ;;  %s5152_s26 = smov 12   ;;  %s7922_s0 = inlined_call_operand.vmem [shape: bf16[8,9,9,4], index: 0, kind: input, shape index: {}]   ;;  %s7923_s1 = inlined_call_operand.vmem [shape: bf16[36,8], index: 1, kind: input, shape index: {}]   ;;  %s7924_s3 = inlined_call_operand.vmem [shape: f32[1,8], index: 3, kind: input, shape index: {}, may-alias: {3,5,8}]   ;;  %s7925_s4 = inlined_call_operand.vmem [shape: f32[1,8], index: 4, kind: input, shape index: {}, may-alias: {4,6,9}]   ;;  %s7926_s7 = inlined_call_operand.vmem [shape: bf16[4,8], index: 7, kind: input, shape index: {}]   ;;  %s7927_s2 = inlined_call_operand.vmem [shape: bf16[72,8], index: 2, kind: input, shape index: {}]   ;;  %s7928_s8 = inlined_call_operand.vmem [shape: f32[1,8], index: 8, kind: input, shape index: {}, may-alias: {3,5,8}]   ;;  %s7929_s5 = inlined_call_operand.vmem [shape: f32[1,8], index: 5, kind: input, shape index: {}, may-alias: {3,5,8}]   ;;  %s7930_s9 = inlined_call_operand.vmem [shape: f32[1,8], index: 9, kind: input, shape index: {}, may-alias: {4,6,9}]   ;;  %s7931_s6 = inlined_call_operand.vmem [shape: f32[1,8], index: 6, kind: input, shape index: {}, may-alias: {4,6,9}]   ;;  %s7932_s11 = inlined_call_operand.vmem [shape: f32[8,128], index: 11, kind: output, shape index: {1}]   ;;  %s7933_s10 = inlined_call_operand.vmem [shape: f32[8,128], index: 10, kind: output, shape index: {0}]  }
   0x1   :  { %v5055_v0 = vld [vmem:[%s7922_s0 + $0x90] ss:$8 sps:$4 sm:$0xff]   ;;  %v5057_v8 = vld [vmem:[%s7922_s0 + $0xa0] ss:$8 sps:$4 sm:$0xff]   ;;  %v71_v25 = vld [vmem:[%s7922_s0 + $0x4] sm:$0x1] }
   0x2   :  { %v4559_v1 = vld [vmem:[%s7922_s0 + $0x130] sm:$0xf]  ;;  %v4560_v2 = vld [vmem:[%s7922_s0 + $0x138] sm:$0xf]  ;;  %942 = vrot.lane.b32.xlu0 %v5055_v0, %s5151_s23  ;;  %v5058_v13 = vld [vmem:[%s7922_s0 + $0x1c0] ss:$8 sps:$4 sm:$0xff]  }
   0x3   :  { %v407_v3 = vshrl.u32 %v4560_v2, 16  ;;  %v410_v4 = vshll.u32 %v4560_v2, 16  ;;  %v4678_v5 = vcombine.low %v4559_v1, %v4560_v2  ;;  %v393_v6 = vshrl.u32 %v4559_v1, 16  ;;  %v4557_v14 = vld [vmem:[%s7922_s0 + $0x120] sm:$0xf]  ;;  %s5153_s20 = smov 16   ;;  %vm5299_vm2 = vmor %vm87_vm0, %vm88_vm1 }
   0x4   :  { %v396_v7 = vshll.u32 %v4559_v1, 16  ;;  %v4558_v16 = vld [vmem:[%s7922_s0 + $0x128] sm:$0xf]  ;;  %v365_v17 = vshrl.u32 %v4557_v14, 16  ;;  %v368_v18 = vshll.u32 %v4557_v14, 16  ;;  %v100_v36 = vshll.u32 %v71_v25, 16 }
   0x5   :  { %v409_v9 = vrot.slane %v407_v3, 4  ;;  %v412_v10 = vrot.slane %v410_v4, 5  ;;  %1040 = vrot.lane.b32.xlu1 %v4678_v5, %s5152_s26  ;;  %v395_v11 = vrot.slane %v393_v6, 4  ;;  %v5251_v19 = vld [vmem:[%s7922_s0] sm:$0xf]  ;;  %v379_v21 = vshrl.u32 %v4558_v16, 16 }
   0x6   :  { %v398_v12 = vrot.slane %v396_v7, 5  ;;  %944 = vrot.lane.b32.xlu0 %v5057_v8, %s5151_s23  ;;  %v382_v22 = vshll.u32 %v4558_v16, 16  ;;  %v4677_v23 = vcombine.low %v4557_v14, %v4558_v16  ;;  %v5256_v24 = vld [vmem:[%s7922_s0 + $0x8] sm:$0xf]  ;;  %v367_v27 = vrot.slane %v365_v17, 4  ;;  %s5154_s12 = smov 8  }
   0x7   :  { %v413_v15 = vor.u32 %v412_v10, %v409_v9  ;;  %v370_v28 = vrot.slane %v368_v18, 5  ;;  %v72_v29 = vld [vmem:[%s7922_s0 + $0xc] sm:$0x1]  ;;  %v91_v30 = vshrl.u32 %v5251_v19, 16  ;;  %v381_v32 = vrot.slane %v379_v21, 4  ;;  %s5155_s25 = smov 20  }
   0x8   :  { %v399_v20 = vor.u32 %v398_v12, %v395_v11  ;;  %v384_v33 = vrot.slane %v382_v22, 5  ;;  %v94_v34 = vshll.u32 %v5251_v19, 16  ;;  %v105_v37 = vshrl.u32 %v5256_v24, 16  ;;  %v5060_v41 = vld [vmem:[%s7922_s0 + $0x1b0] ss:$8 sps:$4 sm:$0xff]   ;;  %s5156_s17 = smov 24  }
   0x9   :  { %v5261_v26 = vrot.slane %v413_v15, 4  ;;  %1096 = vrot.lane.b32.xlu1 %v5058_v13, %s5153_s20  ;;  %v93_v35 = vrot.slane %v91_v30, 4  ;;  %v108_v38 = vshll.u32 %v5256_v24, 16  ;;  %v114_v40 = vshll.u32 %v72_v29, 16  ;;  %v5280_v42 = vld [vmem:[%s7922_s0 + $0x10] sm:$0xf] }
   0xa   :  { %v5268_v31 = vrot.slane %v399_v20, 4  ;;  %1038 = vrot.lane.b32.xlu0 %v4677_v23, %s5152_s26  ;;  %v96_v39 = vrot.slane %v94_v34, 5  ;;  %v371_v43 = vor.u32 %v370_v28, %v367_v27  ;;  %v385_v44 = vor.u32 %v384_v33, %v381_v32  ;;  %v5285_v48 = vld [vmem:[%s7922_s0 + $0x18] sm:$0xf]  ;;  %v73_v52 = vld [vmem:[%s7922_s0 + $0x14] sm:$0x1] }
   0xb   :  { %v102_v45 = vrot.slane %v100_v36, 5  ;;  %v107_v46 = vrot.slane %v105_v37, 4  ;;  %v110_v47 = vrot.slane %v108_v38, 5  ;;  %v119_v49 = vshrl.u32 %v5280_v42, 16  ;;  %v74_v53 = vld [vmem:[%s7922_s0 + $0x1c] sm:$0x1] }
   0xc   :  { %v97_v50 = vor.u32 %v96_v39, %v93_v35  ;;  %v116_v51 = vrot.slane %v114_v40, 5  ;;  %v122_v54 = vshll.u32 %v5280_v42, 16  ;;  %v4653_v55 = vcombine.low %v5251_v19, %v5256_v24  ;;  %v4589_v61 = vld [vmem:[%s7922_s0 + $0x124] sm:$0x1]  ;;  %v4590_v2 = vld [vmem:[%s7922_s0 + $0x12c] sm:$0x1] }
   0xd   :  { %v111_v57 = vor.u32 %v110_v47, %v107_v46  ;;  %v121_v58 = vrot.slane %v119_v49, 4  ;;  %v128_v59 = vshll.u32 %v73_v52, 16  ;;  %v133_v60 = vshrl.u32 %v5285_v48, 16  ;;  %v4591_v7 = vld [vmem:[%s7922_s0 + $0x134] sm:$0x1]  ;;  %v5097_v35 = vld [vmem:[%s7923_s1] sm:$0xff]  }
   0xe   :  { %1094 = vrot.lane.b32.xlu0 %v5060_v41, %s5153_s20  ;;  %v98_v62 = vrot.slane %v97_v50, 4  ;;  %v124_v63 = vrot.slane %v122_v54, 5  ;;  %v136_v0 = vshll.u32 %v5285_v48, 16  ;;  %v142_v1 = vshll.u32 %v74_v53, 16  ;;  %v4592_v12 = vld [vmem:[%s7922_s0 + $0x13c] sm:$0x1]  ;;  %4966 = vmatprep.subr.bf16.mxu0 %v5097_v35 }
   0xf   :  { %v112_v3 = vrot.slane %v111_v57, 4  ;;  %v130_v4 = vrot.slane %v128_v59, 5  ;;  %v135_v5 = vrot.slane %v133_v60, 4  ;;  %v372_v6 = vrot.slane %v371_v43, 4  ;;  %v5323_v13 = vld [vmem:[%s7922_s0 + $0x8] sm:$0xf]  ;;  %5032 = vmatprep.subr.bf16.mxu1 %v5097_v35  ;;  %4967 = vmatpush3.bf16.msra.mxu0 %v5097_v35 }
  0x10   :  { %v103_v8 = vsel %vm5299_vm2, %v98_v62, %v102_v45  ;;  %v125_v9 = vor.u32 %v124_v63, %v121_v58  ;;  %v138_v10 = vrot.slane %v136_v0, 5  ;;  %v144_v11 = vrot.slane %v142_v1, 5  ;;  %v4606_v23 = vld [vmem:[%s7922_s0 + $0x10] sm:$0xf]  ;;  %v5345_v40 = vld [vmem:[%s7922_s0 + $0x18] sm:$0xf]  ;;  %5035 = vmatpush3.bf16.msra.mxu1 %v5097_v35 }
  0x11   :  { %v117_v14 = vsel %vm5299_vm2, %v112_v3, %v116_v51  ;;  %v374_v15 = vshll.u32 %v4589_v61, 16  ;;  %v386_v16 = vrot.slane %v385_v44, 4  ;;  %v388_v17 = vshll.u32 %v4590_v2, 16  ;;  %v5355_v46 = vld [vmem:[%s7922_s0 + $0x20] sm:$0xf]  ;;  %v5098_v47 = vld [vmem:[%s7923_s1 + $0x8] sm:$0xff]  }
  0x12   :  { %v4669_v18 = vcombine.low %v103_v8, %v117_v14  ;;  %v126_v20 = vrot.slane %v125_v9, 4  ;;  %v139_v21 = vor.u32 %v138_v10, %v135_v5  ;;  %v402_v22 = vshll.u32 %v4591_v7, 16  ;;  %4968 = vmatprep.subr.bf16.mxu0 %v5098_v47  ;;  %v4638_v62 = vld [vmem:[%s7922_s0 + $0x14] sm:$0x1]  ;;  %5033 = vmatprep.subr.bf16.mxu1 %v5098_v47  ;;  %v5063_v2 = vld [vmem:[%s7922_s0 + $0x98] ss:$8 sps:$4 sm:$0xff]  }
  0x13   :  { %v376_v25 = vrot.slane %v374_v15, 5  ;;  %v390_v27 = vrot.slane %v388_v17, 5  ;;  %v416_v28 = vshll.u32 %v4592_v12, 16  ;;  %v639_v29 = vshrl.u32 %v5323_v13, 16  ;;  %v4640_v5 = vld [vmem:[%s7922_s0 + $0x24] sm:$0x1]  ;;  %4969 = vmatpush3.bf16.msra.mxu0 %v5098_v47 }
  0x14   :  { %982 = vrot.lane.b32.xlu1 %v4669_v18, %s5154_s12  ;;  %v131_v30 = vsel %vm5299_vm2, %v126_v20, %v130_v4  ;;  %v140_v32 = vrot.slane %v139_v21, 4  ;;  %v404_v33 = vrot.slane %v402_v22, 5  ;;  %v642_v34 = vshll.u32 %v5323_v13, 16  ;;  %v4639_v4 = vld [vmem:[%s7922_s0 + $0x1c] sm:$0x1]  ;;  %5036 = vmatpush3.bf16.msra.mxu1 %v5098_v47  ;;  %s5157_s28 = smov 28  }
  0x15   :  { %v377_v36 = vsel %vm5299_vm2, %v372_v6, %v376_v25  ;;  %v391_v37 = vsel %vm5299_vm2, %v386_v16, %v390_v27  ;;  %v418_v38 = vrot.slane %v416_v28, 5  ;;  %v641_v39 = vrot.slane %v639_v29, 4  ;;  %v5392_v22 = vld [vmem:[%s7922_s0 + $0x20] sm:$0xf]  ;;  %v5399_v28 = vld [vmem:[%s7922_s0 + $0x28] sm:$0xf] }
  0x16   :  { %v145_v41 = vsel %vm5299_vm2, %v140_v32, %v144_v11  ;;  %v4693_v43 = vcombine.low %v377_v36, %v391_v37  ;;  %v405_v44 = vsel %vm5299_vm2, %v5268_v31, %v404_v33  ;;  %v644_v45 = vrot.slane %v642_v34, 5  ;;  %v4637_v31 = vld [vmem:[%s7922_s0 + $0xc] sm:$0x1]  ;;  %v75_v29 = vld [vmem:[%s7922_s0 + $0x24] sm:$0x1]  ;;  %s5158_s29 = smov 32  }
  0x17   :  { %v4670_v49 = vcombine.low %v131_v30, %v145_v41  ;;  %v419_v50 = vsel %vm5299_vm2, %v5261_v26, %v418_v38  ;;  %v653_v51 = vshrl.u32 %v4606_v23, 16  ;;  %v656_v52 = vshll.u32 %v4606_v23, 16  ;;  %v76_v34 = vld [vmem:[%s7922_s0 + $0x2c] sm:$0x1]  ;;  %v5419_v37 = vld [vmem:[%s7922_s0 + $0x30] sm:$0xf] }
  0x18   :  { %1134 = vrot.lane.b32.xlu0 %v4693_v43, %s5155_s25  ;;  %v4694_v53 = vcombine.low %v405_v44, %v419_v50  ;;  %v4701_v54 = vcombine.low %v5323_v13, %v4606_v23  ;;  %v667_v57 = vshrl.u32 %v5345_v40, 16  ;;  %v670_v58 = vshll.u32 %v5345_v40, 16  ;;  %v5064_v38 = vld [vmem:[%s7922_s0 + $0xa8] ss:$8 sps:$4 sm:$0xff]   ;;  %v77_v44 = vld [vmem:[%s7922_s0 + $0x34] sm:$0x1] }
  0x19   :  { %984 = vrot.lane.b32.xlu1 %v4670_v49, %s5154_s12  ;;  %v655_v26 = vrot.slane %v653_v51, 4  ;;  %v658_v59 = vrot.slane %v656_v52, 5  ;;  %v681_v60 = vshrl.u32 %v5355_v46, 16  ;;  %v684_v61 = vshll.u32 %v5355_v46, 16  ;;  %v5435_v50 = vld [vmem:[%s7922_s0 + $0x38] sm:$0xf] }
  0x1a   :  { %v669_v63 = vrot.slane %v667_v57, 4  ;;  %v672_v0 = vrot.slane %v670_v58, 5  ;;  %v4702_v1 = vcombine.low %v5345_v40, %v5355_v46  ;;  %v645_v3 = vor.u32 %v644_v45, %v641_v39  ;;  %s5162_s14 = smov 64  }
  0x1b   :  { %v683_v6 = vrot.slane %v681_v60, 4  ;;  %v686_v7 = vrot.slane %v684_v61, 5  ;;  %v648_v8 = vshll.u32 %v4637_v31, 16  ;;  %v659_v9 = vor.u32 %v658_v59, %v655_v26  ;;  %v5446_v60 = vld [vmem:[%s7922_s0 + $0x140] sm:$0xf] }
  0x1c   :  { %1190 = vrot.lane.b32.xlu0 %v4701_v54, %s5156_s17  ;;  %v646_v10 = vrot.slane %v645_v3, 4  ;;  %v662_v11 = vshll.u32 %v4638_v62, 16  ;;  %v673_v12 = vor.u32 %v672_v0, %v669_v63  ;;  %v676_v13 = vshll.u32 %v4639_v4, 16  ;;  %v5065_v61 = vld [vmem:[%s7922_s0 + $0xb0] ss:$8 sps:$4 sm:$0xff]  }
  0x1d   :  { %1136 = vrot.lane.b32.xlu1 %v4694_v53, %s5155_s25  ;;  %v650_v14 = vrot.slane %v648_v8, 5  ;;  %v660_v15 = vrot.slane %v659_v9, 4  ;;  %v687_v16 = vor.u32 %v686_v7, %v683_v6  ;;  %v690_v17 = vshll.u32 %v4640_v5, 16  ;;  %v78_v53 = vld [vmem:[%s7922_s0 + $0x3c] sm:$0x1] }
  0x1e   :  { %v664_v18 = vrot.slane %v662_v11, 5  ;;  %v674_v20 = vrot.slane %v673_v12, 4  ;;  %v678_v21 = vrot.slane %v676_v13, 5  ;;  %v4654_v30 = vcombine.low %v5280_v42, %v5285_v48  ;;  %v4562_v6 = vld [vmem:[%s7922_s0 + $0x148] sm:$0xf] }
  0x1f   :  { %v651_v23 = vsel %vm5299_vm2, %v646_v10, %v650_v14  ;;  %v688_v25 = vrot.slane %v687_v16, 4  ;;  %v692_v27 = vrot.slane %v690_v17, 5  ;;  %v147_v35 = vshrl.u32 %v5392_v22, 16  ;;  %v5066_v7 = vld [vmem:[%s7922_s0 + $0xc0] ss:$8 sps:$4 sm:$0xff]  }
  0x20   :  { %1246 = vrot.lane.b32.xlu0 %v5063_v2, %s5157_s28  ;;  %v665_v32 = vsel %vm5299_vm2, %v660_v15, %v664_v18  ;;  %v679_v33 = vsel %vm5299_vm2, %v674_v20, %v678_v21  ;;  %v150_v36 = vshll.u32 %v5392_v22, 16  ;;  %v156_v41 = vshll.u32 %v75_v29, 16  ;;  %v5464_v12 = vld [vmem:[%s7922_s0 + $0x150] sm:$0xf]  ;;  %v5473_v17 = vld [vmem:[%s7922_s0 + $0x158] sm:$0xf] }
  0x21   :  { %1192 = vrot.lane.b32.xlu1 %v4702_v1, %s5156_s17  ;;  %v4717_v39 = vcombine.low %v651_v23, %v665_v32  ;;  %v693_v40 = vsel %vm5299_vm2, %v688_v25, %v692_v27  ;;  %v161_v43 = vshrl.u32 %v5399_v28, 16  ;;  %v149_v46 = vrot.slane %v147_v35, 4 }
  0x22   :  { %v4718_v45 = vcombine.low %v679_v33, %v693_v40  ;;  %v152_v47 = vrot.slane %v150_v36, 5  ;;  %v164_v49 = vshll.u32 %v5399_v28, 16  ;;  %v158_v51 = vrot.slane %v156_v41, 5 }
  0x23   :  { %v163_v52 = vrot.slane %v161_v43, 4  ;;  %v170_v31 = vshll.u32 %v76_v34, 16  ;;  %v175_v54 = vshrl.u32 %v5419_v37, 16  ;;  %v178_v26 = vshll.u32 %v5419_v37, 16  ;;  %v4593_v43 = vld [vmem:[%s7922_s0 + $0x144] sm:$0x1] }
  0x24   :  { %1286 = vrot.lane.b32.xlu0 %v4717_v39, %s5158_s29  ;;  %v153_v57 = vor.u32 %v152_v47, %v149_v46  ;;  %v166_v58 = vrot.slane %v164_v49, 5  ;;  %v184_v59 = vshll.u32 %v77_v44, 16  ;;  %v189_v0 = vshrl.u32 %v5435_v50, 16  ;;  %v4594_v49 = vld [vmem:[%s7922_s0 + $0x14c] sm:$0x1] }
  0x25   :  { %1248 = vrot.lane.b32.xlu1 %v5064_v38, %s5157_s28  ;;  %v172_v62 = vrot.slane %v170_v31, 5  ;;  %v177_v63 = vrot.slane %v175_v54, 4  ;;  %v192_v1 = vshll.u32 %v5435_v50, 16  ;;  %v180_v4 = vrot.slane %v178_v26, 5 }
  0x26   :  { %v154_v2 = vrot.slane %v153_v57, 4  ;;  %v167_v3 = vor.u32 %v166_v58, %v163_v52  ;;  %v186_v5 = vrot.slane %v184_v59, 5  ;;  %v191_v8 = vrot.slane %v189_v0, 4  ;;  %v4596_v57 = vld [vmem:[%s7922_s0 + $0x15c] sm:$0x1] }
  0x27   :  { %v194_v9 = vrot.slane %v192_v1, 5  ;;  %v198_v10 = vshll.u32 %v78_v53, 16  ;;  %v421_v11 = vshrl.u32 %v5446_v60, 16  ;;  %v181_v15 = vor.u32 %v180_v4, %v177_v63  ;;  %v5069_v59 = vld [vmem:[%s7922_s0 + $0x1d0] ss:$8 sps:$4 sm:$0xff]  }
  0x28   :  { %1288 = vrot.lane.b32.xlu0 %v4718_v45, %s5158_s29  ;;  %v159_v13 = vsel %vm5299_vm2, %v154_v2, %v158_v51  ;;  %v168_v14 = vrot.slane %v167_v3, 4  ;;  %v424_v16 = vshll.u32 %v5446_v60, 16  ;;  %v435_v23 = vshrl.u32 %v4562_v6, 16  ;;  %v4595_v51 = vld [vmem:[%s7922_s0 + $0x154] sm:$0x1] }
  0x29   :  { %946 = vrot.lane.b32.xlu1 %v5065_v61, %s5151_s23  ;;  %v195_v18 = vor.u32 %v194_v9, %v191_v8  ;;  %v200_v20 = vrot.slane %v198_v10, 5  ;;  %v423_v21 = vrot.slane %v421_v11, 4  ;;  %v182_v27 = vrot.slane %v181_v15, 4  ;;  %v5514_v3 = vld [vmem:[%s7922_s0 + $0x30] sm:$0xf] }
  0x2a   :  { %v173_v25 = vsel %vm5299_vm2, %v168_v14, %v172_v62  ;;  %v426_v29 = vrot.slane %v424_v16, 5  ;;  %v438_v32 = vshll.u32 %v4562_v6, 16  ;;  %v437_v35 = vrot.slane %v435_v23, 4  ;;  %v5509_v62 = vld [vmem:[%s7922_s0 + $0x28] sm:$0xf] }
  0x2b   :  { %v4671_v33 = vcombine.low %v159_v13, %v173_v25  ;;  %v196_v34 = vrot.slane %v195_v18, 4  ;;  %v4679_v36 = vcombine.low %v5446_v60, %v4562_v6  ;;  %v187_v38 = vsel %vm5299_vm2, %v182_v27, %v186_v5  ;;  %v5521_v8 = vld [vmem:[%s7922_s0 + $0x38] sm:$0xf]  ;;  %v5070_v25 = vld [vmem:[%s7922_s0 + $0x1e0] ss:$8 sps:$4 sm:$0xff]  }
  0x2c   :  { %v440_v39 = vrot.slane %v438_v32, 5  ;;  %v449_v40 = vshrl.u32 %v5464_v12, 16  ;;  %v452_v41 = vshll.u32 %v5464_v12, 16  ;;  %v463_v45 = vshrl.u32 %v5473_v17, 16 }
  0x2d   :  { %948 = vrot.lane.b32.xlu1 %v5066_v7, %s5151_s23  ;;  %986 = vrot.lane.b32.xlu0 %v4671_v33, %s5154_s12  ;;  %v201_v44 = vsel %vm5299_vm2, %v196_v34, %v200_v20  ;;  %v466_v46 = vshll.u32 %v5473_v17, 16  ;;  %v4680_v47 = vcombine.low %v5464_v12, %v5473_v17  ;;  %v427_v54 = vor.u32 %v426_v29, %v423_v21  ;;  %v5530_v17 = vld [vmem:[%s7922_s0 + $0x40] sm:$0xf]  ;;  %v4641_v34 = vld [vmem:[%s7922_s0 + $0x2c] sm:$0x1] }
  0x2e   :  { %v4672_v52 = vcombine.low %v187_v38, %v201_v44  ;;  %v451_v31 = vrot.slane %v449_v40, 4  ;;  %v454_v53 = vrot.slane %v452_v41, 5  ;;  %v465_v58 = vrot.slane %v463_v45, 4  ;;  %v4642_v40 = vld [vmem:[%s7922_s0 + $0x34] sm:$0x1] }
  0x2f   :  { %v468_v26 = vrot.slane %v466_v46, 5  ;;  %v430_v60 = vshll.u32 %v4593_v43, 16  ;;  %v441_v61 = vor.u32 %v440_v39, %v437_v35  ;;  %v428_v63 = vrot.slane %v427_v54, 4 }
  0x30   :  { %v444_v0 = vshll.u32 %v4594_v49, 16  ;;  %v455_v1 = vor.u32 %v454_v53, %v451_v31  ;;  %v458_v2 = vshll.u32 %v4595_v51, 16  ;;  %v472_v7 = vshll.u32 %v4596_v57, 16 }
  0x31   :  { %988 = vrot.lane.b32.xlu1 %v4672_v52, %s5154_s12  ;;  %1042 = vrot.lane.b32.xlu0 %v4679_v36, %s5152_s26  ;;  %v432_v4 = vrot.slane %v430_v60, 5  ;;  %v442_v5 = vrot.slane %v441_v61, 4  ;;  %v469_v6 = vor.u32 %v468_v26, %v465_v58  ;;  %v695_v12 = vshrl.u32 %v5509_v62, 16  ;;  %v4643_v52 = vld [vmem:[%s7922_s0 + $0x3c] sm:$0x1] }
  0x32   :  { %v446_v9 = vrot.slane %v444_v0, 5  ;;  %v456_v10 = vrot.slane %v455_v1, 4  ;;  %v460_v11 = vrot.slane %v458_v2, 5  ;;  %v474_v15 = vrot.slane %v472_v7, 5  ;;  %v4644_v58 = vld [vmem:[%s7922_s0 + $0x44] sm:$0x1] }
  0x33   :  { %v433_v13 = vsel %vm5299_vm2, %v428_v63, %v432_v4  ;;  %v470_v14 = vrot.slane %v469_v6, 4  ;;  %v698_v16 = vshll.u32 %v5509_v62, 16  ;;  %v697_v21 = vrot.slane %v695_v12, 4  ;;  %v5575_v6 = vld [vmem:[%s7922_s0 + $0x48] sm:$0xf] }
  0x34   :  { %v447_v18 = vsel %vm5299_vm2, %v442_v5, %v446_v9  ;;  %v461_v20 = vsel %vm5299_vm2, %v456_v10, %v460_v11  ;;  %v709_v23 = vshrl.u32 %v5514_v3, 16  ;;  %v712_v33 = vshll.u32 %v5514_v3, 16  ;;  %v5580_v7 = vld [vmem:[%s7922_s0 + $0x50] sm:$0xf]  ;;  %v79_v12 = vld [vmem:[%s7922_s0 + $0x4c] sm:$0x1] }
  0x35   :  { %1044 = vrot.lane.b32.xlu1 %v4680_v47, %s5152_s26  ;;  %1098 = vrot.lane.b32.xlu0 %v5069_v59, %s5153_s20  ;;  %v4695_v27 = vcombine.low %v433_v13, %v447_v18  ;;  %v475_v29 = vsel %vm5299_vm2, %v470_v14, %v474_v15  ;;  %v700_v32 = vrot.slane %v698_v16, 5  ;;  %v4703_v38 = vcombine.low %v5509_v62, %v5514_v3  ;;  %v5073_v62 = vld [vmem:[%s7922_s0 + $0xb8] ss:$8 sps:$4 sm:$0xff]   ;;  %v80_v15 = vld [vmem:[%s7922_s0 + $0x54] sm:$0x1] }
  0x36   :  { %v4696_v35 = vcombine.low %v461_v20, %v475_v29  ;;  %v711_v36 = vrot.slane %v709_v23, 4  ;;  %v723_v39 = vshrl.u32 %v5521_v8, 16  ;;  %v714_v41 = vrot.slane %v712_v33, 5  ;;  %v5074_v20 = vld [vmem:[%s7922_s0 + $0xc8] ss:$8 sps:$4 sm:$0xff]  }
  0x37   :  { %v726_v43 = vshll.u32 %v5521_v8, 16  ;;  %v737_v44 = vshrl.u32 %v5530_v17, 16  ;;  %v740_v45 = vshll.u32 %v5530_v17, 16  ;;  %v4704_v47 = vcombine.low %v5521_v8, %v5530_v17  ;;  %v5607_v29 = vld [vmem:[%s7922_s0 + $0x58] sm:$0xf] }
  0x38   :  { %v725_v46 = vrot.slane %v723_v39, 4  ;;  %v701_v49 = vor.u32 %v700_v32, %v697_v21  ;;  %v704_v51 = vshll.u32 %v4641_v34, 16  ;;  %v715_v57 = vor.u32 %v714_v41, %v711_v36  ;;  %v5612_v32 = vld [vmem:[%s7922_s0 + $0x60] sm:$0xf]  ;;  %v82_v41 = vld [vmem:[%s7922_s0 + $0x64] sm:$0x1] }
  0x39   :  { %1100 = vrot.lane.b32.xlu1 %v5070_v25, %s5153_s20  ;;  %1138 = vrot.lane.b32.xlu0 %v4695_v27, %s5155_s25  ;;  %v728_v31 = vrot.slane %v726_v43, 5  ;;  %v739_v53 = vrot.slane %v737_v44, 4  ;;  %v742_v54 = vrot.slane %v740_v45, 5  ;;  %v718_v60 = vshll.u32 %v4642_v40, 16 }
  0x3a   :  { %v702_v26 = vrot.slane %v701_v49, 4  ;;  %v706_v59 = vrot.slane %v704_v51, 5  ;;  %v732_v61 = vshll.u32 %v4643_v52, 16  ;;  %v716_v63 = vrot.slane %v715_v57, 4  ;;  %v5635_v57 = vld [vmem:[%s7922_s0 + $0x170] sm:$0xf] }
  0x3b   :  { %v729_v0 = vor.u32 %v728_v31, %v725_v46  ;;  %v743_v1 = vor.u32 %v742_v54, %v739_v53  ;;  %v746_v2 = vshll.u32 %v4644_v58, 16  ;;  %v720_v4 = vrot.slane %v718_v60, 5  ;;  %v5075_v58 = vld [vmem:[%s7922_s0 + $0xd8] ss:$8 sps:$4 sm:$0xff]  }
  0x3c   :  { %v707_v3 = vsel %vm5299_vm2, %v702_v26, %v706_v59  ;;  %v734_v5 = vrot.slane %v732_v61, 5  ;;  %v4655_v8 = vcombine.low %v5392_v22, %v5399_v28  ;;  %v203_v13 = vshrl.u32 %v5575_v6, 16 }
  0x3d   :  { %1140 = vrot.lane.b32.xlu1 %v4696_v35, %s5155_s25  ;;  %1194 = vrot.lane.b32.xlu0 %v4703_v38, %s5156_s17  ;;  %v730_v9 = vrot.slane %v729_v0, 4  ;;  %v744_v10 = vrot.slane %v743_v1, 4  ;;  %v748_v11 = vrot.slane %v746_v2, 5  ;;  %v721_v14 = vsel %vm5299_vm2, %v716_v63, %v720_v4  ;;  %v81_v38 = vld [vmem:[%s7922_s0 + $0x5c] sm:$0x1] }
  0x3e   :  { %v206_v16 = vshll.u32 %v5575_v6, 16  ;;  %v212_v17 = vshll.u32 %v79_v12, 16  ;;  %v217_v18 = vshrl.u32 %v5580_v7, 16  ;;  %v4719_v21 = vcombine.low %v707_v3, %v721_v14  ;;  %v5646_v2 = vld [vmem:[%s7922_s0 + $0x178] sm:$0xf] }
  0x3f   :  { %v735_v23 = vsel %vm5299_vm2, %v730_v9, %v734_v5  ;;  %v749_v25 = vsel %vm5299_vm2, %v744_v10, %v748_v11  ;;  %v205_v27 = vrot.slane %v203_v13, 4  ;;  %v220_v39 = vshll.u32 %v5580_v7, 16  ;;  %v5655_v10 = vld [vmem:[%s7922_s0 + $0x180] sm:$0xf] }
  0x40   :  { %v4720_v33 = vcombine.low %v735_v23, %v749_v25  ;;  %v208_v34 = vrot.slane %v206_v16, 5  ;;  %v214_v35 = vrot.slane %v212_v17, 5  ;;  %v219_v36 = vrot.slane %v217_v18, 4 }
  0x41   :  { %1196 = vrot.lane.b32.xlu1 %v4704_v47, %s5156_s17  ;;  %1250 = vrot.lane.b32.xlu0 %v5073_v62, %s5157_s28  ;;  %v226_v40 = vshll.u32 %v80_v15, 16  ;;  %v231_v43 = vshrl.u32 %v5607_v29, 16  ;;  %v234_v44 = vshll.u32 %v5607_v29, 16  ;;  %v240_v46 = vshll.u32 %v81_v38, 16  ;;  %v5630_v47 = vld [vmem:[%s7922_s0 + $0x168] sm:$0xf] }
  0x42   :  { %v209_v45 = vor.u32 %v208_v34, %v205_v27  ;;  %v245_v49 = vshrl.u32 %v5612_v32, 16  ;;  %v248_v51 = vshll.u32 %v5612_v32, 16  ;;  %v222_v52 = vrot.slane %v220_v39, 5  ;;  %v4597_v34 = vld [vmem:[%s7922_s0 + $0x16c] sm:$0x1] }
  0x43   :  { %v228_v31 = vrot.slane %v226_v40, 5  ;;  %v233_v53 = vrot.slane %v231_v43, 4  ;;  %v236_v54 = vrot.slane %v234_v44, 5  ;;  %v242_v59 = vrot.slane %v240_v46, 5  ;;  %v4598_v39 = vld [vmem:[%s7922_s0 + $0x174] sm:$0x1] }
  0x44   :  { %v210_v26 = vrot.slane %v209_v45, 4  ;;  %v247_v60 = vrot.slane %v245_v49, 4  ;;  %v250_v61 = vrot.slane %v248_v51, 5  ;;  %v223_v62 = vor.u32 %v222_v52, %v219_v36  ;;  %v4599_v45 = vld [vmem:[%s7922_s0 + $0x17c] sm:$0x1] }
  0x45   :  { %1252 = vrot.lane.b32.xlu1 %v5074_v20, %s5157_s28  ;;  %1290 = vrot.lane.b32.xlu0 %v4719_v21, %s5158_s29  ;;  %v237_v63 = vor.u32 %v236_v54, %v233_v53  ;;  %v254_v0 = vshll.u32 %v82_v41, 16  ;;  %v477_v1 = vshrl.u32 %v5630_v47, 16  ;;  %v480_v5 = vshll.u32 %v5630_v47, 16  ;;  %v5076_v20 = vld [vmem:[%s7922_s0 + $0xe8] ss:$8 sps:$4 sm:$0xff]  }
  0x46   :  { %v215_v3 = vsel %vm5299_vm2, %v210_v26, %v214_v35  ;;  %v251_v4 = vor.u32 %v250_v61, %v247_v60  ;;  %v491_v9 = vshrl.u32 %v5635_v57, 16  ;;  %v224_v11 = vrot.slane %v223_v62, 4  ;;  %v4600_v52 = vld [vmem:[%s7922_s0 + $0x184] sm:$0x1]  ;;  %v5699_v62 = vld [vmem:[%s7922_s0 + $0x58] sm:$0xf] }
  0x47   :  { %v238_v12 = vrot.slane %v237_v63, 4  ;;  %v256_v13 = vrot.slane %v254_v0, 5  ;;  %v479_v14 = vrot.slane %v477_v1, 4  ;;  %v482_v16 = vrot.slane %v480_v5, 5  ;;  %v5079_v63 = vld [vmem:[%s7922_s0 + $0x1f8] ss:$8 sps:$4 sm:$0xff]  }
  0x48   :  { %v252_v15 = vrot.slane %v251_v4, 4  ;;  %v493_v17 = vrot.slane %v491_v9, 4  ;;  %v494_v18 = vshll.u32 %v5635_v57, 16  ;;  %v229_v21 = vsel %vm5299_vm2, %v224_v11, %v228_v31  ;;  %v5707_v4 = vld [vmem:[%s7922_s0 + $0x60] sm:$0xf] }
  0x49   :  { %950 = vrot.lane.b32.xlu1 %v5075_v58, %s5151_s23  ;;  %1292 = vrot.lane.b32.xlu0 %v4720_v33, %s5158_s29  ;;  %v243_v23 = vsel %vm5299_vm2, %v238_v12, %v242_v59  ;;  %v4681_v25 = vcombine.low %v5630_v47, %v5635_v57  ;;  %v505_v27 = vshrl.u32 %v5646_v2, 16  ;;  %v4673_v33 = vcombine.low %v215_v3, %v229_v21  ;;  %v5694_v58 = vld [vmem:[%s7922_s0 + $0x50] sm:$0xf] }
  0x4a   :  { %v257_v35 = vsel %vm5299_vm2, %v252_v15, %v256_v13  ;;  %v496_v36 = vrot.slane %v494_v18, 5  ;;  %v508_v38 = vshll.u32 %v5646_v2, 16  ;;  %v519_v43 = vshrl.u32 %v5655_v10, 16 }
  0x4b   :  { %v4674_v40 = vcombine.low %v243_v23, %v257_v35  ;;  %v507_v41 = vrot.slane %v505_v27, 4  ;;  %v522_v44 = vshll.u32 %v5655_v10, 16  ;;  %v4682_v49 = vcombine.low %v5646_v2, %v5655_v10  ;;  %v5080_v23 = vld [vmem:[%s7922_s0 + $0x208] ss:$8 sps:$4 sm:$0xff]   ;;  %v4645_v35 = vld [vmem:[%s7922_s0 + $0x54] sm:$0x1] }
  0x4c   :  { %v510_v46 = vrot.slane %v508_v38, 5  ;;  %v483_v51 = vor.u32 %v482_v16, %v479_v14  ;;  %v486_v47 = vshll.u32 %v4597_v34, 16  ;;  %v521_v31 = vrot.slane %v519_v43, 4  ;;  %v5720_v16 = vld [vmem:[%s7922_s0 + $0x68] sm:$0xf] }
  0x4d   :  { %952 = vrot.lane.b32.xlu1 %v5076_v20, %s5151_s23  ;;  %990 = vrot.lane.b32.xlu0 %v4673_v33, %s5154_s12  ;;  %v524_v53 = vrot.slane %v522_v44, 5  ;;  %v497_v54 = vor.u32 %v496_v36, %v493_v17  ;;  %v500_v57 = vshll.u32 %v4598_v39, 16  ;;  %v514_v61 = vshll.u32 %v4599_v45, 16 }
  0x4e   :  { %v484_v26 = vrot.slane %v483_v51, 4  ;;  %v488_v59 = vrot.slane %v486_v47, 5  ;;  %v511_v60 = vor.u32 %v510_v46, %v507_v41  ;;  %v528_v3 = vshll.u32 %v4600_v52, 16  ;;  %v4646_v41 = vld [vmem:[%s7922_s0 + $0x5c] sm:$0x1] }
  0x4f   :  { %v498_v0 = vrot.slane %v497_v54, 4  ;;  %v502_v1 = vrot.slane %v500_v57, 5  ;;  %v525_v2 = vor.u32 %v524_v53, %v521_v31  ;;  %v516_v10 = vrot.slane %v514_v61, 5 }
  0x50   :  { %v489_v5 = vsel %vm5299_vm2, %v484_v26, %v488_v59  ;;  %v512_v9 = vrot.slane %v511_v60, 4  ;;  %v751_v11 = vshrl.u32 %v5694_v58, 16  ;;  %v530_v14 = vrot.slane %v528_v3, 5  ;;  %v4647_v59 = vld [vmem:[%s7922_s0 + $0x64] sm:$0x1] }
  0x51   :  { %992 = vrot.lane.b32.xlu1 %v4674_v40, %s5154_s12  ;;  %1046 = vrot.lane.b32.xlu0 %v4681_v25, %s5152_s26  ;;  %v503_v12 = vsel %vm5299_vm2, %v498_v0, %v502_v1  ;;  %v526_v13 = vrot.slane %v525_v2, 4  ;;  %v754_v15 = vshll.u32 %v5694_v58, 16  ;;  %v765_v21 = vshrl.u32 %v5699_v62, 16  ;;  %v4648_v60 = vld [vmem:[%s7922_s0 + $0x6c] sm:$0x1] }
  0x52   :  { %v4697_v17 = vcombine.low %v489_v5, %v503_v12  ;;  %v517_v18 = vsel %vm5299_vm2, %v512_v9, %v516_v10  ;;  %v753_v20 = vrot.slane %v751_v11, 4  ;;  %v768_v34 = vshll.u32 %v5699_v62, 16  ;;  %v5083_v10 = vld [vmem:[%s7922_s0 + $0xe0] ss:$8 sps:$4 sm:$0xff]  }
  0x53   :  { %v531_v25 = vsel %vm5299_vm2, %v526_v13, %v530_v14  ;;  %v756_v27 = vrot.slane %v754_v15, 5  ;;  %v4705_v33 = vcombine.low %v5694_v58, %v5699_v62  ;;  %v767_v38 = vrot.slane %v765_v21, 4  ;;  %v5769_v14 = vld [vmem:[%s7922_s0 + $0x68] sm:$0xf]  ;;  %v5774_v15 = vld [vmem:[%s7922_s0 + $0x70] sm:$0xf] }
  0x54   :  { %v4698_v36 = vcombine.low %v517_v18, %v531_v25  ;;  %v779_v39 = vshrl.u32 %v5707_v4, 16  ;;  %v782_v40 = vshll.u32 %v5707_v4, 16  ;;  %v770_v43 = vrot.slane %v768_v34, 5  ;;  %v84_v21 = vld [vmem:[%s7922_s0 + $0x74] sm:$0x1] }
  0x55   :  { %1048 = vrot.lane.b32.xlu1 %v4682_v49, %s5152_s26  ;;  %1102 = vrot.lane.b32.xlu0 %v5079_v63, %s5153_s20  ;;  %v793_v44 = vshrl.u32 %v5720_v16, 16  ;;  %v796_v45 = vshll.u32 %v5720_v16, 16  ;;  %v4706_v46 = vcombine.low %v5707_v4, %v5720_v16  ;;  %v757_v52 = vor.u32 %v756_v27, %v753_v20  ;;  %v83_v20 = vld [vmem:[%s7922_s0 + $0x6c] sm:$0x1] }
  0x56   :  { %v781_v51 = vrot.slane %v779_v39, 4  ;;  %v784_v47 = vrot.slane %v782_v40, 5  ;;  %v760_v31 = vshll.u32 %v4645_v35, 16  ;;  %v771_v57 = vor.u32 %v770_v43, %v767_v38  ;;  %v5796_v39 = vld [vmem:[%s7922_s0 + $0x78] sm:$0xf] }
  0x57   :  { %v795_v53 = vrot.slane %v793_v44, 4  ;;  %v798_v54 = vrot.slane %v796_v45, 5  ;;  %v774_v58 = vshll.u32 %v4646_v41, 16  ;;  %v758_v26 = vrot.slane %v757_v52, 4  ;;  %v5804_v43 = vld [vmem:[%s7922_s0 + $0x80] sm:$0xf] }
  0x58   :  { %v762_v49 = vrot.slane %v760_v31, 5  ;;  %v785_v61 = vor.u32 %v784_v47, %v781_v51  ;;  %v4656_v62 = vcombine.low %v5419_v37, %v5435_v50  ;;  %v772_v63 = vrot.slane %v771_v57, 4  ;;  %v5084_v44 = vld [vmem:[%s7922_s0 + $0xf0] ss:$8 sps:$4 sm:$0xff]   ;;  %v85_v31 = vld [vmem:[%s7922_s0 + $0x7c] sm:$0x1] }
  0x59   :  { %1104 = vrot.lane.b32.xlu1 %v5080_v23, %s5153_s20  ;;  %1142 = vrot.lane.b32.xlu0 %v4697_v17, %s5155_s25  ;;  %v776_v0 = vrot.slane %v774_v58, 5  ;;  %v788_v1 = vshll.u32 %v4647_v59, 16  ;;  %v799_v2 = vor.u32 %v798_v54, %v795_v53  ;;  %v802_v5 = vshll.u32 %v4648_v60, 16  ;;  %v86_v57 = vld [vmem:[%s7922_s0 + $0x84] sm:$0x1] }
  0x5a   :  { %v763_v3 = vsel %vm5299_vm2, %v758_v26, %v762_v49  ;;  %v786_v4 = vrot.slane %v785_v61, 4  ;;  %v4657_v9 = vcombine.low %v5575_v6, %v5580_v7  ;;  %v4658_v16 = vcombine.low %v5607_v29, %v5612_v32 }
  0x5b   :  { %v777_v11 = vsel %vm5299_vm2, %v772_v63, %v776_v0  ;;  %v790_v12 = vrot.slane %v788_v1, 5  ;;  %v800_v13 = vrot.slane %v799_v2, 4  ;;  %v804_v18 = vrot.slane %v802_v5, 5  ;;  %v5824_v63 = vld [vmem:[%s7922_s0 + $0x188] sm:$0xf] }
  0x5c   :  { %v4721_v17 = vcombine.low %v763_v3, %v777_v11  ;;  %v259_v23 = vshrl.u32 %v5769_v14, 16  ;;  %v4659_v25 = vcombine.low %v5769_v14, %v5774_v15  ;;  %v262_v34 = vshll.u32 %v5769_v14, 16 }
  0x5d   :  { %1144 = vrot.lane.b32.xlu1 %v4698_v36, %s5155_s25  ;;  %1198 = vrot.lane.b32.xlu0 %v4705_v33, %s5156_s17  ;;  %v791_v27 = vsel %vm5299_vm2, %v786_v4, %v790_v12  ;;  %v268_v35 = vshll.u32 %v83_v20, 16  ;;  %v273_v38 = vshrl.u32 %v5774_v15, 16  ;;  %v805_v40 = vsel %vm5299_vm2, %v800_v13, %v804_v18  ;;  %v5085_v4 = vld [vmem:[%s7922_s0 + $0xf8] ss:$8 sps:$4 sm:$0xff]  }
  0x5e   :  { %v261_v41 = vrot.slane %v259_v23, 4  ;;  %v276_v36 = vshll.u32 %v5774_v15, 16  ;;  %v282_v33 = vshll.u32 %v84_v21, 16  ;;  %v4722_v45 = vcombine.low %v791_v27, %v805_v40  ;;  %v5838_v23 = vld [vmem:[%s7922_s0 + $0x198] sm:$0xf] }
  0x5f   :  { %v264_v51 = vrot.slane %v262_v34, 5  ;;  %v270_v47 = vrot.slane %v268_v35, 5  ;;  %v275_v52 = vrot.slane %v273_v38, 4  ;;  %v287_v58 = vshrl.u32 %v5796_v39, 16 }
  0x60   :  { %v278_v53 = vrot.slane %v276_v36, 5  ;;  %v284_v54 = vrot.slane %v282_v33, 5  ;;  %v290_v26 = vshll.u32 %v5796_v39, 16  ;;  %v296_v59 = vshll.u32 %v85_v31, 16 }
  0x61   :  { %1200 = vrot.lane.b32.xlu1 %v4706_v46, %s5156_s17  ;;  %1254 = vrot.lane.b32.xlu0 %v5083_v10, %s5157_s28  ;;  %v265_v49 = vor.u32 %v264_v51, %v261_v41  ;;  %v301_v60 = vshrl.u32 %v5804_v43, 16  ;;  %v304_v61 = vshll.u32 %v5804_v43, 16  ;;  %v289_v1 = vrot.slane %v287_v58, 4  ;;  %v5829_v46 = vld [vmem:[%s7922_s0 + $0x190] sm:$0xf] }
  0x62   :  { %v279_v0 = vor.u32 %v278_v53, %v275_v52  ;;  %v292_v2 = vrot.slane %v290_v26, 5  ;;  %v310_v3 = vshll.u32 %v86_v57, 16  ;;  %v298_v10 = vrot.slane %v296_v59, 5 }
  0x63   :  { %v266_v5 = vrot.slane %v265_v49, 4  ;;  %v303_v11 = vrot.slane %v301_v60, 4  ;;  %v306_v12 = vrot.slane %v304_v61, 5  ;;  %v533_v21 = vshrl.u32 %v5824_v63, 16  ;;  %v4601_v60 = vld [vmem:[%s7922_s0 + $0x18c] sm:$0x1] }
  0x64   :  { %v280_v13 = vrot.slane %v279_v0, 4  ;;  %v293_v18 = vor.u32 %v292_v2, %v289_v1  ;;  %v312_v20 = vrot.slane %v310_v3, 5  ;;  %v536_v35 = vshll.u32 %v5824_v63, 16  ;;  %v4603_v3 = vld [vmem:[%s7922_s0 + $0x19c] sm:$0x1] }
  0x65   :  { %1256 = vrot.lane.b32.xlu1 %v5084_v44, %s5157_s28  ;;  %1294 = vrot.lane.b32.xlu0 %v4721_v17, %s5158_s29  ;;  %v271_v27 = vsel %vm5299_vm2, %v266_v5, %v270_v47  ;;  %v307_v34 = vor.u32 %v306_v12, %v303_v11  ;;  %v547_v38 = vshrl.u32 %v5829_v46, 16  ;;  %v535_v36 = vrot.slane %v533_v21, 4  ;;  %v5852_v44 = vld [vmem:[%s7922_s0 + $0x1a0] sm:$0xf]  ;;  %v5086_v17 = vld [vmem:[%s7922_s0 + $0x108] ss:$8 sps:$4 sm:$0xff]  }
  0x66   :  { %v285_v40 = vsel %vm5299_vm2, %v280_v13, %v284_v54  ;;  %v294_v41 = vrot.slane %v293_v18, 4  ;;  %v550_v33 = vshll.u32 %v5829_v46, 16  ;;  %v538_v52 = vrot.slane %v536_v35, 5  ;;  %v4604_v12 = vld [vmem:[%s7922_s0 + $0x1a4] sm:$0x1] }
  0x67   :  { %v4675_v51 = vcombine.low %v271_v27, %v285_v40  ;;  %v308_v47 = vrot.slane %v307_v34, 4  ;;  %v549_v53 = vrot.slane %v547_v38, 4  ;;  %v561_v57 = vshrl.u32 %v5838_v23, 16  ;;  %v5891_v38 = vld [vmem:[%s7922_s0 + $0x78] sm:$0xf] }
  0x68   :  { %v299_v31 = vsel %vm5299_vm2, %v294_v41, %v298_v10  ;;  %v552_v54 = vrot.slane %v550_v33, 5  ;;  %v564_v26 = vshll.u32 %v5838_v23, 16  ;;  %v575_v49 = vshrl.u32 %v5852_v44, 16  ;;  %v5897_v33 = vld [vmem:[%s7922_s0 + $0x80] sm:$0xf] }
  0x69   :  { %954 = vrot.lane.b32.xlu1 %v5085_v4, %s5151_s23  ;;  %1296 = vrot.lane.b32.xlu0 %v4722_v45, %s5158_s29  ;;  %v313_v58 = vsel %vm5299_vm2, %v308_v47, %v312_v20  ;;  %v578_v59 = vshll.u32 %v5852_v44, 16  ;;  %v4683_v0 = vcombine.low %v5824_v63, %v5829_v46  ;;  %v563_v1 = vrot.slane %v561_v57, 4  ;;  %v4602_v45 = vld [vmem:[%s7922_s0 + $0x194] sm:$0x1]  ;;  %v5884_v20 = vld [vmem:[%s7922_s0 + $0x70] sm:$0xf] }
  0x6a   :  { %v4676_v61 = vcombine.low %v299_v31, %v313_v58  ;;  %v539_v2 = vor.u32 %v538_v52, %v535_v36  ;;  %v566_v4 = vrot.slane %v564_v26, 5  ;;  %v577_v5 = vrot.slane %v575_v49, 4  ;;  %v5904_v52 = vld [vmem:[%s7922_s0 + $0x88] sm:$0xf] }
  0x6b   :  { %v580_v10 = vrot.slane %v578_v59, 5  ;;  %v542_v11 = vshll.u32 %v4601_v60, 16  ;;  %v553_v63 = vor.u32 %v552_v54, %v549_v53  ;;  %v556_v46 = vshll.u32 %v4602_v45, 16 }
  0x6c   :  { %v540_v13 = vrot.slane %v539_v2, 4  ;;  %v570_v18 = vshll.u32 %v4603_v3, 16  ;;  %v567_v27 = vor.u32 %v566_v4, %v563_v1  ;;  %v584_v35 = vshll.u32 %v4604_v12, 16  ;;  %v4649_v4 = vld [vmem:[%s7922_s0 + $0x74] sm:$0x1] }
  0x6d   :  { %956 = vrot.lane.b32.xlu1 %v5086_v17, %s5151_s23  ;;  %994 = vrot.lane.b32.xlu0 %v4675_v51, %s5154_s12  ;;  %v544_v21 = vrot.slane %v542_v11, 5  ;;  %v581_v34 = vor.u32 %v580_v10, %v577_v5  ;;  %v554_v40 = vrot.slane %v553_v63, 4  ;;  %v558_v41 = vrot.slane %v556_v46, 5  ;;  %v4651_v63 = vld [vmem:[%s7922_s0 + $0x84] sm:$0x1]  ;;  %s5163_s23 = smov 56  }
  0x6e   :  { %v807_v36 = vshrl.u32 %v5884_v20, 16  ;;  %v4684_v17 = vcombine.low %v5838_v23, %v5852_v44  ;;  %v568_v51 = vrot.slane %v567_v27, 4  ;;  %v572_v47 = vrot.slane %v570_v18, 5  ;;  %v5089_v23 = vld [vmem:[%s7922_s0 + $0x218] ss:$8 sps:$4 sm:$0xff]  }
  0x6f   :  { %v582_v31 = vrot.slane %v581_v34, 4  ;;  %v586_v53 = vrot.slane %v584_v35, 5  ;;  %v810_v54 = vshll.u32 %v5884_v20, 16  ;;  %v821_v57 = vshrl.u32 %v5891_v38, 16  ;;  %v4652_v34 = vld [vmem:[%s7922_s0 + $0x8c] sm:$0x1] }
  0x70   :  { %v545_v44 = vsel %vm5299_vm2, %v540_v13, %v544_v21  ;;  %v559_v58 = vsel %vm5299_vm2, %v554_v40, %v558_v41  ;;  %v809_v26 = vrot.slane %v807_v36, 4  ;;  %v824_v49 = vshll.u32 %v5891_v38, 16  ;;  %v4650_v13 = vld [vmem:[%s7922_s0 + $0x7c] sm:$0x1] }
  0x71   :  { %996 = vrot.lane.b32.xlu1 %v4676_v61, %s5154_s12  ;;  %1050 = vrot.lane.b32.xlu0 %v4683_v0, %s5152_s26  ;;  %v812_v59 = vrot.slane %v810_v54, 5  ;;  %v823_v60 = vrot.slane %v821_v57, 4  ;;  %v5090_v61 = vld [vmem:[%s7922_s0 + $0x228] ss:$8 sps:$4 sm:$0xff]   ;;  %v835_v45 = vshrl.u32 %v5897_v33, 16  ;;  %v838_v2 = vshll.u32 %v5897_v33, 16 }
  0x72   :  { %v826_v1 = vrot.slane %v824_v49, 5  ;;  %v849_v3 = vshrl.u32 %v5904_v52, 16  ;;  %v4699_v5 = vcombine.low %v545_v44, %v559_v58  ;;  %v573_v10 = vsel %vm5299_vm2, %v568_v51, %v572_v47 }
  0x73   :  { %v587_v11 = vsel %vm5299_vm2, %v582_v31, %v586_v53  ;;  %v852_v12 = vshll.u32 %v5904_v52, 16  ;;  %v837_v46 = vrot.slane %v835_v45, 4  ;;  %v840_v18 = vrot.slane %v838_v2, 5 }
  0x74   :  { %v5921_v0 = vpop.permute.xlu0 %942  ;;  %v851_v21 = vrot.slane %v849_v3, 4  ;;  %v813_v27 = vor.u32 %v812_v59, %v809_v26  ;;  %v816_v40 = vshll.u32 %v4649_v4, 16  ;;  %v827_v41 = vor.u32 %v826_v1, %v823_v60  ;;  %v5095_v59 = vld [vmem:[%s7922_s0 + $0x100] ss:$8 sps:$4 sm:$0xff]  }
  0x75   :  { %1052 = vrot.lane.b32.xlu1 %v4684_v17, %s5152_s26  ;;  %1106 = vrot.lane.b32.xlu0 %v5089_v23, %s5153_s20  ;;  %v854_v35 = vrot.slane %v852_v12, 5  ;;  %v830_v36 = vshll.u32 %v4650_v13, 16  ;;  %v4700_v51 = vcombine.low %v573_v10, %v587_v11  ;;  %v841_v31 = vor.u32 %v840_v18, %v837_v46  ;;  %v5100_v60 = vld [vmem:[%s7923_s1 + $0x10] ss:$0 sps:$4 sm:$0x33]  }
  0x76   :  { %v844_v53 = vshll.u32 %v4651_v63, 16  ;;  %v858_v54 = vshll.u32 %v4652_v34, 16  ;;  %v4707_v17 = vcombine.low %v5884_v20, %v5891_v38  ;;  %v814_v57 = vrot.slane %v813_v27, 4 }
  0x77   :  { %v818_v23 = vrot.slane %v816_v40, 5  ;;  %v855_v44 = vor.u32 %v854_v35, %v851_v21  ;;  %v1041_v58 = vpop.permute.xlu1 %1040  ;;  %v828_v26 = vrot.slane %v827_v41, 4  ;;  %v832_v49 = vrot.slane %v830_v36, 5 }
  0x78   :  { %v945_v47 = vpop.permute.xlu0 %944  ;;  %v846_v1 = vrot.slane %v844_v53, 5  ;;  %v860_v45 = vrot.slane %v858_v54, 5  ;;  %vm1483_vm3 = vcmask 1041408   ;;  %v4708_v20 = vcombine.low %v5897_v33, %v5904_v52  ;;  %v5096_v33 = vld [vmem:[%s7922_s0 + $0x110] ss:$8 sps:$4 sm:$0xff]  }
  0x79   :  { %1108 = vrot.lane.b32.xlu1 %v5090_v61, %s5153_s20  ;;  %1146 = vrot.lane.b32.xlu0 %v4699_v5, %s5155_s25  ;;  %v842_v61 = vrot.slane %v841_v31, 4  ;;  %v856_v38 = vrot.slane %v855_v44, 4  ;;  %v1485_v2 = vsel %vm1483_vm3, %v5100_v60, 0  ;;  %v4660_v3 = vcombine.low %v5796_v39, %v5804_v43 }
  0x7a   :  { %v819_v5 = vsel %vm5299_vm2, %v814_v57, %v818_v23  ;;  %v833_v10 = vsel %vm5299_vm2, %v828_v26, %v832_v49  ;;  %5038 = vmatprep.subr.msk.bf16.mxu0 %vm1483_vm3, %v5100_v60  ;;  %5039 = vmatprep.subr.msk.bf16.mxu1 %vm1483_vm3, %v5100_v60  ;;  %vm1302_vm4 = vcmask 31744   ;;  %vm1327_vm5 = vcmask 64512  }
  0x7b   :  { %4971 = vmatpush3.bf16.msra.mxu0 %v1485_v2  ;;  %5037 = vmatpush3.bf16.msra.mxu1 %v1485_v2  ;;  %v1097_v52 = vpop.permute.xlu1 %1096  ;;  %v4723_v11 = vcombine.low %v819_v5, %v833_v10  ;;  %v847_v12 = vsel %vm5299_vm2, %v842_v61, %v846_v1  ;;  %v861_v13 = vsel %vm5299_vm2, %v856_v38, %v860_v45  ;;  %vm1344_vm6 = vcmask 97280  }
  0x7c   :  { %v1039_v4 = vpop.permute.xlu0 %1038  ;;  %v4724_v46 = vcombine.low %v847_v12, %v861_v13  ;;  %v1305_v34 = vsel %vm1302_vm4, %v4653_v55, %v5921_v0  ;;  %v1308_v40 = vsel %vm1302_vm4, %v4654_v30, %v945_v47  ;;  %vm1361_vm7 = vcmask 130048  }
  0x7d   :  { %1148 = vrot.lane.b32.xlu1 %v4700_v51, %s5155_s25  ;;  %1202 = vrot.lane.b32.xlu0 %v4707_v17, %s5156_s17  ;;  %vm1378_vm8 = vcmask 162816   ;;  %vm1395_vm9 = vcmask 195584   ;;  %vm1412_vm10 = vcmask 228352   ;;  %vm1429_vm11 = vcmask 261120  }
  0x7e   :  { %vm1466_vm12 = vcmask 293888   ;;  %vm1748_vm13 = vcmask 57344   ;;  %vm1758_vm14 = vsmask.f32 256  ;;  %vm1820_vm15 = vsmask.f32 7938 }
  0x7f   :  { %vm6106_vm0 = vmand %vm1748_vm13, %vm1758_vm14  ;;  %vm3795_vm14 = vcmask 457728  }
  0x80   :  { %v1095_v63 = vpop.permute.xlu0 %1094  ;;  %vm6114_vm1 = vmand %vm1748_vm13, %vm1820_vm15 }
  0x81   :  { %1204 = vrot.lane.b32.xlu1 %v4708_v20, %s5156_s17  ;;  %1258 = vrot.lane.b32.xlu0 %v5095_v59, %s5157_s28 }
  0x85   :  { %1260 = vrot.lane.b32.xlu1 %v5096_v33, %s5157_s28  ;;  %1298 = vrot.lane.b32.xlu0 %v4723_v11, %s5158_s29 }
  0x86   :  { %v983_v18 = vpop.permute.xlu1 %982 }
  0x87   :  { %v1329_v35 = vsel %vm1327_vm5, %v1305_v34, %v983_v18 }
  0x88   :  { %v1346_v31 = vsel %vm1344_vm6, %v1329_v35, %v1039_v4 }
  0x89   :  { %1300 = vrot.lane.b32.xlu1 %v4724_v46, %s5158_s29  ;;  %v1363_v55 = vsel %vm1361_vm7, %v1346_v31, %v1095_v63 }
  0x8a   :  { %v1135_v21 = vpop.permute.xlu0 %1134 }
  0x8b   :  { %v985_v27 = vpop.permute.xlu1 %984  ;;  %v1380_v42 = vsel %vm1378_vm8, %v1363_v55, %v1135_v21 }
  0x8c   :  { %v1331_v36 = vsel %vm1327_vm5, %v1308_v40, %v985_v27 }
  0x8d   :  { %v1348_v19 = vsel %vm1344_vm6, %v1331_v36, %v1041_v58 }
  0x8e   :  { %v1191_v41 = vpop.permute.xlu0 %1190  ;;  %v1365_v48 = vsel %vm1361_vm7, %v1348_v19, %v1097_v52 }
  0x8f   :  { %v1137_v51 = vpop.permute.xlu1 %1136  ;;  %v1397_v30 = vsel %vm1395_vm9, %v1380_v42, %v1191_v41 }
  0x90   :  { %v1382_v57 = vsel %vm1378_vm8, %v1365_v48, %v1137_v51 }
  0x92   :  { %v1247_v24 = vpop.permute.xlu0 %1246 }
  0x93   :  { %v1193_v0 = vpop.permute.xlu1 %1192  ;;  %v1414_v47 = vsel %vm1412_vm10, %v1397_v30, %v1247_v24 }
  0x94   :  { %v1399_v23 = vsel %vm1395_vm9, %v1382_v57, %v1193_v0 }
  0x96   :  { %v1287_v53 = vpop.permute.xlu0 %1286 }
  0x97   :  { %v1249_v54 = vpop.permute.xlu1 %1248  ;;  %v1431_v17 = vsel %vm1429_vm11, %v1414_v47, %v1287_v53 }
  0x98   :  { %4972 = vmatprep.mubr.msk.bf16.mxu0 %vm1466_vm12, %v1431_v17  ;;  %v1416_v44 = vsel %vm1412_vm10, %v1399_v23, %v1249_v54 }
  0x9a   :  { %v1289_v58 = vpop.permute.xlu0 %1288 }
  0x9b   :  { %v947_v26 = vpop.permute.xlu1 %946  ;;  %v1433_v49 = vsel %vm1429_vm11, %v1416_v44, %v1289_v58 }
  0x9c   :  { %4973 = vmatmul.mubr.msk.bf16.vlgmr.msra.gmra.mrb[0].mxu0 %vm1466_vm12, %v1433_v49  ;;  %v1311_v10 = vsel %vm1302_vm4, %v4655_v8, %v947_v26 }
  0x9f   :  { %v949_v59 = vpop.permute.xlu1 %948  ;;  %v987_v60 = vpop.permute.xlu0 %986 }
  0xa0   :  { %v1333_v33 = vsel %vm1327_vm5, %v1311_v10, %v987_v60  ;;  %v1314_v63 = vsel %vm1302_vm4, %v4656_v62, %v949_v59 }
  0xa3   :  { %v989_v61 = vpop.permute.xlu1 %988  ;;  %v1043_v1 = vpop.permute.xlu0 %1042 }
  0xa4   :  { %v1350_v52 = vsel %vm1344_vm6, %v1333_v33, %v1043_v1  ;;  %v1335_v18 = vsel %vm1327_vm5, %v1314_v63, %v989_v61 }
  0xa7   :  { %v1045_v45 = vpop.permute.xlu1 %1044  ;;  %v1099_v20 = vpop.permute.xlu0 %1098 }
  0xa8   :  { %v1367_v13 = vsel %vm1361_vm7, %v1350_v52, %v1099_v20  ;;  %v1352_v28 = vsel %vm1344_vm6, %v1335_v18, %v1045_v45 }
  0xab   :  { %v1101_v38 = vpop.permute.xlu1 %1100  ;;  %v1139_v2 = vpop.permute.xlu0 %1138 }
  0xac   :  { %v1384_v46 = vsel %vm1378_vm8, %v1367_v13, %v1139_v2  ;;  %v1369_v34 = vsel %vm1361_vm7, %v1352_v28, %v1101_v38 }
  0xaf   :  { %v1141_v4 = vpop.permute.xlu1 %1140  ;;  %v1195_v5 = vpop.permute.xlu0 %1194 }
  0xb0   :  { %v1401_v22 = vsel %vm1395_vm9, %v1384_v46, %v1195_v5  ;;  %v1386_v37 = vsel %vm1378_vm8, %v1369_v34, %v1141_v4 }
  0xb3   :  { %v1197_v11 = vpop.permute.xlu1 %1196  ;;  %v1251_v12 = vpop.permute.xlu0 %1250 }
  0xb4   :  { %v1418_v8 = vsel %vm1412_vm10, %v1401_v22, %v1251_v12  ;;  %v1403_v50 = vsel %vm1395_vm9, %v1386_v37, %v1197_v11 }
  0xb7   :  { %v1253_v21 = vpop.permute.xlu1 %1252  ;;  %v1291_v27 = vpop.permute.xlu0 %1290 }
  0xb8   :  { %v1435_v35 = vsel %vm1429_vm11, %v1418_v8, %v1291_v27  ;;  %v1420_v62 = vsel %vm1412_vm10, %v1403_v50, %v1253_v21 }
  0xb9   :  { %4976 = vmatprep.mubr.msk.bf16.mxu1 %vm1466_vm12, %v1435_v35 }
  0xbb   :  { %v951_v40 = vpop.permute.xlu1 %950  ;;  %v1293_v41 = vpop.permute.xlu0 %1292 }
  0xbc   :  { %v1437_v36 = vsel %vm1429_vm11, %v1420_v62, %v1293_v41  ;;  %v1317_v53 = vsel %vm1302_vm4, %v4657_v9, %v951_v40 }
  0xbd   :  { %4977 = vmatmul.mubr.msk.bf16.vlgmr.msra.gmra.mrb[0].mxu1 %vm1466_vm12, %v1437_v36 }
  0xbf   :  { %v953_v51 = vpop.permute.xlu1 %952  ;;  %v991_v31 = vpop.permute.xlu0 %990 }
  0xc0   :  { %v1337_v54 = vsel %vm1327_vm5, %v1317_v53, %v991_v31  ;;  %v1320_v58 = vsel %vm1302_vm4, %v4658_v16, %v953_v51 }
  0xc3   :  { %v993_v19 = vpop.permute.xlu1 %992  ;;  %v1047_v24 = vpop.permute.xlu0 %1046 }
  0xc4   :  { %v1354_v17 = vsel %vm1344_vm6, %v1337_v54, %v1047_v24  ;;  %v1339_v49 = vsel %vm1327_vm5, %v1320_v58, %v993_v19 }
  0xc7   :  { %v1049_v55 = vpop.permute.xlu1 %1048  ;;  %v1103_v0 = vpop.permute.xlu0 %1102 }
  0xc8   :  { %v1371_v44 = vsel %vm1361_vm7, %v1354_v17, %v1103_v0  ;;  %v1356_v7 = vsel %vm1344_vm6, %v1339_v49, %v1049_v55 }
  0xcb   :  { %v1105_v42 = vpop.permute.xlu1 %1104  ;;  %v1143_v48 = vpop.permute.xlu0 %1142 }
  0xcc   :  { %v1388_v26 = vsel %vm1378_vm8, %v1371_v44, %v1143_v48  ;;  %v1373_v61 = vsel %vm1361_vm7, %v1356_v7, %v1105_v42 }
  0xcf   :  { %v1145_v30 = vpop.permute.xlu1 %1144  ;;  %v1199_v47 = vpop.permute.xlu0 %1198 }
  0xd0   :  { %v1405_v6 = vsel %vm1395_vm9, %v1388_v26, %v1199_v47  ;;  %v1390_v29 = vsel %vm1378_vm8, %v1373_v61, %v1145_v30  ;;  %v1870_v61 = vld [vmem:[#allocation2 + $0x84] sm:$0x1] }
  0xd3   :  { %v1201_v57 = vpop.permute.xlu1 %1200  ;;  %v1255_v23 = vpop.permute.xlu0 %1254 }
  0xd4   :  { %v1422_v9 = vsel %vm1412_vm10, %v1405_v6, %v1255_v23  ;;  %v1407_v32 = vsel %vm1395_vm9, %v1390_v29, %v1201_v57 }
  0xd7   :  { %v1257_v59 = vpop.permute.xlu1 %1256  ;;  %v1295_v60 = vpop.permute.xlu0 %1294 }
  0xd8   :  { %v1439_v1 = vsel %vm1429_vm11, %v1422_v9, %v1295_v60  ;;  %v1424_v16 = vsel %vm1412_vm10, %v1407_v32, %v1257_v59  ;;  %v1808_v60 = vld [vmem:[#allocation2 + $0x80] sm:$0x1]  ;;  %v1769_v32 = vld [vmem:[#allocation2 + $0x18] sm:$0x1] }
  0xd9   :  { %4980 = vmatprep.mubr.msk.bf16.mxu1 %vm1466_vm12, %v1439_v1  ;;  %v1809_v1 = vsel %vm6106_vm0, 0, %v1808_v60 }
  0xda   :  { %1810 = vst [vmem:[#allocation2 + $0x80] sm:$0x1] %v1809_v1 }
  0xdb   :  { %v955_v45 = vpop.permute.xlu1 %954  ;;  %v1297_v20 = vpop.permute.xlu0 %1296 }
  0xdc   :  { %v1441_v38 = vsel %vm1429_vm11, %v1424_v16, %v1297_v20  ;;  %v1323_v46 = vsel %vm1302_vm4, %v4659_v25, %v955_v45  ;;  %v1772_v16 = vld [vmem:[#allocation2 + $0x20] sm:$0x1]  ;;  %v1871_v45 = vsel %vm6114_vm1, 0, %v1870_v61  ;;  %v1770_v20 = vsel %vm6106_vm0, 0, %v1769_v32 }
  0xdd   :  { %4981 = vmatmul.mubr.msk.bf16.gmra.mrb[4].mxu1 %vm1466_vm12, %v1441_v38  ;;  %v1773_v38 = vsel %vm6106_vm0, 0, %v1772_v16  ;;  %1872 = vst [vmem:[#allocation2 + $0x84] sm:$0x1] %v1871_v45  ;;  %1771 = vst [vmem:[#allocation2 + $0x18] sm:$0x1] %v1770_v20 }
  0xde   :  { %1774 = vst [vmem:[#allocation2 + $0x20] sm:$0x1] %v1773_v38  ;;  %v1805_v38 = vld [vmem:[#allocation2 + $0x78] sm:$0x1] }
  0xdf   :  { %v957_v2 = vpop.permute.xlu1 %956  ;;  %v995_v4 = vpop.permute.xlu0 %994 }
  0xe0   :  { %v1341_v18 = vsel %vm1327_vm5, %v1323_v46, %v995_v4  ;;  %v1326_v27 = vsel %vm1302_vm4, %v4660_v3, %v957_v2  ;;  %v1763_v2 = vld [vmem:[#allocation2 + $0x8] sm:$0x1] }
  0xe1   :  { %v1764_v4 = vsel %vm6106_vm0, 0, %v1763_v2 }
  0xe2   :  { %1765 = vst [vmem:[#allocation2 + $0x8] sm:$0x1] %v1764_v4 }
  0xe3   :  { %v997_v5 = vpop.permute.xlu1 %996  ;;  %v1051_v10 = vpop.permute.xlu0 %1050 }
  0xe4   :  { %v1358_v22 = vsel %vm1344_vm6, %v1341_v18, %v1051_v10  ;;  %v1343_v35 = vsel %vm1327_vm5, %v1326_v27, %v997_v5  ;;  %v1766_v5 = vld [vmem:[#allocation2 + $0x10] sm:$0x1] }
  0xe5   :  { %v1767_v10 = vsel %vm6106_vm0, 0, %v1766_v5 }
  0xe6   :  { %1768 = vst [vmem:[#allocation2 + $0x10] sm:$0x1] %v1767_v10  ;;  %v1806_v10 = vsel %vm6106_vm0, 0, %v1805_v38 }
  0xe7   :  { %v1053_v33 = vpop.permute.xlu1 %1052  ;;  %v1107_v52 = vpop.permute.xlu0 %1106  ;;  %1807 = vst [vmem:[#allocation2 + $0x78] sm:$0x1] %v1806_v10 }
  0xe8   :  { %v1375_v21 = vsel %vm1361_vm7, %v1358_v22, %v1107_v52  ;;  %v1360_v15 = vsel %vm1344_vm6, %v1343_v35, %v1053_v33  ;;  %v1775_v33 = vld [vmem:[#allocation2 + $0x28] sm:$0x1]  ;;  %vm1746_vm6 = vcmask 60416  }
  0xe9   :  { %v1776_v52 = vsel %vm6106_vm0, 0, %v1775_v33 }
  0xea   :  { %1777 = vst [vmem:[#allocation2 + $0x28] sm:$0x1] %v1776_v52 }
  0xeb   :  { %v1109_v11 = vpop.permute.xlu1 %1108  ;;  %v1147_v12 = vpop.permute.xlu0 %1146 }
  0xec   :  { %v1392_v34 = vsel %vm1378_vm8, %v1375_v21, %v1147_v12  ;;  %v1377_v62 = vsel %vm1361_vm7, %v1360_v15, %v1109_v11 }
  0xef   :  { %v1149_v13 = vpop.permute.xlu1 %1148  ;;  %v1203_v63 = vpop.permute.xlu0 %1202 }
  0xf0   :  { %v1409_v14 = vsel %vm1395_vm9, %v1392_v34, %v1203_v63  ;;  %v1394_v39 = vsel %vm1378_vm8, %v1377_v62, %v1149_v13  ;;  %vm6132_vm8 = vmand %vm1746_vm6, %vm1820_vm15  ;;  %v1781_v63 = vld [vmem:[#allocation2 + $0x38] sm:$0x1]  ;;  %vm3812_vm15 = vcmask 523264  }
  0xf3   :  { %v1205_v28 = vpop.permute.xlu1 %1204  ;;  %v1259_v8 = vpop.permute.xlu0 %1258 }
  0xf4   :  { %v1426_v25 = vsel %vm1412_vm10, %v1409_v14, %v1259_v8  ;;  %v1411_v43 = vsel %vm1395_vm9, %v1394_v39, %v1205_v28  ;;  %v1782_v28 = vsel %vm6106_vm0, 0, %v1781_v63  ;;  %v1784_v8 = vld [vmem:[#allocation2 + $0x40] sm:$0x1] }
  0xf5   :  { %1783 = vst [vmem:[#allocation2 + $0x38] sm:$0x1] %v1782_v28 }
  0xf7   :  { %v1261_v37 = vpop.permute.xlu1 %1260  ;;  %v1299_v50 = vpop.permute.xlu0 %1298 }
  0xf8   :  { %v1443_v40 = vsel %vm1429_vm11, %v1426_v25, %v1299_v50  ;;  %v1428_v3 = vsel %vm1412_vm10, %v1411_v43, %v1261_v37  ;;  %v1785_v50 = vsel %vm6106_vm0, 0, %v1784_v8  ;;  %v1778_v43 = vld [vmem:[#allocation2 + $0x30] sm:$0x1]  ;;  %vm2493_vm10 = vcmask 1042432  }
  0xf9   :  { %4984 = vmatprep.mubr.msk.bf16.mxu1 %vm1466_vm12, %v1443_v40  ;;  %1786 = vst [vmem:[#allocation2 + $0x40] sm:$0x1] %v1785_v50  ;;  %v1814_v50 = vld [vmem:[#allocation2 + $0x90] sm:$0x1] }
  0xfb   :  { %v1301_v41 = vpop.permute.xlu1 %1300 }
  0xfc   :  { %v1445_v36 = vsel %vm1429_vm11, %v1428_v3, %v1301_v41 }
  0xfd   :  { %4985 = vmatmul.mubr.msk.bf16.gmra.mrb[8].mxu1 %vm1466_vm12, %v1445_v36  ;;  %v1779_v36 = vsel %vm6106_vm0, 0, %v1778_v43  ;;  %v1831_v43 = vld [vmem:[#allocation2 + $0x1c] sm:$0x1]  ;;  %vm2494_vm12 = vcmask 1046532  }
  0xfe   :  { %1780 = vst [vmem:[#allocation2 + $0x30] sm:$0x1] %v1779_v36  ;;  %v1832_v36 = vsel %vm6114_vm1, 0, %v1831_v43 }
  0xff   :  { %1833 = vst [vmem:[#allocation2 + $0x1c] sm:$0x1] %v1832_v36 }
 0x16f   :  { %v6077_v51 = vpop.f32.mrb[0].mxu0 }
 0x170   :  { %v6079_v31 = vpop.f32.mrb[1].mxu0  ;;  %v1625_v0 = vmul.f32 %v6077_v51, %v6077_v51  ;;  %v1589_v53 = vsel %vm1327_vm5, %v6077_v51, 0.0 }
 0x171   :  { %v1623_v19 = vmul.f32 %v6079_v31, %v6079_v31  ;;  %v6083_v24 = vpop.f32.mrb[2].mxu0  ;;  %v1586_v42 = vsel %vm1327_vm5, %v6079_v31, 0.0 }
 0x172   :  { %v6085_v55 = vpop.f32.mrb[3].mxu0  ;;  %v1626_v17 = vmul.f32 %v6083_v24, %v6083_v24  ;;  %v1642_v58 = vsel %vm1327_vm5, %v1625_v0, 0.0  ;;  %v1591_v26 = vsel %vm1327_vm5, %v6083_v24, 0.0 }
 0x173   :  { %v1587_v48 = vsel %vm1327_vm5, %v6085_v55, 0.0  ;;  %v1624_v30 = vmul.f32 %v6085_v55, %v6085_v55  ;;  %v1639_v54 = vsel %vm1327_vm5, %v1623_v19, 0.0 }
 0x174   :  { %v1588_v47 = vadd.f32 %v1587_v48, %v1586_v42  ;;  %v1644_v7 = vsel %vm1327_vm5, %v1626_v17, 0.0  ;;  %v5159_v17 = vmov 0  }
 0x175   :  { %v1640_v57 = vsel %vm1327_vm5, %v1624_v30, 0.0  ;;  %1753 = vst.msk [vmem:[#allocation2 + $0x48] sm:$0xf] %vm1746_vm6, %v5159_v17  ;;  %1747 = vst.msk [vmem:[#allocation2] sm:$0xf] %vm1746_vm6, %v5159_v17 }
 0x176   :  { %v1590_v23 = vadd.f32 %v1589_v53, %v1588_v47  ;;  %v1641_v44 = vadd.f32 %v1640_v57, %v1639_v54  ;;  %v1799_v53 = vld [vmem:[#allocation2 + $0x68] sm:$0x1]  ;;  %v1802_v54 = vld [vmem:[#allocation2 + $0x70] sm:$0x1]  ;;  %1749 = vst.msk [vmem:[#allocation2 + $0x4] sm:$0x1] %vm1748_vm13, %v5159_v17 }
 0x177   :  { %1750 = vst.msk [vmem:[#allocation2 + $0x50] sm:$0xf] %vm1746_vm6, %v5159_v17  ;;  %1755 = vst.msk [vmem:[#allocation2 + $0x98] sm:$0xf] %vm1746_vm6, %v5159_v17  ;;  %v1800_v57 = vsel %vm6106_vm0, 0, %v1799_v53 }
 0x178   :  { %v1643_v49 = vadd.f32 %v1642_v58, %v1641_v44  ;;  %v1592_v6 = vadd.f32 %v1591_v26, %v1590_v23  ;;  %1751 = vst.msk [vmem:[#allocation2 + $0x54] sm:$0x1] %vm1748_vm13, %v5159_v17  ;;  %1754 = vst.msk [vmem:[#allocation2 + $0x4c] sm:$0x1] %vm1748_vm13, %v5159_v17  ;;  %v1803_v23 = vsel %vm6106_vm0, 0, %v1802_v54 }
 0x179   :  { %1756 = vst.msk [vmem:[#allocation2 + $0x9c] sm:$0x1] %vm1748_vm13, %v5159_v17  ;;  %1801 = vst [vmem:[#allocation2 + $0x68] sm:$0x1] %v1800_v57 }
 0x17a   :  { %v1645_v9 = vadd.f32 %v1644_v7, %v1643_v49  ;;  %1804 = vst [vmem:[#allocation2 + $0x70] sm:$0x1] %v1803_v23  ;;  %v1796_v7 = vld [vmem:[#allocation2 + $0x60] sm:$0x1]  ;;  %vm6358_vm13 = vmor %vm2493_vm10, %vm2494_vm12 }
 0x17b   :  { %v1797_v32 = vsel %vm6106_vm0, 0, %v1796_v7 }
 0x17c   :  { %v1787_v44 = vld [vmem:[#allocation2 + $0x48] sm:$0x1]  ;;  %1798 = vst [vmem:[#allocation2 + $0x60] sm:$0x1] %v1797_v32  ;;  %v1760_v32 = vld [vmem:[#allocation2] sm:$0x1] }
 0x17d   :  { %v1788_v58 = vsel %vm6106_vm0, 0, %v1787_v44  ;;  %v1761_v38 = vsel %vm6106_vm0, 0, %v1760_v32 }
 0x17e   :  { %1789 = vst [vmem:[#allocation2 + $0x48] sm:$0x1] %v1788_v58  ;;  %v1817_v23 = vld [vmem:[#allocation2 + $0x98] sm:$0x1]  ;;  %1762 = vst [vmem:[#allocation2] sm:$0x1] %v1761_v38 }
 0x190   :  { %v6136_v12 = vpop.f32.mrb[0].mxu1 }
 0x191   :  { %v6138_v13 = vpop.f32.mrb[1].mxu1  ;;  %v1629_v34 = vmul.f32 %v6136_v12, %v6136_v12  ;;  %v1597_v62 = vsel %vm1327_vm5, %v6136_v12, 0.0 }
 0x192   :  { %v1593_v46 = vsel %vm1327_vm5, %v6138_v13, 0.0  ;;  %v1627_v18 = vmul.f32 %v6138_v13, %v6138_v13  ;;  %v6144_v22 = vpop.f32.mrb[2].mxu1 }
 0x193   :  { %v1594_v21 = vadd.f32 %v1593_v46, %v1592_v6  ;;  %v6148_v27 = vpop.f32.mrb[3].mxu1  ;;  %v1630_v40 = vmul.f32 %v6144_v22, %v6144_v22  ;;  %v1650_v19 = vsel %vm1327_vm5, %v1629_v34, 0.0  ;;  %v1599_v0 = vsel %vm1327_vm5, %v6144_v22, 0.0  ;;  %v1793_v6 = vld [vmem:[#allocation2 + $0x58] sm:$0x1] }
 0x194   :  { %v1646_v35 = vsel %vm1327_vm5, %v1627_v18, 0.0  ;;  %v1595_v14 = vsel %vm1327_vm5, %v6148_v27, 0.0  ;;  %v1628_v15 = vmul.f32 %v6148_v27, %v6148_v27  ;;  %v1794_v1 = vsel %vm6106_vm0, 0, %v1793_v6 }
 0x195   :  { %v1647_v25 = vadd.f32 %v1646_v35, %v1645_v9  ;;  %v1596_v37 = vadd.f32 %v1595_v14, %v1594_v21  ;;  %v1652_v30 = vsel %vm1327_vm5, %v1630_v40, 0.0  ;;  %1795 = vst [vmem:[#allocation2 + $0x58] sm:$0x1] %v1794_v1  ;;  %v1815_v40 = vsel %vm6106_vm0, 0, %v1814_v50 }
 0x196   :  { %v1648_v39 = vsel %vm1327_vm5, %v1628_v15, 0.0  ;;  %1816 = vst [vmem:[#allocation2 + $0x90] sm:$0x1] %v1815_v40  ;;  %v1818_v1 = vsel %vm6106_vm0, 0, %v1817_v23  ;;  %v1837_v40 = vld [vmem:[#allocation2 + $0x2c] sm:$0x1] }
 0x197   :  { %v1598_v3 = vadd.f32 %v1597_v62, %v1596_v37  ;;  %v1649_v41 = vadd.f32 %v1648_v39, %v1647_v25  ;;  %v1811_v37 = vld [vmem:[#allocation2 + $0x88] sm:$0x1]  ;;  %v1828_v39 = vld [vmem:[#allocation2 + $0x14] sm:$0x1]  ;;  %1819 = vst [vmem:[#allocation2 + $0x98] sm:$0x1] %v1818_v1 }
 0x198   :  { %v1812_v62 = vsel %vm6106_vm0, 0, %v1811_v37 }
 0x199   :  { %v1651_v42 = vadd.f32 %v1650_v19, %v1649_v41  ;;  %v1600_v48 = vadd.f32 %v1599_v0, %v1598_v3  ;;  %1813 = vst [vmem:[#allocation2 + $0x88] sm:$0x1] %v1812_v62  ;;  %v1825_v3 = vld [vmem:[#allocation2 + $0xc] sm:$0x1]  ;;  %v1829_v41 = vsel %vm6114_vm1, 0, %v1828_v39 }
 0x19a   :  { %v1826_v19 = vsel %vm6114_vm1, 0, %v1825_v3  ;;  %1830 = vst [vmem:[#allocation2 + $0x14] sm:$0x1] %v1829_v41  ;;  %v1834_v0 = vld [vmem:[#allocation2 + $0x24] sm:$0x1]  ;;  %v1838_v3 = vsel %vm6114_vm1, 0, %v1837_v40 }
 0x19b   :  { %v1653_v47 = vadd.f32 %v1652_v30, %v1651_v42  ;;  %1827 = vst [vmem:[#allocation2 + $0xc] sm:$0x1] %v1826_v19  ;;  %v1835_v42 = vsel %vm6114_vm1, 0, %v1834_v0  ;;  %v1840_v30 = vld [vmem:[#allocation2 + $0x34] sm:$0x1] }
 0x19c   :  { %1836 = vst [vmem:[#allocation2 + $0x24] sm:$0x1] %v1835_v42  ;;  %v1841_v53 = vsel %vm6114_vm1, 0, %v1840_v30  ;;  %v1858_v41 = vld [vmem:[#allocation2 + $0x64] sm:$0x1] }
 0x19d   :  { %1842 = vst [vmem:[#allocation2 + $0x34] sm:$0x1] %v1841_v53  ;;  %1839 = vst [vmem:[#allocation2 + $0x2c] sm:$0x1] %v1838_v3  ;;  %v1861_v0 = vld [vmem:[#allocation2 + $0x6c] sm:$0x1] }
 0x19e   :  { %v1859_v42 = vsel %vm6114_vm1, 0, %v1858_v41  ;;  %v1862_v30 = vsel %vm6114_vm1, 0, %v1861_v0 }
 0x19f   :  { %1860 = vst [vmem:[#allocation2 + $0x64] sm:$0x1] %v1859_v42  ;;  %1863 = vst [vmem:[#allocation2 + $0x6c] sm:$0x1] %v1862_v30 }
 0x1b0   :  { %v6184_v26 = vpop.f32.mrb[4].mxu1 }
 0x1b1   :  { %v6186_v49 = vpop.f32.mrb[5].mxu1  ;;  %v1633_v16 = vmul.f32 %v6184_v26, %v6184_v26  ;;  %v1605_v63 = vsel %vm1327_vm5, %v6184_v26, 0.0 }
 0x1b2   :  { %v1601_v9 = vsel %vm1327_vm5, %v6186_v49, 0.0  ;;  %v1631_v60 = vmul.f32 %v6186_v49, %v6186_v49  ;;  %v6192_v61 = vpop.f32.mrb[6].mxu1 }
 0x1b3   :  { %v1602_v45 = vadd.f32 %v1601_v9, %v1600_v48  ;;  %v6200_v20 = vpop.f32.mrb[7].mxu1  ;;  %v1634_v46 = vmul.f32 %v6192_v61, %v6192_v61  ;;  %v1658_v21 = vsel %vm1327_vm5, %v1633_v16, 0.0  ;;  %v1607_v34 = vsel %vm1327_vm5, %v6192_v61, 0.0 }
 0x1b4   :  { %v1654_v2 = vsel %vm1327_vm5, %v1631_v60, 0.0  ;;  %v1603_v4 = vsel %vm1327_vm5, %v6200_v20, 0.0  ;;  %v1632_v5 = vmul.f32 %v6200_v20, %v6200_v20 }
 0x1b5   :  { %v1655_v33 = vadd.f32 %v1654_v2, %v1653_v47  ;;  %v1604_v52 = vadd.f32 %v1603_v4, %v1602_v45  ;;  %v1660_v15 = vsel %vm1327_vm5, %v1634_v46, 0.0  ;;  %v1822_v2 = vld [vmem:[#allocation2 + $0x4] sm:$0x1] }
 0x1b6   :  { %v1656_v18 = vsel %vm1327_vm5, %v1632_v5, 0.0 }
 0x1b7   :  { %v1606_v28 = vadd.f32 %v1605_v63, %v1604_v52  ;;  %v1657_v8 = vadd.f32 %v1656_v18, %v1655_v33  ;;  %v1823_v33 = vsel %vm6114_vm1, 0, %v1822_v2  ;;  %v1843_v52 = vld [vmem:[#allocation2 + $0x3c] sm:$0x1]  ;;  %v1876_v2 = vld [vmem:[#allocation2 + $0x94] sm:$0x1] }
 0x1b8   :  { %1824 = vst [vmem:[#allocation2 + $0x4] sm:$0x1] %v1823_v33  ;;  %v1844_v18 = vsel %vm6114_vm1, 0, %v1843_v52 }
 0x1b9   :  { %v1659_v35 = vadd.f32 %v1658_v21, %v1657_v8  ;;  %v1608_v14 = vadd.f32 %v1607_v34, %v1606_v28  ;;  %v1846_v28 = vld [vmem:[#allocation2 + $0x44] sm:$0x1]  ;;  %1845 = vst [vmem:[#allocation2 + $0x3c] sm:$0x1] %v1844_v18 }
 0x1ba   :  { %v1847_v34 = vsel %vm6114_vm1, 0, %v1846_v28 }
 0x1bb   :  { %v1661_v25 = vadd.f32 %v1660_v15, %v1659_v35  ;;  %1848 = vst [vmem:[#allocation2 + $0x44] sm:$0x1] %v1847_v34 }
 0x1d0   :  { %v6230_v48 = vpop.f32.mrb[8].mxu1 }
 0x1d1   :  { %v6232_v47 = vpop.f32.mrb[9].mxu1  ;;  %v1637_v44 = vmul.f32 %v6230_v48, %v6230_v48  ;;  %v1613_v4 = vsel %vm1327_vm5, %v6230_v48, 0.0 }
 0x1d2   :  { %v1609_v54 = vsel %vm1327_vm5, %v6232_v47, 0.0  ;;  %v1635_v17 = vmul.f32 %v6232_v47, %v6232_v47  ;;  %v6240_v57 = vpop.f32.mrb[10].mxu1 }
 0x1d3   :  { %v1610_v58 = vadd.f32 %v1609_v54, %v1608_v14  ;;  %v6244_v6 = vpop.f32.mrb[11].mxu1  ;;  %v1638_v5 = vmul.f32 %v6240_v57, %v6240_v57  ;;  %v1666_v8 = vsel %vm1327_vm5, %v1637_v44, 0.0  ;;  %v1615_v21 = vsel %vm1327_vm5, %v6240_v57, 0.0 }
 0x1d4   :  { %v1662_v7 = vsel %vm1327_vm5, %v1635_v17, 0.0  ;;  %v1611_v9 = vsel %vm1327_vm5, %v6244_v6, 0.0  ;;  %v1636_v60 = vmul.f32 %v6244_v6, %v6244_v6  ;;  %v1864_v17 = vld [vmem:[#allocation2 + $0x74] sm:$0x1] }
 0x1d5   :  { %v1663_v16 = vadd.f32 %v1662_v7, %v1661_v25  ;;  %v1612_v45 = vadd.f32 %v1611_v9, %v1610_v58  ;;  %v1668_v15 = vsel %vm1327_vm5, %v1638_v5, 0.0  ;;  %v1865_v23 = vsel %vm6114_vm1, 0, %v1864_v17 }
 0x1d6   :  { %v1664_v10 = vsel %vm1327_vm5, %v1636_v60, 0.0  ;;  %1866 = vst [vmem:[#allocation2 + $0x74] sm:$0x1] %v1865_v23  ;;  %v1873_v60 = vld [vmem:[#allocation2 + $0x8c] sm:$0x1]  ;;  %v1877_v5 = vsel %vm6114_vm1, 0, %v1876_v2 }
 0x1d7   :  { %v1614_v63 = vadd.f32 %v1613_v4, %v1612_v45  ;;  %v1665_v46 = vadd.f32 %v1664_v10, %v1663_v16  ;;  %v1874_v1 = vsel %vm6114_vm1, 0, %v1873_v60  ;;  %v6280_v4 = vld [vmem:[#allocation2 + $0x48] sm:$0xf]  ;;  %1878 = vst [vmem:[#allocation2 + $0x94] sm:$0x1] %v1877_v5 }
 0x1d8   :  { %1875 = vst [vmem:[#allocation2 + $0x8c] sm:$0x1] %v1874_v1  ;;  %v3060_v33 = vshrl.u32 %v6280_v4, 16  ;;  %v3063_v52 = vshll.u32 %v6280_v4, 16  ;;  %v5129_v5 = vld [vmem:[%s7922_s0 + $0x228] ss:$8 sps:$4 sm:$0xff]  }
 0x1d9   :  { %v1616_v35 = vadd.f32 %v1615_v21, %v1614_v63  ;;  %v1667_v14 = vadd.f32 %v1666_v8, %v1665_v46  ;;  %v1687_v63 = vlaneseq  ;;  %v2944_v8 = vld [vmem:[#allocation2 + $0x98] sm:$0xf]  ;;  %v1584_v21 = vld [vmem:[%s7924_s3] sm:$0x1]  ;;  %s5160_s3 = smov 48  }
 0x1da   :  { %v3062_v46 = vrot.slane %v3060_v33, 4  ;;  %v3065_v18 = vrot.slane %v3063_v52, 5 }
 0x1db   :  { %v1617_v25 = vrot.slane %v1616_v35, 4  ;;  %v1669_v37 = vadd.f32 %v1668_v15, %v1667_v14  ;;  %v1688_v28 = vshrl.u32 %v1687_v63, 7 }
 0x1dc   :  { %v3066_v34 = vor.u32 %v3065_v18, %v3062_v46 }
 0x1dd   :  { %v1618_v50 = vadd.f32 %v1617_v25, %v1616_v35  ;;  %v1670_v62 = vrot.slane %v1669_v37, 4  ;;  %v1849_v35 = vld [vmem:[#allocation2 + $0x4c] sm:$0x1]  ;;  %v6289_v14 = vsub.s32 0, %v1688_v28 }
 0x1de   :  { %v1850_v15 = vsel %vm6114_vm1, 0, %v1849_v35  ;;  %v6296_v3 = vrot.slane %v3066_v34, 4 }
 0x1df   :  { %v1619_v39 = vrot.slane %v1618_v50, 2  ;;  %v1671_v43 = vadd.f32 %v1670_v62, %v1669_v37  ;;  %7957 = vst [vmem:[#allocation3_spill] sm:$0xff] %v6289_v14  ;;  %v3172_v37 = vshrl.u32 %v2944_v8, 16  ;;  %v2445_v62 = vld [vmem:[#allocation2] sm:$0xe] }
 0x1e0   :  { %1851 = vst [vmem:[#allocation2 + $0x4c] sm:$0x1] %v1850_v15 }
 0x1e1   :  { %v1620_v36 = vadd.f32 %v1619_v39, %v1618_v50  ;;  %v1672_v19 = vrot.slane %v1671_v43, 2  ;;  %v3175_v50 = vshll.u32 %v2944_v8, 16  ;;  %v2205_v39 = vld [vmem:[#allocation2 + $0x4] sm:$0x1]  ;;  %v6301_v0 = vrot.slane %v3172_v37, 4 }
 0x1e2   :  { %v2231_v30 = vshll.u32 %v2205_v39, 16 }
 0x1e3   :  { %v1621_v53 = vrot.slane %v1620_v36, 1  ;;  %v1673_v54 = vadd.f32 %v1672_v19, %v1671_v43  ;;  %v1585_v43 = vld [vmem:[%s7925_s4] sm:$0x1]  ;;  %v4752_v19 = vrot.slane %v2445_v62, 9  ;;  %7958 = vst [vmem:[#allocation4_spill] sm:$0xff] %v6301_v0  ;;  %v6303_v42 = vrot.slane %v3175_v50, 5 }
 0x1e4   :  { %v6362_v35 = vrot.slane %v2231_v30, 5  ;;  %s5161_s4 = smov 40  }
 0x1e5   :  { %v1622_v44 = vadd.f32 %v1621_v53, %v1620_v36  ;;  %v1674_v58 = vrot.slane %v1673_v54, 1  ;;  %7959 = vst [vmem:[#allocation5_spill] sm:$0xff] %v6303_v42  ;;  %v2498_v53 = vrot.slane %v2205_v39, 5  ;;  %v2171_v39 = vld [vmem:[#allocation2 + $0x80] sm:$0xf] }
 0x1e6   :  { %7962 = vst [vmem:[#allocation6_spill] sm:$0xff] %v6362_v35 }
 0x1e7   :  { %v1675_v7 = vadd.f32 %v1674_v58, %v1673_v54  ;;  %v1676_v9 = vmul.f32 0.0078125, %v1622_v44  ;;  %v6366_v15 = vsel %vm6358_vm13, %v4752_v19, %v2498_v53  ;;  %v2105_v19 = vld [vmem:[#allocation2 + $0x18] sm:$0xf] }
 0x1e9   :  { %v1677_v32 = vmul.f32 0.0078125, %v1675_v7  ;;  %v1678_v16 = vmul.f32 %v1676_v9, %v1676_v9 }
 0x1eb   :  { %v1679_v45 = vsub.f32 %v1677_v32, %v1678_v16 }
 0x1ed   :  { %v1680_v38 = vmax.f32 %v1679_v45, 0.0 }
 0x1ef   :  { %v1681_v10 = vadd.f32 1e-05, %v1680_v38 }
 0x1f1   :  { %5143 = vrsqrt.f32 %v1681_v10 }
 0x1fb   :  { %v5144_v25 = vpop.eup %5143 }
 0x1fc   :  { %v1683_v40 = vmul.f32 %v5144_v25, %v1584_v21 }
 0x1fe   :  { %v1684_v41 = vmul.f32 %v1683_v40, %v1676_v9  ;;  %v6299_v36 = vrot.slane %v1683_v40, %v6289_v14 }
 0x200   :  { %v1685_v54 = vsub.f32 %v1585_v43, %v1684_v41  ;;  %v1705_v17 = vmul.f32 %v6299_v36, %v6244_v6  ;;  %v1694_v23 = vmul.f32 %v6077_v51, %v6299_v36  ;;  %v1695_v44 = vmul.f32 %v6083_v24, %v6299_v36 }
 0x201   :  { %v1692_v58 = vmul.f32 %v6299_v36, %v6079_v31  ;;  %v1693_v7 = vmul.f32 %v6299_v36, %v6085_v55  ;;  %v1696_v9 = vmul.f32 %v6299_v36, %v6138_v13  ;;  %v1698_v60 = vmul.f32 %v6136_v12, %v6299_v36 }
 0x202   :  { %v6320_v6 = vrot.slane %v1685_v54, %v6289_v14  ;;  %v1699_v51 = vmul.f32 %v6144_v22, %v6299_v36  ;;  %v6326_v24 = vmul.f32 %v6299_v36, %v6148_v27  ;;  %v6330_v31 = vmul.f32 %v6184_v26, %v6299_v36 }
 0x203   :  { %v6334_v55 = vmul.f32 %v6192_v61, %v6299_v36  ;;  %v6338_v12 = vmul.f32 %v6299_v36, %v6186_v49  ;;  %v6342_v13 = vmul.f32 %v6299_v36, %v6200_v20  ;;  %v6346_v22 = vmul.f32 %v6299_v36, %v6232_v47 }
 0x204   :  { %v1727_v27 = vadd.f32 %v6320_v6, %v1705_v17  ;;  %v1716_v26 = vadd.f32 %v6320_v6, %v1694_v23  ;;  %v1717_v1 = vadd.f32 %v6320_v6, %v1695_v44  ;;  %v1714_v61 = vadd.f32 %v6320_v6, %v1692_v58  ;;  %v2174_v23 = vld [vmem:[#allocation2 + $0x84] sm:$0x1] }
 0x205   :  { %v1715_v32 = vadd.f32 %v6320_v6, %v1693_v7  ;;  %v1718_v49 = vadd.f32 %v6320_v6, %v1696_v9  ;;  %v1720_v16 = vadd.f32 %v6320_v6, %v1698_v60  ;;  %v1721_v20 = vadd.f32 %v6320_v6, %v1699_v51 }
 0x206   :  { %v1743_v45 = vmax.f32 %v1727_v27, 0.0  ;;  %v1732_v38 = vmax.f32 %v1716_v26, 0.0  ;;  %v1733_v47 = vmax.f32 %v1717_v1, 0.0  ;;  %v1730_v2 = vmax.f32 %v1714_v61, 0.0  ;;  %v2111_v1 = vld [vmem:[#allocation2 + $0x20] sm:$0xf] }
 0x207   :  { %v1731_v10 = vmax.f32 %v1715_v32, 0.0  ;;  %v1734_v33 = vmax.f32 %v1718_v49, 0.0  ;;  %v1736_v52 = vmax.f32 %v1720_v16, 0.0  ;;  %v1737_v63 = vmax.f32 %v1721_v20, 0.0  ;;  %v2093_v32 = vld [vmem:[#allocation2 + $0x8] sm:$0xf] }
 0x208   :  { %v4930_v46 = vpack.c.bf16 %v1743_v45, %v1743_v45  ;;  %v4919_v18 = vpack.c.bf16 %v1732_v38, %v1732_v38  ;;  %v4920_v28 = vpack.c.bf16 %v1733_v47, %v1733_v47  ;;  %v4917_v8 = vpack.c.bf16 %v1730_v2, %v1730_v2 }
 0x209   :  { %v4918_v21 = vpack.c.bf16 %v1731_v10, %v1731_v10  ;;  %v4921_v34 = vpack.c.bf16 %v1734_v33, %v1734_v33  ;;  %v4923_v50 = vpack.c.bf16 %v1736_v52, %v1736_v52  ;;  %v6368_v62 = vpack.c.bf16 %v1737_v63, %v1737_v63  ;;  %v2099_v63 = vld [vmem:[#allocation2 + $0x10] sm:$0xf] }
 0x20a   :  { %v2035_v25 = vshrl.u32 %v4930_v46, 16  ;;  %v1947_v37 = vshrl.u32 %v4919_v18, 16  ;;  %v2038_v40 = vshll.u32 %v4930_v46, 16  ;;  %v1950_v43 = vshll.u32 %v4919_v18, 16 }
 0x20b   :  { %v1955_v41 = vshrl.u32 %v4920_v28, 16  ;;  %v1931_v54 = vshrl.u32 %v4917_v8, 16  ;;  %v1958_v30 = vshll.u32 %v4920_v28, 16  ;;  %v1939_v58 = vshrl.u32 %v4918_v21, 16 }
 0x20c   :  { %v2037_v17 = vrot.slane %v2035_v25, 7  ;;  %v6370_v44 = vrot.slane %v1947_v37, 7  ;;  %v1934_v9 = vshll.u32 %v4917_v8, 16  ;;  %v1963_v60 = vshrl.u32 %v4921_v34, 16 }
 0x20d   :  { %v6372_v7 = vrot.slane %v1955_v41, 7  ;;  %v6374_v53 = vrot.slane %v1931_v54, 7  ;;  %v1942_v61 = vshll.u32 %v4918_v21, 16  ;;  %v1966_v45 = vshll.u32 %v4921_v34, 16  ;;  %v2117_v34 = vld [vmem:[#allocation2 + $0x28] sm:$0xf] }
 0x20e   :  { %v2040_v51 = vor.u32 %v2038_v40, %v2037_v17  ;;  %v2041_v27 = vrot.slane %v2037_v17, 4  ;;  %v1952_v26 = vor.u32 %v1950_v43, %v6370_v44  ;;  %v1953_v49 = vrot.slane %v6370_v44, 4  ;;  %v2129_v17 = vld [vmem:[#allocation2 + $0x38] sm:$0xf] }
 0x20f   :  { %v1960_v16 = vor.u32 %v1958_v30, %v6372_v7  ;;  %v1936_v20 = vor.u32 %v1934_v9, %v6374_v53  ;;  %v6386_v10 = vrot.slane %v1939_v58, 7  ;;  %v6392_v46 = vrot.slane %v1963_v60, 7 }
 0x210   :  { %v2172_v38 = vsel %vm6132_vm8, %v2040_v51, %v2171_v39  ;;  %v2175_v47 = vsel %vm6106_vm0, %v2041_v27, %v2174_v23  ;;  %v2106_v2 = vsel %vm6132_vm8, %v1952_v26, %v2105_v19  ;;  %v1979_v18 = vshrl.u32 %v4923_v50, 16  ;;  %v2135_v19 = vld [vmem:[#allocation2 + $0x40] sm:$0xf] }
 0x211   :  { %2173 = vst [vmem:[#allocation2 + $0x80] sm:$0xf] %v2172_v38  ;;  %2176 = vst [vmem:[#allocation2 + $0x84] sm:$0x1] %v2175_v47  ;;  %v2112_v33 = vsel %vm6132_vm8, %v1960_v16, %v2111_v1  ;;  %v2094_v52 = vsel %vm6132_vm8, %v1936_v20, %v2093_v32  ;;  %v1944_v21 = vor.u32 %v1942_v61, %v6386_v10  ;;  %v1987_v25 = vshrl.u32 %v6368_v62, 16 }
 0x212   :  { %2107 = vst [vmem:[#allocation2 + $0x18] sm:$0xf] %v2106_v2  ;;  %2113 = vst [vmem:[#allocation2 + $0x20] sm:$0xf] %v2112_v33  ;;  %v1968_v37 = vor.u32 %v1966_v45, %v6392_v46  ;;  %v6399_v40 = vrot.slane %v1979_v18, 7  ;;  %v1982_v39 = vshll.u32 %v4923_v50, 16  ;;  %v1719_v23 = vadd.f32 %v6320_v6, %v6326_v24 }
 0x213   :  { %2095 = vst [vmem:[#allocation2 + $0x8] sm:$0xf] %v2094_v52  ;;  %v1990_v43 = vshll.u32 %v6368_v62, 16  ;;  %v2100_v41 = vsel %vm6132_vm8, %v1944_v21, %v2099_v63  ;;  %v6404_v54 = vrot.slane %v1987_v25, 7  ;;  %v1724_v30 = vadd.f32 %v6320_v6, %v6330_v31  ;;  %v2153_v24 = vld [vmem:[#allocation2 + $0x68] sm:$0xf] }
 0x214   :  { %v1945_v58 = vrot.slane %v6386_v10, 4  ;;  %2101 = vst [vmem:[#allocation2 + $0x10] sm:$0xf] %v2100_v41  ;;  %v2118_v50 = vsel %vm6132_vm8, %v1968_v37, %v2117_v34  ;;  %v1984_v62 = vor.u32 %v1982_v39, %v6399_v40  ;;  %v1725_v9 = vadd.f32 %v6320_v6, %v6334_v55 }
 0x215   :  { %2119 = vst [vmem:[#allocation2 + $0x28] sm:$0xf] %v2118_v50  ;;  %v1992_v51 = vor.u32 %v1990_v43, %v6404_v54  ;;  %v1735_v31 = vmax.f32 %v1719_v23, 0.0  ;;  %v6424_v1 = vadd.f32 %v6320_v6, %v6338_v12  ;;  %v6428_v55 = vadd.f32 %v6320_v6, %v6342_v13 }
 0x216   :  { %v2130_v26 = vsel %vm6132_vm8, %v1984_v62, %v2129_v17  ;;  %v1740_v16 = vmax.f32 %v1724_v30, 0.0  ;;  %v1741_v20 = vmax.f32 %v1725_v9, 0.0  ;;  %v6434_v45 = vadd.f32 %v6320_v6, %v6346_v22 }
 0x217   :  { %2131 = vst [vmem:[#allocation2 + $0x38] sm:$0xf] %v2130_v26  ;;  %v2136_v32 = vsel %vm6132_vm8, %v1992_v51, %v2135_v19  ;;  %v6436_v33 = vpack.c.bf16 %v1735_v31, %v1735_v31  ;;  %v6440_v13 = vmul.f32 %v6230_v48, %v6299_v36 }
 0x218   :  { %2137 = vst [vmem:[#allocation2 + $0x40] sm:$0xf] %v2136_v32 }
 0x219   :  { %v2562_v61 = vld [vmem:[#allocation2 + $0x18] sm:$0xf]  ;;  %v2563_v38 = vld [vmem:[#allocation2 + $0x20] sm:$0xf] }
 0x21a   :  { %v2621_v47 = vshrl.u32 %v2562_v61, 16  ;;  %v2624_v2 = vshll.u32 %v2562_v61, 16  ;;  %v2560_v12 = vld [vmem:[#allocation2 + $0x8] sm:$0xf]  ;;  %v2635_v52 = vshrl.u32 %v2563_v38, 16  ;;  %v2638_v63 = vshll.u32 %v2563_v38, 16 }
 0x21b   :  { %v4825_v18 = vcombine.low %v2562_v61, %v2563_v38  ;;  %v2593_v21 = vshrl.u32 %v2560_v12, 16  ;;  %v2931_v34 = vld [vmem:[#allocation2 + $0x20] sm:$0xf]  ;;  %v2596_v22 = vshll.u32 %v2560_v12, 16  ;;  %v2561_v17 = vld [vmem:[#allocation2 + $0x10] sm:$0xf] }
 0x21c   :  { %v2623_v25 = vrot.slane %v2621_v47, 4  ;;  %v2626_v37 = vrot.slane %v2624_v2, 5  ;;  %v2990_v39 = vshrl.u32 %v2931_v34, 16  ;;  %v2637_v43 = vrot.slane %v2635_v52, 4  ;;  %v2932_v9 = vld [vmem:[#allocation2 + $0x28] sm:$0xf] }
 0x21d   :  { %v2640_v41 = vrot.slane %v2638_v63, 5  ;;  %3459 = vrot.lane.b32.xlu1 %v4825_v18, %s5156_s17  ;;  %v2595_v23 = vrot.slane %v2593_v21, 4  ;;  %v2993_v30 = vshll.u32 %v2931_v34, 16  ;;  %v2607_v62 = vshrl.u32 %v2561_v17, 16  ;;  %v2929_v32 = vld [vmem:[#allocation2 + $0x10] sm:$0xf] }
 0x21e   :  { %v2627_v50 = vor.u32 %v2626_v37, %v2623_v25  ;;  %v2610_v48 = vshll.u32 %v2561_v17, 16  ;;  %v4824_v19 = vcombine.low %v2560_v12, %v2561_v17  ;;  %v2598_v31 = vrot.slane %v2596_v22, 5  ;;  %v2930_v25 = vld [vmem:[#allocation2 + $0x18] sm:$0xf] }
 0x21f   :  { %v2641_v51 = vor.u32 %v2640_v41, %v2637_v43  ;;  %v2992_v26 = vrot.slane %v2990_v39, 4  ;;  %v2995_v61 = vrot.slane %v2993_v30, 5  ;;  %v2609_v38 = vrot.slane %v2607_v62, 4  ;;  %v2566_v41 = vld [vmem:[#allocation2 + $0x38] sm:$0xf] }
 0x220   :  { %v2612_v47 = vrot.slane %v2610_v48, 5  ;;  %3457 = vrot.lane.b32.xlu0 %v4824_v19, %s5156_s17  ;;  %v3004_v2 = vshrl.u32 %v2932_v9, 16  ;;  %v6444_v52 = vpack.c.bf16 %v1740_v16, %v1740_v16  ;;  %v6446_v63 = vrot.slane %v2627_v50, 4  ;;  %v2567_v19 = vld [vmem:[#allocation2 + $0x40] sm:$0xf] }
 0x221   :  { %v2599_v18 = vor.u32 %v2598_v31, %v2595_v23  ;;  %v3007_v21 = vshll.u32 %v2932_v9, 16  ;;  %v6448_v37 = vpack.c.bf16 %v1741_v20, %v1741_v20  ;;  %v6450_v12 = vrot.slane %v2641_v51, 4 }
 0x222   :  { %v3006_v22 = vrot.slane %v3004_v2, 4  ;;  %v4849_v39 = vcombine.low %v2931_v34, %v2932_v9  ;;  %v2962_v43 = vshrl.u32 %v2929_v32, 16  ;;  %v2613_v17 = vor.u32 %v2612_v47, %v2609_v38 }
 0x223   :  { %v2996_v30 = vor.u32 %v2995_v61, %v2992_v26  ;;  %v3009_v62 = vrot.slane %v3007_v21, 5  ;;  %v2965_v48 = vshll.u32 %v2929_v32, 16  ;;  %v6452_v16 = vrot.slane %v2599_v18, 4  ;;  %v6460_v21 = vld [vmem:[#allocation2 + $0x28] sm:$0xf] }
 0x224   :  { %3595 = vrot.lane.b32.xlu1 %v4849_v39, %s5160_s3  ;;  %v2964_v23 = vrot.slane %v2962_v43, 4  ;;  %v2976_v50 = vshrl.u32 %v2930_v25, 16  ;;  %v2979_v20 = vshll.u32 %v2930_v25, 16  ;;  %v4848_v60 = vcombine.low %v2929_v32, %v2930_v25  ;;  %v2935_v32 = vld [vmem:[#allocation2 + $0x40] sm:$0xf] }
 0x225   :  { %v3010_v31 = vor.u32 %v3009_v62, %v3006_v22  ;;  %v2967_v51 = vrot.slane %v2965_v48, 5  ;;  %v2677_v2 = vshrl.u32 %v2566_v41, 16  ;;  %v2680_v27 = vshll.u32 %v2566_v41, 16 }
 0x226   :  { %v2978_v34 = vrot.slane %v2976_v50, 4  ;;  %v2981_v9 = vrot.slane %v2979_v20, 5  ;;  %v2691_v38 = vshrl.u32 %v2567_v19, 16  ;;  %v6455_v26 = vrot.slane %v2613_v17, 4  ;;  %3593 = vrot.lane.b32.xlu0 %v4848_v60, %s5160_s3 }
 0x227   :  { %v6457_v61 = vrot.slane %v2996_v30, 4  ;;  %v2679_v47 = vrot.slane %v2677_v2, 4  ;;  %v2694_v18 = vshll.u32 %v2567_v19, 16  ;;  %v2968_v39 = vor.u32 %v2967_v51, %v2964_v23 }
 0x228   :  { %v2682_v43 = vrot.slane %v2680_v27, 5  ;;  %v2693_v22 = vrot.slane %v2691_v38, 4  ;;  %v4827_v62 = vcombine.low %v2566_v41, %v2567_v19  ;;  %v6462_v25 = vrot.slane %v3010_v31, 4  ;;  %v6471_v31 = vld [vmem:[#allocation2 + $0x38] sm:$0xf] }
 0x229   :  { %v2982_v48 = vor.u32 %v2981_v9, %v2978_v34  ;;  %v2696_v50 = vrot.slane %v2694_v18, 5  ;;  %v1971_v17 = vshrl.u32 %v6436_v33, 16  ;;  %v1974_v60 = vshll.u32 %v6436_v33, 16  ;;  %v2123_v34 = vld [vmem:[#allocation2 + $0x30] sm:$0xf] }
 0x22a   :  { %v2683_v20 = vor.u32 %v2682_v43, %v2679_v47  ;;  %3463 = vrot.lane.b32.xlu1 %v4827_v62, %s5156_s17  ;;  %v2649_v30 = vshrl.u32 %v6460_v21, 16  ;;  %v2652_v2 = vshll.u32 %v6460_v21, 16  ;;  %v3046_v41 = vshrl.u32 %v2935_v32, 16 }
 0x22b   :  { %v2697_v23 = vor.u32 %v2696_v50, %v2693_v22  ;;  %v6469_v27 = vrot.slane %v1971_v17, 7  ;;  %v3049_v19 = vshll.u32 %v2935_v32, 16  ;;  %v6473_v51 = vrot.slane %v2968_v39, 4 }
 0x22c   :  { %v2651_v9 = vrot.slane %v2649_v30, 4  ;;  %v2654_v38 = vrot.slane %v2652_v2, 5  ;;  %v4851_v47 = vcombine.low %v2935_v32, %v6280_v4  ;;  %v6476_v18 = vrot.slane %v2982_v48, 4 }
 0x22d   :  { %v6478_v33 = vrot.slane %v2683_v20, 4  ;;  %v1976_v43 = vor.u32 %v1974_v60, %v6469_v27  ;;  %v3048_v22 = vrot.slane %v3046_v41, 4  ;;  %v6481_v62 = vrot.slane %v2697_v23, 4 }
 0x22e   :  { %7963 = vst [vmem:[#allocation7_spill] sm:$0xff] %v6476_v18  ;;  %v3051_v50 = vrot.slane %v3049_v19, 5  ;;  %3599 = vrot.lane.b32.xlu1 %v4851_v47, %s5160_s3  ;;  %v3032_v39 = vshrl.u32 %v6471_v31, 16  ;;  %v3035_v17 = vshll.u32 %v6471_v31, 16  ;;  %v2655_v4 = vor.u32 %v2654_v38, %v2651_v9  ;;  %v2102_v9 = vld [vmem:[#allocation2 + $0x14] sm:$0x1] }
 0x22f   :  { %v2124_v30 = vsel %vm6132_vm8, %v1976_v43, %v2123_v34  ;;  %v2011_v32 = vshrl.u32 %v6444_v52, 16  ;;  %v2019_v48 = vshrl.u32 %v6448_v37, 16  ;;  %v2014_v23 = vshll.u32 %v6444_v52, 16  ;;  %v2159_v43 = vld [vmem:[#allocation2 + $0x70] sm:$0xf] }
 0x230   :  { %2125 = vst [vmem:[#allocation2 + $0x30] sm:$0xf] %v2124_v30  ;;  %v3052_v20 = vor.u32 %v3051_v50, %v3048_v22  ;;  %v3034_v60 = vrot.slane %v3032_v39, 4  ;;  %v3037_v2 = vrot.slane %v3035_v17, 5  ;;  %v2022_v47 = vshll.u32 %v6448_v37, 16 }
 0x231   :  { %v6491_v41 = vrot.slane %v2011_v32, 7  ;;  %v6493_v19 = vrot.slane %v2019_v48, 7  ;;  %v1738_v34 = vmax.f32 %v6424_v1, 0.0  ;;  %v1739_v30 = vmax.f32 %v6428_v55, 0.0 }
 0x232   :  { %v3038_v38 = vor.u32 %v3037_v2, %v3034_v60  ;;  %v1742_v22 = vmax.f32 %v6434_v45, 0.0  ;;  %v6500_v50 = vrot.slane %v2655_v4, 4  ;;  %v6502_v52 = vrot.slane %v3052_v20, 4 }
 0x233   :  { %v2016_v39 = vor.u32 %v2014_v23, %v6491_v41  ;;  %v2024_v17 = vor.u32 %v2022_v47, %v6493_v19  ;;  %v4925_v32 = vpack.c.bf16 %v1738_v34, %v1738_v34  ;;  %v4926_v1 = vpack.c.bf16 %v1739_v30, %v1739_v30 }
 0x234   :  { %7964 = vst [vmem:[#allocation8_spill] sm:$0xff] %v6500_v50  ;;  %v4929_v48 = vpack.c.bf16 %v1742_v22, %v1742_v22  ;;  %v1707_v45 = vmul.f32 %v6240_v57, %v6299_v36  ;;  %v6515_v4 = vadd.f32 %v6320_v6, %v6440_v13  ;;  %v6517_v20 = vrot.slane %v3038_v38, 4 }
 0x235   :  { %v2154_v60 = vsel %vm6132_vm8, %v2016_v39, %v2153_v24  ;;  %v2160_v55 = vsel %vm6132_vm8, %v2024_v17, %v2159_v43  ;;  %v1995_v23 = vshrl.u32 %v4925_v32, 16  ;;  %v2003_v47 = vshrl.u32 %v4926_v1, 16  ;;  %v2141_v17 = vld [vmem:[#allocation2 + $0x58] sm:$0xf] }
 0x236   :  { %7965 = vst [vmem:[#allocation9_spill] sm:$0xff] %v6517_v20  ;;  %2155 = vst [vmem:[#allocation2 + $0x68] sm:$0xf] %v2154_v60  ;;  %v1998_v30 = vshll.u32 %v4925_v32, 16  ;;  %v2027_v22 = vshrl.u32 %v4929_v48, 16  ;;  %v6521_v43 = vadd.f32 %v6320_v6, %v1707_v45  ;;  %v2103_v57 = vsel %vm6106_vm0, %v1945_v58, %v2102_v9 }
 0x237   :  { %2161 = vst [vmem:[#allocation2 + $0x70] sm:$0xf] %v2160_v55  ;;  %v2565_v34 = vld [vmem:[#allocation2 + $0x30] sm:$0xf]  ;;  %2104 = vst [vmem:[#allocation2 + $0x14] sm:$0x1] %v2103_v57 }
 0x238   :  { %v2933_v24 = vld [vmem:[#allocation2 + $0x30] sm:$0xf]  ;;  %v2663_v36 = vshrl.u32 %v2565_v34, 16  ;;  %v2666_v13 = vshll.u32 %v2565_v34, 16  ;;  %v4826_v38 = vcombine.low %v6460_v21, %v2565_v34  ;;  %v6528_v55 = vrot.slane %v1995_v23, 7 }
 0x239   :  { %v3018_v39 = vshrl.u32 %v2933_v24, 16  ;;  %v3021_v60 = vshll.u32 %v2933_v24, 16  ;;  %v6530_v32 = vrot.slane %v2003_v47, 7  ;;  %v2006_v2 = vshll.u32 %v4926_v1, 16  ;;  %v2147_v6 = vld [vmem:[#allocation2 + $0x60] sm:$0xf] }
 0x23a   :  { %v2665_v45 = vrot.slane %v2663_v36, 4  ;;  %v2668_v37 = vrot.slane %v2666_v13, 5  ;;  %3461 = vrot.lane.b32.xlu0 %v4826_v38, %s5156_s17  ;;  %v6533_v10 = vrot.slane %v2027_v22, 7  ;;  %v2030_v58 = vshll.u32 %v4929_v48, 16  ;;  %v2108_v9 = vld [vmem:[#allocation2 + $0x1c] sm:$0x1] }
 0x23b   :  { %v3020_v28 = vrot.slane %v3018_v39, 4  ;;  %v3023_v21 = vrot.slane %v3021_v60, 5  ;;  %v2000_v34 = vor.u32 %v1998_v30, %v6528_v55  ;;  %v2008_v57 = vor.u32 %v2006_v2, %v6530_v32  ;;  %v2165_v13 = vld [vmem:[#allocation2 + $0x78] sm:$0xf] }
 0x23c   :  { %v4850_v23 = vcombine.low %v2933_v24, %v6471_v31  ;;  %v2032_v36 = vor.u32 %v2030_v58, %v6533_v10  ;;  %v2669_v38 = vor.u32 %v2668_v37, %v2665_v45  ;;  %v2109_v31 = vsel %vm6106_vm0, %v1953_v49, %v2108_v9 }
 0x23d   :  { %v2570_v22 = vld [vmem:[#allocation2 + $0x68] sm:$0xf]  ;;  %v2142_v48 = vsel %vm6132_vm8, %v2000_v34, %v2141_v17  ;;  %v2148_v30 = vsel %vm6132_vm8, %v2008_v57, %v2147_v6  ;;  %2110 = vst [vmem:[#allocation2 + $0x1c] sm:$0x1] %v2109_v31  ;;  %v3024_v6 = vor.u32 %v3023_v21, %v3020_v28 }
 0x23e   :  { %v2571_v8 = vld [vmem:[#allocation2 + $0x70] sm:$0xf]  ;;  %3597 = vrot.lane.b32.xlu0 %v4850_v23, %s5160_s3  ;;  %v2733_v2 = vshrl.u32 %v2570_v22, 16  ;;  %v2736_v24 = vshll.u32 %v2570_v22, 16  ;;  %2143 = vst [vmem:[#allocation2 + $0x58] sm:$0xf] %v2142_v48  ;;  %v2166_v44 = vsel %vm6132_vm8, %v2032_v36, %v2165_v13 }
 0x23f   :  { %v6545_v39 = vld [vmem:[#allocation2 + $0x70] sm:$0xf]  ;;  %v2747_v37 = vshrl.u32 %v2571_v8, 16  ;;  %2149 = vst [vmem:[#allocation2 + $0x60] sm:$0xf] %v2148_v30  ;;  %v2750_v45 = vshll.u32 %v2571_v8, 16  ;;  %v4829_v58 = vcombine.low %v2570_v22, %v2571_v8 }
 0x240   :  { %v6553_v17 = vld [vmem:[#allocation2 + $0x68] sm:$0xf]  ;;  %v2735_v34 = vrot.slane %v2733_v2, 4  ;;  %v2738_v49 = vrot.slane %v2736_v24, 5  ;;  %2167 = vst [vmem:[#allocation2 + $0x78] sm:$0xf] %v2166_v44 }
 0x241   :  { %v2749_v9 = vrot.slane %v2747_v37, 4  ;;  %v3102_v57 = vshrl.u32 %v6545_v39, 16  ;;  %v2752_v23 = vrot.slane %v2750_v45, 5  ;;  %3467 = vrot.lane.b32.xlu1 %v4829_v58, %s5156_s17  ;;  %v3105_v48 = vshll.u32 %v6545_v39, 16  ;;  %v6564_v13 = vld [vmem:[#allocation2 + $0x80] sm:$0xf] }
 0x242   :  { %v3088_v30 = vshrl.u32 %v6553_v17, 16  ;;  %v3091_v28 = vshll.u32 %v6553_v17, 16  ;;  %v2739_v21 = vor.u32 %v2738_v49, %v2735_v34  ;;  %v1744_v22 = vmax.f32 %v6515_v4, 0.0 }
 0x243   :  { %v3104_v8 = vrot.slane %v3102_v57, 4  ;;  %v1745_v36 = vmax.f32 %v6521_v43, 0.0  ;;  %v2753_v31 = vor.u32 %v2752_v23, %v2749_v9  ;;  %v3107_v2 = vrot.slane %v3105_v48, 5 }
 0x244   :  { %v3090_v24 = vrot.slane %v3088_v30, 4  ;;  %v3093_v37 = vrot.slane %v3091_v28, 5  ;;  %v6566_v45 = vrot.slane %v2669_v38, 4  ;;  %v6568_v58 = vrot.slane %v3024_v6, 4 }
 0x245   :  { %v6570_v44 = vrot.slane %v2739_v21, 4  ;;  %v4931_v60 = vpack.c.bf16 %v1744_v22, %v1744_v22  ;;  %v6572_v47 = vrot.slane %v2753_v31, 4  ;;  %v2568_v34 = vld [vmem:[#allocation2 + $0x58] sm:$0xf]  ;;  %v3108_v4 = vor.u32 %v3107_v2, %v3104_v8 }
 0x246   :  { %7966 = vst [vmem:[#allocation10_spill] sm:$0xff] %v6566_v45  ;;  %7967 = vst [vmem:[#allocation11_spill] sm:$0xff] %v6568_v58  ;;  %v2569_v49 = vld [vmem:[#allocation2 + $0x60] sm:$0xf]  ;;  %v4932_v57 = vpack.c.bf16 %v1745_v36, %v1745_v36  ;;  %v2775_v43 = vshrl.u32 %v6564_v13, 16  ;;  %v2705_v1 = vshrl.u32 %v2568_v34, 16  ;;  %v3094_v21 = vor.u32 %v3093_v37, %v3090_v24 }
 0x247   :  { %7968 = vst [vmem:[#allocation12_spill] sm:$0xff] %v6570_v44  ;;  %7969 = vst [vmem:[#allocation13_spill] sm:$0xff] %v6572_v47  ;;  %v2708_v9 = vshll.u32 %v2568_v34, 16  ;;  %v2719_v23 = vshrl.u32 %v2569_v49, 16  ;;  %v2722_v48 = vshll.u32 %v2569_v49, 16  ;;  %v4828_v38 = vcombine.low %v2568_v34, %v2569_v49 }
 0x248   :  { %v2937_v30 = vld [vmem:[#allocation2 + $0x60] sm:$0xf]  ;;  %v2940_v28 = vld [vmem:[#allocation2 + $0x78] sm:$0xf]  ;;  %v2707_v42 = vrot.slane %v2705_v1, 4  ;;  %v2778_v34 = vshll.u32 %v6564_v13, 16 }
 0x249   :  { %v3074_v6 = vshrl.u32 %v2937_v30, 16  ;;  %v3077_v14 = vshll.u32 %v2937_v30, 16  ;;  %v2710_v22 = vrot.slane %v2708_v9, 5  ;;  %v2721_v31 = vrot.slane %v2719_v23, 4  ;;  %3465 = vrot.lane.b32.xlu0 %v4828_v38, %s5156_s17  ;;  %v2572_v37 = vld [vmem:[#allocation2 + $0x78] sm:$0xf] }
 0x24a   :  { %v2724_v0 = vrot.slane %v2722_v48, 5  ;;  %v3116_v8 = vshrl.u32 %v2940_v28, 16  ;;  %v3119_v36 = vshll.u32 %v2940_v28, 16  ;;  %v4853_v2 = vcombine.low %v6545_v39, %v2940_v28 }
 0x24b   :  { %v3076_v20 = vrot.slane %v3074_v6, 4  ;;  %v2711_v58 = vor.u32 %v2710_v22, %v2707_v42  ;;  %v3079_v50 = vrot.slane %v3077_v14, 5  ;;  %v4852_v1 = vcombine.low %v2937_v30, %v6553_v17  ;;  %v2177_v42 = vld [vmem:[#allocation2 + $0x88] sm:$0xf]  ;;  %v6589_v6 = vld [vmem:[#allocation2 + $0x80] sm:$0xf] }
 0x24c   :  { %v2725_v45 = vor.u32 %v2724_v0, %v2721_v31  ;;  %v3118_v49 = vrot.slane %v3116_v8, 4  ;;  %v3121_v47 = vrot.slane %v3119_v36, 5  ;;  %3603 = vrot.lane.b32.xlu1 %v4853_v2, %s5160_s3  ;;  %v2043_v24 = vshrl.u32 %v4931_v60, 16  ;;  %v2183_v30 = vld [vmem:[#allocation2 + $0x90] sm:$0xf] }
 0x24d   :  { %v6580_v9 = vrot.slane %v2711_v58, 4  ;;  %v6582_v23 = vrot.slane %v3108_v4, 4  ;;  %v3080_v48 = vor.u32 %v3079_v50, %v3076_v20  ;;  %v6584_v39 = vrot.slane %v3094_v21, 4  ;;  %3601 = vrot.lane.b32.xlu0 %v4852_v1, %s5160_s3  ;;  %v2447_v31 = vld [vmem:[#allocation2 + $0x10] sm:$0xe] }
 0x24e   :  { %v3122_v0 = vor.u32 %v3121_v47, %v3118_v49  ;;  %v6587_v14 = vrot.slane %v2043_v24, 7  ;;  %v2046_v38 = vshll.u32 %v4931_v60, 16  ;;  %v2051_v28 = vshrl.u32 %v4932_v57, 16  ;;  %v2448_v8 = vld [vmem:[#allocation2 + $0x18] sm:$0xe] }
 0x24f   :  { %7970 = vst [vmem:[#allocation14_spill] sm:$0xff] %v6580_v9  ;;  %7971 = vst [vmem:[#allocation15_spill] sm:$0xff] %v6582_v23  ;;  %v6591_v17 = vrot.slane %v2725_v45, 4  ;;  %v2761_v58 = vshrl.u32 %v2572_v37, 16  ;;  %v2764_v22 = vshll.u32 %v2572_v37, 16  ;;  %v2777_v4 = vrot.slane %v2775_v43, 4 }
 0x250   :  { %7972 = vst [vmem:[#allocation16_spill] sm:$0xff] %v6584_v39  ;;  %v6593_v50 = vrot.slane %v3080_v48, 4  ;;  %v2048_v20 = vor.u32 %v2046_v38, %v6587_v14  ;;  %v6596_v47 = vrot.slane %v2051_v28, 7  ;;  %v2054_v21 = vshll.u32 %v4932_v57, 16  ;;  %v6599_v45 = vld [vmem:[#allocation2 + $0x14] sm:$0x1] }
 0x251   :  { %7973 = vst [vmem:[#allocation17_spill] sm:$0xff] %v6591_v17  ;;  %v2763_v36 = vrot.slane %v2761_v58, 4  ;;  %v2766_v60 = vrot.slane %v2764_v22, 5  ;;  %v2780_v2 = vrot.slane %v2778_v34, 5  ;;  %v4830_v49 = vcombine.low %v2572_v37, %v6564_v13  ;;  %v2096_v1 = vld [vmem:[#allocation2 + $0xc] sm:$0x1] }
 0x252   :  { %7974 = vst [vmem:[#allocation18_spill] sm:$0xff] %v6593_v50  ;;  %v6601_v24 = vrot.slane %v3122_v0, 4  ;;  %v2056_v43 = vor.u32 %v2054_v21, %v6596_v47  ;;  %v2178_v48 = vsel %vm6132_vm8, %v2048_v20, %v2177_v42  ;;  %v3130_v38 = vshrl.u32 %v6589_v6, 16  ;;  %v6607_v28 = vld [vmem:[#allocation2 + $0x1c] sm:$0x1] }
 0x253   :  { %v2114_v57 = vld [vmem:[#allocation2 + $0x24] sm:$0x1]  ;;  %2179 = vst [vmem:[#allocation2 + $0x88] sm:$0xf] %v2178_v48  ;;  %v2767_v58 = vor.u32 %v2766_v60, %v2763_v36  ;;  %v2781_v34 = vor.u32 %v2780_v2, %v2777_v4  ;;  %3469 = vrot.lane.b32.xlu0 %v4830_v49, %s5156_s17  ;;  %v3133_v13 = vshll.u32 %v6589_v6, 16  ;;  %v4754_v37 = vrot.slane %v2447_v31, 9 }
 0x254   :  { %7975 = vst [vmem:[#allocation19_spill] sm:$0xff] %v6601_v24  ;;  %v6611_v0 = vld [vmem:[#allocation2 + $0x8] sm:$0xe]  ;;  %v2818_v22 = vld [vmem:[#allocation2 + $0x18] sm:$0xe]  ;;  %v2184_v21 = vsel %vm6132_vm8, %v2056_v43, %v2183_v30  ;;  %v3132_v42 = vrot.slane %v3130_v38, 4 }
 0x255   :  { %v2506_v20 = vrot.slane %v6599_v45, 5  ;;  %v4755_v39 = vrot.slane %v2448_v8, 9  ;;  %v2578_v50 = vld [vmem:[#allocation2 + $0x1c] sm:$0x1]  ;;  %2185 = vst [vmem:[#allocation2 + $0x90] sm:$0xf] %v2184_v21 }
 0x256   :  { %v3135_v36 = vrot.slane %v3133_v13, 5  ;;  %v2510_v60 = vrot.slane %v6607_v28, 5  ;;  %v2577_v31 = vld [vmem:[#allocation2 + $0x14] sm:$0x1]  ;;  %v6619_v2 = vrot.slane %v2767_v58, 4  ;;  %v7977_v30 = vrot.slane %v6374_v53, 4 }
 0x257   :  { %v6623_v11 = vsel %vm6358_vm13, %v4754_v37, %v2506_v20  ;;  %v7978_v49 = vrot.slane %v6372_v7, 4  ;;  %v6633_v38 = vld [vmem:[#allocation2 + $0x20] sm:$0xe]  ;;  %v6635_v13 = vld [vmem:[#allocation2 + $0x8] sm:$0xe]  ;;  %v2630_v53 = vshll.u32 %v2578_v50, 16 }
 0x258   :  { %7976 = vst [vmem:[#allocation20_spill] sm:$0xff] %v6619_v2  ;;  %v2097_v8 = vsel %vm6106_vm0, %v7977_v30, %v2096_v1  ;;  %v3136_v58 = vor.u32 %v3135_v36, %v3132_v42  ;;  %v6639_v21 = vsel %vm6358_vm13, %v4755_v39, %v2510_v60  ;;  %v4770_v37 = vrot.slane %v2818_v22, 9  ;;  %v2817_v20 = vld [vmem:[#allocation2 + $0x10] sm:$0xe]  ;;  %v2126_v1 = vld [vmem:[#allocation2 + $0x34] sm:$0x1] }
 0x259   :  { %v2115_v43 = vsel %vm6106_vm0, %v7978_v49, %v2114_v57  ;;  %2098 = vst [vmem:[#allocation2 + $0xc] sm:$0x1] %v2097_v8  ;;  %v6641_v30 = vrot.slane %v2781_v34, 4  ;;  %v4753_v7 = vrot.slane %v6611_v0, 9  ;;  %v2874_v57 = vrot.slane %v2578_v50, 5 }
 0x25a   :  { %2116 = vst [vmem:[#allocation2 + $0x24] sm:$0x1] %v2115_v43  ;;  %v2616_v49 = vshll.u32 %v2577_v31, 16  ;;  %v6644_v4 = vrot.slane %v3136_v58, 4  ;;  %v6646_v48 = vrot.slane %v2630_v53, 5  ;;  %v4769_v34 = vrot.slane %v2817_v20, 9 }
 0x25b   :  { %7979 = vst [vmem:[#allocation21_spill] sm:$0xff] %v6641_v30  ;;  %v2132_v36 = vld [vmem:[#allocation2 + $0x3c] sm:$0x1]  ;;  %v2574_v60 = vld [vmem:[#allocation2 + $0x88] sm:$0xf]  ;;  %v2870_v43 = vrot.slane %v2577_v31, 5  ;;  %v6658_v42 = vsel %vm6358_vm13, %v4770_v37, %v2874_v57 }
 0x25c   :  { %7980 = vst [vmem:[#allocation22_spill] sm:$0xff] %v6644_v4  ;;  %v2942_v8 = vld [vmem:[#allocation2 + $0x88] sm:$0xf]  ;;  %v7981_v0 = vrot.slane %v6469_v27, 4  ;;  %v2789_v58 = vshrl.u32 %v2574_v60, 16  ;;  %v2792_v53 = vshll.u32 %v2574_v60, 16 }
 0x25d   :  { %v3144_v4 = vshrl.u32 %v2942_v8, 16  ;;  %v2575_v39 = vld [vmem:[#allocation2 + $0x90] sm:$0xf]  ;;  %v3147_v2 = vshll.u32 %v2942_v8, 16  ;;  %v4854_v22 = vcombine.low %v6589_v6, %v2942_v8  ;;  %v6661_v20 = vrot.slane %v2616_v49, 5 }
 0x25e   :  { %v2127_v50 = vsel %vm6106_vm0, %v7981_v0, %v2126_v1  ;;  %v2943_v30 = vld [vmem:[#allocation2 + $0x90] sm:$0xf]  ;;  %v7982_v27 = vrot.slane %v6399_v40, 4  ;;  %v2791_v1 = vrot.slane %v2789_v58, 4  ;;  %v2794_v0 = vrot.slane %v2792_v53, 5 }
 0x25f   :  { %2128 = vst [vmem:[#allocation2 + $0x34] sm:$0x1] %v2127_v50  ;;  %v2803_v17 = vshrl.u32 %v2575_v39, 16  ;;  %v2806_v9 = vshll.u32 %v2575_v39, 16  ;;  %v6667_v37 = vld [vmem:[#allocation2 + $0x30] sm:$0xe]  ;;  %v4831_v57 = vcombine.low %v2574_v60, %v2575_v39  ;;  %3605 = vrot.lane.b32.xlu0 %v4854_v22, %s5160_s3  ;;  %v6672_v40 = vsel %vm6358_vm13, %v4769_v34, %v2870_v43 }
 0x260   :  { %v2133_v31 = vsel %vm6106_vm0, %v7982_v27, %v2132_v36  ;;  %v3158_v50 = vshrl.u32 %v2943_v30, 16  ;;  %v3161_v24 = vshll.u32 %v2943_v30, 16  ;;  %v2206_v6 = vld [vmem:[#allocation2 + $0xc] sm:$0x1]  ;;  %v2795_v8 = vor.u32 %v2794_v0, %v2791_v1  ;;  %v5149_v43 = vld [vmem:[#allocation2 + $0x98] sm:$0xf] }
 0x261   :  { %2134 = vst [vmem:[#allocation2 + $0x3c] sm:$0x1] %v2133_v31  ;;  %v2579_v49 = vld [vmem:[#allocation2 + $0x24] sm:$0x1]  ;;  %v2805_v36 = vrot.slane %v2803_v17, 4  ;;  %v2808_v58 = vrot.slane %v2806_v9, 5  ;;  %3471 = vrot.lane.b32.xlu1 %v4831_v57, %s5156_s17  ;;  %v4855_v17 = vcombine.low %v2943_v30, %v5149_v43 }
 0x262   :  { %v3146_v53 = vrot.slane %v3144_v4, 4  ;;  %v6675_v27 = vrot.slane %v3158_v50, 4  ;;  %v6677_v31 = vrot.slane %v3161_v24, 5  ;;  %v3149_v39 = vrot.slane %v3147_v2, 5  ;;  %v2576_v23 = vld [vmem:[#allocation2 + $0xc] sm:$0x1] }
 0x263   :  { %v2245_v60 = vshll.u32 %v2206_v6, 16  ;;  %v2809_v22 = vor.u32 %v2808_v58, %v2805_v36  ;;  %v2502_v44 = vrot.slane %v2206_v6, 5  ;;  %v2644_v35 = vshll.u32 %v2579_v49, 16  ;;  %v2452_v50 = vld [vmem:[#allocation2 + $0x38] sm:$0xe] }
 0x264   :  { %7983 = vst [vmem:[#allocation23_spill] sm:$0xff] %v6675_v27  ;;  %7984 = vst [vmem:[#allocation24_spill] sm:$0xff] %v6677_v31  ;;  %v4758_v18 = vrot.slane %v6667_v37, 9  ;;  %v6680_v34 = vrot.slane %v2795_v8, 4  ;;  %v3150_v9 = vor.u32 %v3149_v39, %v3146_v53  ;;  %v2878_v4 = vrot.slane %v2579_v49, 5 }
 0x265   :  { %v6684_v24 = vrot.slane %v2245_v60, 5  ;;  %v2503_v2 = vsel %vm6358_vm13, %v4753_v7, %v2502_v44  ;;  %v2602_v57 = vshll.u32 %v2576_v23, 16  ;;  %v2945_v6 = vld [vmem:[#allocation2 + $0x14] sm:$0x1]  ;;  %v6688_v36 = vrot.slane %v2809_v22, 4  ;;  %3607 = vrot.lane.b32.xlu1 %v4855_v17, %s5160_s3 }
 0x266   :  { %7985 = vst [vmem:[#allocation25_spill] sm:$0xff] %v6680_v34  ;;  %v2211_v1 = vld [vmem:[#allocation2 + $0x34] sm:$0x1]  ;;  %v4816_v30 = vcombine.low %v6366_v15, %v2503_v2  ;;  %v6692_v37 = vrot.slane %v2644_v35, 5  ;;  %v7988_v49 = vrot.slane %v6633_v38, 9  ;;  %v6698_v39 = vrot.slane %v3150_v9, 4 }
 0x267   :  { %7986 = vst [vmem:[#allocation26_spill] sm:$0xff] %v6684_v24  ;;  %7987 = vst [vmem:[#allocation27_spill] sm:$0xff] %v6688_v36  ;;  %v2946_v53 = vld [vmem:[#allocation2 + $0x1c] sm:$0x1]  ;;  %v2866_v7 = vrot.slane %v2576_v23, 5  ;;  %v2315_v60 = vshll.u32 %v2211_v1, 16 }
 0x268   :  { %v2879_v8 = vsel %vm6358_vm13, %v7988_v49, %v2878_v4  ;;  %v2212_v58 = vld [vmem:[#allocation2 + $0x3c] sm:$0x1]  ;;  %7989 = vst [vmem:[#allocation28_spill] sm:$0xff] %v6698_v39  ;;  %v3185_v22 = vld [vmem:[#allocation2 + $0x10] sm:$0xe]  ;;  %3401 = vrot.lane.b32.xlu0 %v4816_v30, %s5153_s20  ;;  %v2522_v35 = vrot.slane %v2211_v1, 5  ;;  %v7991_v30 = vcombine.low %v6623_v11, %v6639_v21 }
 0x269   :  { %v4841_v44 = vcombine.low %v6658_v42, %v2879_v8  ;;  %v2138_v43 = vld [vmem:[#allocation2 + $0x44] sm:$0x1]  ;;  %v2329_v15 = vshll.u32 %v2212_v58, 16  ;;  %v4759_v17 = vrot.slane %v2452_v50, 9  ;;  %v2526_v2 = vrot.slane %v2212_v58, 5 }
 0x26a   :  { %v3186_v38 = vld [vmem:[#allocation2 + $0x18] sm:$0xe]  ;;  %v6702_v0 = vrot.slane %v2602_v57, 5  ;;  %v7990_v4 = vrot.slane %v6635_v13, 9  ;;  %v2971_v49 = vshll.u32 %v2945_v6, 16  ;;  %v2985_v42 = vshll.u32 %v2946_v53, 16  ;;  %3403 = vrot.lane.b32.xlu1 %v7991_v30, %s5153_s20 }
 0x26b   :  { %v2822_v23 = vld [vmem:[#allocation2 + $0x38] sm:$0xe]  ;;  %v2120_v8 = vld [vmem:[#allocation2 + $0x2c] sm:$0x1]  ;;  %v6713_v50 = vrot.slane %v2315_v60, 5  ;;  %v2523_v57 = vsel %vm6358_vm13, %v4758_v18, %v2522_v35  ;;  %v2527_v13 = vsel %vm6358_vm13, %v4759_v17, %v2526_v2  ;;  %v6721_v39 = vrot.slane %v2329_v15, 5 }
 0x26c   :  { %v2867_v9 = vsel %vm6358_vm13, %v7990_v4, %v2866_v7  ;;  %v2582_v58 = vld [vmem:[#allocation2 + $0x3c] sm:$0x1]  ;;  %v6719_v7 = vld [vmem:[#allocation2 + $0x40] sm:$0xe]  ;;  %v4819_v27 = vcombine.low %v2523_v57, %v2527_v13  ;;  %v6723_v31 = vrot.slane %v2971_v49, 5  ;;  %v4784_v11 = vrot.slane %v3185_v22, 9 }
 0x26d   :  { %v4840_v1 = vcombine.low %v2867_v9, %v6672_v40  ;;  %v3187_v4 = vld [vmem:[#allocation2 + $0x20] sm:$0xe]  ;;  %v2947_v21 = vld [vmem:[#allocation2 + $0x24] sm:$0x1]  ;;  %v3235_v60 = vrot.slane %v2945_v6, 5  ;;  %v4785_v18 = vrot.slane %v3186_v38, 9 }
 0x26e   :  { %v2150_v40 = vld [vmem:[#allocation2 + $0x64] sm:$0x1]  ;;  %v3239_v35 = vrot.slane %v2946_v53, 5  ;;  %v7992_v17 = vrot.slane %v6404_v54, 4  ;;  %v6730_v9 = vld [vmem:[#allocation2 + $0x28] sm:$0xe]  ;;  %3539 = vrot.lane.b32.xlu1 %v4841_v44, %s5161_s4 }
 0x26f   :  { %3537 = vrot.lane.b32.xlu0 %v4840_v1, %s5161_s4  ;;  %v2156_v15 = vld [vmem:[#allocation2 + $0x6c] sm:$0x1]  ;;  %v6732_v30 = vld [vmem:[#allocation2 + $0x60] sm:$0xe]  ;;  %v6734_v49 = vrot.slane %v2985_v42, 5  ;;  %v2686_v22 = vshll.u32 %v2582_v58, 16  ;;  %v3236_v54 = vsel %vm6358_vm13, %v4784_v11, %v3235_v60 }
 0x270   :  { %v2139_v2 = vsel %vm6106_vm0, %v7992_v17, %v2138_v43  ;;  %v4774_v57 = vrot.slane %v2822_v23, 9  ;;  %v2890_v13 = vrot.slane %v2582_v58, 5  ;;  %v2449_v1 = vld [vmem:[#allocation2 + $0x20] sm:$0xe]  ;;  %v3240_v53 = vsel %vm6358_vm13, %v4785_v18, %v3239_v35  ;;  %v2209_v23 = vld [vmem:[#allocation2 + $0x24] sm:$0x1] }
 0x271   :  { %7993 = vst [vmem:[#allocation29_spill] sm:$0xff] %v6734_v49  ;;  %2140 = vst [vmem:[#allocation2 + $0x44] sm:$0x1] %v2139_v2  ;;  %v4101_v6 = vld [vmem:[%s7926_s7] sm:$0x3]  ;;  %v7994_v43 = vrot.slane %v6392_v46, 4  ;;  %v4864_v11 = vcombine.low %v3236_v54, %v3240_v53 }
 0x272   :  { %v2999_v42 = vshll.u32 %v2947_v21, 16  ;;  %v6748_v58 = vld [vmem:[#allocation2 + $0x28] sm:$0xe]  ;;  %v2162_v17 = vld [vmem:[#allocation2 + $0x74] sm:$0x1]  ;;  %5041 = vmatprep.subr.msk.bf16.mxu0 %vm1483_vm3, %v4101_v6  ;;  %v6754_v60 = vrot.slane %v2686_v22, 5  ;;  %v2891_v6 = vsel %vm6358_vm13, %v4774_v57, %v2890_v13  ;;  %3407 = vrot.lane.b32.xlu1 %v4819_v27, %s5153_s20 }
 0x273   :  { %v2121_v38 = vsel %vm6106_vm0, %v7994_v43, %v2120_v8  ;;  %v5122_v44 = vld [vmem:[%s7922_s0 + $0x1b0] ss:$8 sps:$4 sm:$0xff]   ;;  %v4775_v18 = vrot.slane %v6719_v7, 9  ;;  %v4786_v46 = vrot.slane %v3187_v4, 9  ;;  %v6757_v35 = vld [vmem:[#allocation2 + $0x68] sm:$0xe]  ;;  %3673 = vrot.lane.b32.xlu0 %v4864_v11, %s5162_s14 }
 0x274   :  { %2122 = vst [vmem:[#allocation2 + $0x2c] sm:$0x1] %v2121_v38  ;;  %v6759_v8 = vld [vmem:[#allocation2 + $0x28] sm:$0xe]  ;;  %v6761_v2 = vld [vmem:[#allocation2 + $0x30] sm:$0xe]  ;;  %5016 = vmatprep.mubr.msk.bf16.mxu0 %vm1302_vm4, %v5122_v44 }
 0x275   :  { %v6765_v43 = vrot.slane %v2999_v42, 5  ;;  %v3243_v36 = vrot.slane %v2947_v21, 5  ;;  %v7995_v54 = vrot.slane %v6530_v32, 4  ;;  %v6771_v7 = vld [vmem:[#allocation2 + $0x68] sm:$0xe]  ;;  %v4787_v53 = vrot.slane %v6730_v9, 9 }
 0x276   :  { %v6773_v4 = vld [vmem:[#allocation2 + $0x70] sm:$0xe]  ;;  %v7996_v57 = vrot.slane %v6491_v41, 4  ;;  %v4762_v21 = vrot.slane %v6732_v30, 9  ;;  %v6783_v13 = vld [vmem:[#allocation2 + $0x34] sm:$0x1] }
 0x277   :  { %v2151_v22 = vsel %vm6106_vm0, %v7995_v54, %v2150_v40  ;;  %v2287_v40 = vshll.u32 %v2209_v23, 16  ;;  %v3244_v38 = vsel %vm6358_vm13, %v4786_v46, %v3243_v36  ;;  %v4763_v42 = vrot.slane %v6757_v35, 9  ;;  %v2180_v11 = vld [vmem:[#allocation2 + $0x8c] sm:$0x1]  ;;  %v2459_v24 = vld [vmem:[#allocation2 + $0x80] sm:$0xe] }
 0x278   :  { %2152 = vst [vmem:[#allocation2 + $0x64] sm:$0x1] %v2151_v22  ;;  %v2157_v32 = vsel %vm6106_vm0, %v7996_v57, %v2156_v15  ;;  %v4756_v9 = vrot.slane %v2449_v1, 9  ;;  %v2514_v44 = vrot.slane %v2209_v23, 5  ;;  %v4757_v15 = vrot.slane %v6748_v58, 9 }
 0x279   :  { %2158 = vst [vmem:[#allocation2 + $0x6c] sm:$0x1] %v2157_v32  ;;  %v6789_v41 = vrot.slane %v2287_v40, 5  ;;  %v7997_v30 = vrot.slane %v6493_v19, 4  ;;  %v2186_v22 = vld [vmem:[#allocation2 + $0x94] sm:$0x1] }
 0x27a   :  { %v2583_v57 = vld [vmem:[#allocation2 + $0x44] sm:$0x1]  ;;  %v4779_v36 = vrot.slane %v6773_v4, 9  ;;  %v4773_v46 = vrot.slane %v6761_v2, 9  ;;  %v2886_v19 = vrot.slane %v6783_v13, 5  ;;  %v7998_v32 = vrot.slane %v6587_v14, 4 }
 0x27b   :  { %v2163_v54 = vsel %vm6106_vm0, %v7997_v30, %v2162_v17  ;;  %v2700_v35 = vshll.u32 %v2583_v57, 16  ;;  %v2894_v58 = vrot.slane %v2583_v57, 5  ;;  %v2948_v40 = vld [vmem:[#allocation2 + $0x2c] sm:$0x1]  ;;  %v2515_v4 = vsel %vm6358_vm13, %v4756_v9, %v2514_v44  ;;  %v2460_v49 = vld [vmem:[#allocation2 + $0x88] sm:$0xe] }
 0x27c   :  { %2164 = vst [vmem:[#allocation2 + $0x74] sm:$0x1] %v2163_v54  ;;  %v2181_v17 = vsel %vm6106_vm0, %v7998_v32, %v2180_v11  ;;  %v2210_v30 = vld [vmem:[#allocation2 + $0x2c] sm:$0x1]  ;;  %v7999_v23 = vrot.slane %v6596_v47, 4  ;;  %v3013_v44 = vshll.u32 %v2948_v40, 16 }
 0x27d   :  { %v2580_v54 = vld [vmem:[#allocation2 + $0x2c] sm:$0x1]  ;;  %2182 = vst [vmem:[#allocation2 + $0x8c] sm:$0x1] %v2181_v17  ;;  %v2895_v9 = vsel %vm6358_vm13, %v4775_v18, %v2894_v58  ;;  %v3247_v57 = vrot.slane %v2948_v40, 5  ;;  %v2301_v17 = vshll.u32 %v2210_v30, 16 }
 0x27e   :  { %v2187_v2 = vsel %vm6106_vm0, %v7999_v23, %v2186_v22  ;;  %v6826_v22 = vrot.slane %v2700_v35, 5  ;;  %v4843_v23 = vcombine.low %v2891_v6, %v2895_v9  ;;  %v2518_v14 = vrot.slane %v2210_v30, 5 }
 0x27f   :  { %2188 = vst [vmem:[#allocation2 + $0x94] sm:$0x1] %v2187_v2  ;;  %v2215_v32 = vld [vmem:[#allocation2 + $0x64] sm:$0x1]  ;;  %v3248_v11 = vsel %vm6358_vm13, %v4787_v53, %v3247_v57  ;;  %v2658_v58 = vshll.u32 %v2580_v54, 16  ;;  %v6831_v40 = vrot.slane %v3013_v44, 5 }
 0x280   :  { %v2216_v1 = vld [vmem:[#allocation2 + $0x6c] sm:$0x1]  ;;  %v2371_v27 = vshll.u32 %v2215_v32, 16  ;;  %v2538_v18 = vrot.slane %v2215_v32, 5  ;;  %3543 = vrot.lane.b32.xlu1 %v4843_v23, %s5161_s4  ;;  %v4865_v2 = vcombine.low %v3244_v38, %v3248_v11  ;;  %v6835_v9 = vrot.slane %v2301_v17, 5 }
 0x281   :  { %v2385_v34 = vshll.u32 %v2216_v1, 16  ;;  %v2542_v47 = vrot.slane %v2216_v1, 5  ;;  %v2586_v35 = vld [vmem:[#allocation2 + $0x6c] sm:$0x1]  ;;  %v2519_v53 = vsel %vm6358_vm13, %v4757_v15, %v2518_v14  ;;  %v2219_v11 = vld [vmem:[#allocation2 + $0x84] sm:$0x1] }
 0x282   :  { %v2539_v6 = vsel %vm6358_vm13, %v4762_v21, %v2538_v18  ;;  %v2742_v57 = vshll.u32 %v2586_v35, 16  ;;  %3675 = vrot.lane.b32.xlu0 %v4865_v2, %s5162_s14  ;;  %v6840_v32 = vrot.slane %v2371_v27, 5  ;;  %v4818_v21 = vcombine.low %v2515_v4, %v2519_v53  ;;  %v2949_v53 = vld [vmem:[#allocation2 + $0x34] sm:$0x1] }
 0x283   :  { %v2587_v30 = vld [vmem:[#allocation2 + $0x74] sm:$0x1]  ;;  %v6842_v44 = vrot.slane %v2385_v34, 5  ;;  %v2543_v38 = vsel %vm6358_vm13, %v4763_v42, %v2542_v47  ;;  %v2906_v17 = vrot.slane %v2586_v35, 5  ;;  %v6850_v2 = vrot.slane %v2658_v58, 5 }
 0x284   :  { %8000 = vst [vmem:[#allocation30_spill] sm:$0xff] %v6840_v32  ;;  %v2756_v1 = vshll.u32 %v2587_v30, 16  ;;  %v4821_v23 = vcombine.low %v2539_v6, %v2543_v38  ;;  %v2910_v18 = vrot.slane %v2587_v30, 5  ;;  %v6846_v15 = vrot.slane %v2742_v57, 5  ;;  %v6852_v34 = vld [vmem:[#allocation2 + $0x8c] sm:$0x1] }
 0x285   :  { %8001 = vst [vmem:[#allocation31_spill] sm:$0xff] %v6842_v44  ;;  %v2882_v27 = vrot.slane %v2580_v54, 5  ;;  %8002 = vst [vmem:[#allocation32_spill] sm:$0xff] %v6852_v34  ;;  %v8003_v42 = vrot.slane %v6771_v7, 9  ;;  %v2887_v35 = vsel %vm6358_vm13, %v4773_v46, %v2886_v19  ;;  %v2427_v6 = vshll.u32 %v2219_v11, 16 }
 0x286   :  { %v6848_v14 = vrot.slane %v2756_v1, 5  ;;  %3411 = vrot.lane.b32.xlu1 %v4821_v23, %s5153_s20  ;;  %v2911_v47 = vsel %vm6358_vm13, %v4779_v36, %v2910_v18  ;;  %v2950_v58 = vld [vmem:[#allocation2 + $0x3c] sm:$0x1]  ;;  %3405 = vrot.lane.b32.xlu0 %v4818_v21, %s5153_s20  ;;  %v8004_v30 = vshll.u32 %v6783_v13, 16  ;;  %v8005_v7 = vrot.slane %v6759_v8, 9 }
 0x287   :  { %v2907_v4 = vsel %vm6358_vm13, %v8003_v42, %v2906_v17  ;;  %v4766_v1 = vrot.slane %v2459_v24, 9  ;;  %v3189_v36 = vld [vmem:[#allocation2 + $0x30] sm:$0xe]  ;;  %v3190_v23 = vld [vmem:[#allocation2 + $0x38] sm:$0xe]  ;;  %v2554_v19 = vrot.slane %v2219_v11, 5 }
 0x288   :  { %v4845_v54 = vcombine.low %v2907_v4, %v2911_v47  ;;  %v6866_v57 = vrot.slane %v8004_v30, 5  ;;  %v2883_v38 = vsel %vm6358_vm13, %v8005_v7, %v2882_v27  ;;  %v4767_v18 = vrot.slane %v2460_v49, 9  ;;  %v2590_v42 = vld [vmem:[#allocation2 + $0x8c] sm:$0x1]  ;;  %v2830_v21 = vld [vmem:[#allocation2 + $0x88] sm:$0xe] }
 0x289   :  { %v4842_v17 = vcombine.low %v2883_v38, %v2887_v35  ;;  %v6873_v4 = vrot.slane %v2427_v6, 5  ;;  %v2558_v13 = vrot.slane %v6852_v34, 5  ;;  %v3027_v47 = vshll.u32 %v2949_v53, 16  ;;  %v2591_v8 = vld [vmem:[#allocation2 + $0x94] sm:$0x1] }
 0x28a   :  { %v3041_v30 = vshll.u32 %v2950_v58, 16  ;;  %3547 = vrot.lane.b32.xlu1 %v4845_v54, %s5161_s4  ;;  %v2555_v24 = vsel %vm6358_vm13, %v4766_v1, %v2554_v19  ;;  %v4788_v27 = vrot.slane %v3189_v36, 9  ;;  %v3251_v35 = vrot.slane %v2949_v53, 5  ;;  %v2831_v38 = vld [vmem:[#allocation2 + $0x90] sm:$0xe] }
 0x28b   :  { %8006 = vst [vmem:[#allocation33_spill] sm:$0xff] %v6873_v4  ;;  %v4789_v7 = vrot.slane %v3190_v23, 9  ;;  %3541 = vrot.lane.b32.xlu0 %v4842_v17, %s5161_s4  ;;  %v2559_v49 = vsel %vm6358_vm13, %v4767_v18, %v2558_v13  ;;  %v6882_v11 = vrot.slane %v3027_v47, 5  ;;  %v3255_v46 = vrot.slane %v2950_v58, 5  ;;  %v2952_v4 = vld [vmem:[#allocation2 + $0x4c] sm:$0x1] }
 0x28c   :  { %v6884_v6 = vrot.slane %v3041_v30, 5  ;;  %v4823_v34 = vcombine.low %v2555_v24, %v2559_v49  ;;  %v3252_v54 = vsel %vm6358_vm13, %v4788_v27, %v3251_v35  ;;  %v2798_v1 = vshll.u32 %v2590_v42, 16  ;;  %v2951_v53 = vld [vmem:[#allocation2 + $0x44] sm:$0x1]  ;;  %v3191_v23 = vld [vmem:[#allocation2 + $0x40] sm:$0xe] }
 0x28d   :  { %v2812_v36 = vshll.u32 %v2591_v8, 16  ;;  %v3256_v17 = vsel %vm6358_vm13, %v4789_v7, %v3255_v46  ;;  %v4782_v19 = vrot.slane %v2830_v21, 9  ;;  %v2922_v44 = vrot.slane %v2590_v42, 5  ;;  %v3192_v13 = vld [vmem:[#allocation2 + $0x48] sm:$0xe] }
 0x28e   :  { %v4783_v18 = vrot.slane %v2831_v38, 9  ;;  %3415 = vrot.lane.b32.xlu1 %v4823_v34, %s5153_s20  ;;  %v4866_v47 = vcombine.low %v3252_v54, %v3256_v17  ;;  %v6891_v58 = vrot.slane %v2798_v1, 5  ;;  %v2926_v24 = vrot.slane %v2591_v8, 5  ;;  %v6895_v27 = vld [vmem:[#allocation2 + $0x10] sm:$0xf] }
 0x28f   :  { %v6893_v30 = vrot.slane %v2812_v36, 5  ;;  %8009 = vst [vmem:[#allocation36_spill] sm:$0xff] %v6895_v27  ;;  %v2923_v35 = vsel %vm6358_vm13, %v4782_v19, %v2922_v44  ;;  %v3055_v49 = vshll.u32 %v2951_v53, 16  ;;  %v3069_v32 = vshll.u32 %v2952_v4, 16  ;;  %v1790_v21 = vld [vmem:[#allocation2 + $0x50] sm:$0x1] }
 0x290   :  { %8007 = vst [vmem:[#allocation34_spill] sm:$0xff] %v6891_v58  ;;  %v4790_v46 = vrot.slane %v3191_v23, 9  ;;  %3677 = vrot.lane.b32.xlu0 %v4866_v47, %s5162_s14  ;;  %v2927_v34 = vsel %vm6358_vm13, %v4783_v18, %v2926_v24  ;;  %v3259_v42 = vrot.slane %v2951_v53, 5  ;;  %v4791_v7 = vrot.slane %v3192_v13, 9  ;;  %v6902_v54 = vld [vmem:[#allocation2 + $0x18] sm:$0xf] }
 0x291   :  { %8008 = vst [vmem:[#allocation35_spill] sm:$0xff] %v6893_v30  ;;  %v3263_v38 = vrot.slane %v2952_v4, 5  ;;  %8010 = vst [vmem:[#allocation37_spill] sm:$0xff] %v6902_v54  ;;  %v1852_v8 = vld [vmem:[#allocation2 + $0x54] sm:$0x1]  ;;  %v4847_v36 = vcombine.low %v2923_v35, %v2927_v34  ;;  %v6904_v17 = vrot.slane %v3055_v49, 5 }
 0x292   :  { %v1855_v1 = vld [vmem:[#allocation2 + $0x5c] sm:$0x1]  ;;  %v6906_v44 = vrot.slane %v3069_v32, 5  ;;  %v2250_v23 = vshrl.u32 %v6895_v27, 16  ;;  %v6909_v19 = vld [vmem:[#allocation2 + $0x50] sm:$0xe]  ;;  %v3260_v47 = vsel %vm6358_vm13, %v4790_v46, %v3259_v42 }
 0x293   :  { %v3264_v53 = vsel %vm6358_vm13, %v4791_v7, %v3263_v38  ;;  %v2253_v4 = vshll.u32 %v6895_v27, 16  ;;  %v2259_v18 = vshll.u32 %v6599_v45, 16  ;;  %v6917_v13 = vld [vmem:[#allocation2 + $0x58] sm:$0xe]  ;;  %3551 = vrot.lane.b32.xlu1 %v4847_v36, %s5161_s4  ;;  %v2264_v49 = vshrl.u32 %v6902_v54, 16 }
 0x294   :  { %v6919_v24 = vld [vmem:[#allocation2 + $0x58] sm:$0xe]  ;;  %v4867_v32 = vcombine.low %v3260_v47, %v3264_v53  ;;  %v2252_v35 = vrot.slane %v2250_v23, 4  ;;  %v2267_v34 = vshll.u32 %v6902_v54, 16  ;;  %v2825_v46 = vld [vmem:[#allocation2 + $0x60] sm:$0xe] }
 0x295   :  { %v2255_v42 = vrot.slane %v2253_v4, 5  ;;  %v2261_v30 = vrot.slane %v2259_v18, 5  ;;  %v2273_v7 = vshll.u32 %v6607_v28, 16  ;;  %v1791_v45 = vsel %vm6106_vm0, 0, %v1790_v21  ;;  %v3193_v38 = vld [vmem:[#allocation2 + $0x60] sm:$0xe] }
 0x296   :  { %v3194_v27 = vld [vmem:[#allocation2 + $0x68] sm:$0xe]  ;;  %3679 = vrot.lane.b32.xlu0 %v4867_v32, %s5162_s14  ;;  %v2266_v58 = vrot.slane %v2264_v49, 4  ;;  %v2269_v36 = vrot.slane %v2267_v34, 5  ;;  %1792 = vst [vmem:[#allocation2 + $0x50] sm:$0x1] %v1791_v45 }
 0x297   :  { %v1853_v23 = vsel %vm6114_vm1, 0, %v1852_v8  ;;  %v1856_v47 = vsel %vm6114_vm1, 0, %v1855_v1  ;;  %v6932_v53 = vld [vmem:[#allocation2 + $0x64] sm:$0x1]  ;;  %v2256_v4 = vor.u32 %v2255_v42, %v2252_v35  ;;  %v2275_v28 = vrot.slane %v2273_v7, 5 }
 0x298   :  { %1854 = vst [vmem:[#allocation2 + $0x54] sm:$0x1] %v1853_v23  ;;  %1857 = vst [vmem:[#allocation2 + $0x5c] sm:$0x1] %v1856_v47  ;;  %v4760_v21 = vrot.slane %v6909_v19, 9  ;;  %v2270_v49 = vor.u32 %v2269_v36, %v2266_v58  ;;  %v8011_v8 = vsel %vm5299_vm2, %v6450_v12, %v6692_v37  ;;  %v8012_v1 = vsel %vm5299_vm2, %v6446_v63, %v6646_v48 }
 0x299   :  { %v6936_v32 = vld [vmem:[#allocation2 + $0x64] sm:$0x1]  ;;  %v4833_v35 = vcombine.low %v8012_v1, %v8011_v8  ;;  %v4777_v42 = vrot.slane %v2825_v46, 9  ;;  %v6949_v19 = vld [vmem:[#allocation2 + $0x6c] sm:$0x1]  ;;  %v2257_v45 = vrot.slane %v2256_v4, 4  ;;  %v3016_v12 = vsel %vm5299_vm2, %v6462_v25, %v6831_v40 }
 0x29a   :  { %v6951_v7 = vld [vmem:[#allocation2 + $0x20] sm:$0xf]  ;;  %v2902_v58 = vrot.slane %v6932_v53, 5  ;;  %v4792_v37 = vrot.slane %v3193_v38, 9  ;;  %v6958_v36 = vld [vmem:[#allocation2 + $0x28] sm:$0xf]  ;;  %v8015_v48 = vsel %vm5299_vm2, %v6457_v61, %v6765_v43 }
 0x29b   :  { %8013 = vst [vmem:[#allocation38_spill] sm:$0xff] %v6951_v7  ;;  %8014 = vst [vmem:[#allocation39_spill] sm:$0xff] %v6958_v36  ;;  %v2271_v63 = vrot.slane %v2270_v49, 4  ;;  %v6965_v46 = vcombine.low %v8015_v48, %v3016_v12  ;;  %v3267_v23 = vrot.slane %v6936_v32, 5  ;;  %v4793_v47 = vrot.slane %v3194_v27, 9 }
 0x29c   :  { %v2262_v4 = vsel %vm5299_vm2, %v2257_v45, %v2261_v30  ;;  %v6972_v25 = vsel %vm6358_vm13, %v4777_v42, %v2902_v58  ;;  %v3271_v40 = vrot.slane %v6949_v19, 5  ;;  %v2278_v38 = vshrl.u32 %v6951_v7, 16  ;;  %v1867_v30 = vld [vmem:[#allocation2 + $0x7c] sm:$0x1]  ;;  %v3195_v8 = vld [vmem:[#allocation2 + $0x70] sm:$0xe] }
 0x29d   :  { %v2276_v49 = vsel %vm5299_vm2, %v2271_v63, %v2275_v28  ;;  %v6980_v61 = vsel %vm6358_vm13, %v4792_v37, %v3267_v23  ;;  %v2281_v43 = vshll.u32 %v6951_v7, 16  ;;  %v2292_v27 = vshrl.u32 %v6958_v36, 16  ;;  %v6989_v12 = vld [vmem:[#allocation2 + $0x74] sm:$0x1]  ;;  %v6991_v28 = vld [vmem:[#allocation2 + $0x78] sm:$0xe] }
 0x29e   :  { %v4809_v1 = vcombine.low %v2262_v4, %v2276_v49  ;;  %v6986_v42 = vsel %vm6358_vm13, %v4793_v47, %v3271_v40  ;;  %v2280_v45 = vrot.slane %v2278_v38, 4  ;;  %v2295_v58 = vshll.u32 %v6958_v36, 16  ;;  %v6995_v18 = vld [vmem:[#allocation2 + $0x38] sm:$0xf]  ;;  %v7006_v48 = vld [vmem:[#allocation2 + $0x30] sm:$0xf] }
 0x29f   :  { %v2144_v37 = vld [vmem:[#allocation2 + $0x5c] sm:$0x1]  ;;  %v2213_v63 = vld [vmem:[#allocation2 + $0x54] sm:$0x1]  ;;  %v2283_v23 = vrot.slane %v2281_v43, 5  ;;  %v2294_v34 = vrot.slane %v2292_v27, 4  ;;  %v2689_v47 = vsel %vm5299_vm2, %v6478_v33, %v6754_v60 }
 0x2a0   :  { %8016 = vst [vmem:[#allocation40_spill] sm:$0xff] %v6995_v18  ;;  %3363 = vrot.lane.b32.xlu1 %v4809_v1, %s5154_s12  ;;  %v8017_v4 = vrot.slane %v6528_v55, 4  ;;  %v2343_v38 = vshll.u32 %v2213_v63, 16  ;;  %v2530_v49 = vrot.slane %v2213_v63, 5  ;;  %v2297_v54 = vrot.slane %v2295_v58, 5  ;;  %8018 = vst [vmem:[#allocation41_spill] sm:$0xff] %v7006_v48 }
 0x2a1   :  { %v2284_v43 = vor.u32 %v2283_v23, %v2280_v45  ;;  %v1868_v27 = vsel %vm6114_vm1, 0, %v1867_v30  ;;  %v4794_v7 = vrot.slane %v3195_v8, 9  ;;  %v3275_v33 = vrot.slane %v6989_v12, 5  ;;  %v2457_v60 = vld [vmem:[#allocation2 + $0x70] sm:$0xe] }
 0x2a2   :  { %v2145_v40 = vsel %vm6106_vm0, %v8017_v4, %v2144_v37  ;;  %v7011_v1 = vrot.slane %v2343_v38, 5  ;;  %v7015_v55 = vsel %vm6358_vm13, %v4760_v21, %v2530_v49  ;;  %v2298_v37 = vor.u32 %v2297_v54, %v2294_v34  ;;  %1869 = vst [vmem:[#allocation2 + $0x7c] sm:$0x1] %v1868_v27  ;;  %v7018_v63 = vld [vmem:[#allocation2 + $0x74] sm:$0x1] }
 0x2a3   :  { %2146 = vst [vmem:[#allocation2 + $0x5c] sm:$0x1] %v2145_v40  ;;  %v2285_v45 = vrot.slane %v2284_v43, 4  ;;  %v7022_v30 = vsel %vm6358_vm13, %v4794_v7, %v3275_v33  ;;  %v2306_v8 = vshrl.u32 %v7006_v48, 16  ;;  %v2309_v23 = vshll.u32 %v7006_v48, 16 }
 0x2a4   :  { %v7026_v4 = vld [vmem:[#allocation2 + $0x78] sm:$0xe]  ;;  %3499 = vrot.lane.b32.xlu1 %v4833_v35, %s5158_s29  ;;  %v2299_v21 = vrot.slane %v2298_v37, 4  ;;  %v2320_v54 = vshrl.u32 %v6995_v18, 16  ;;  %v2323_v34 = vshll.u32 %v6995_v18, 16  ;;  %v4764_v40 = vrot.slane %v2457_v60, 9 }
 0x2a5   :  { %v2829_v38 = vld [vmem:[#allocation2 + $0x80] sm:$0xe]  ;;  %v2290_v7 = vsel %vm5299_vm2, %v2285_v45, %v6789_v41  ;;  %v2308_v49 = vrot.slane %v2306_v8, 4  ;;  %v2311_v43 = vrot.slane %v2309_v23, 5  ;;  %v2546_v27 = vrot.slane %v7018_v63, 5 }
 0x2a6   :  { %v7035_v33 = vld [vmem:[#allocation2 + $0x78] sm:$0xe]  ;;  %v2304_v35 = vsel %vm5299_vm2, %v2299_v21, %v6835_v9  ;;  %v2322_v37 = vrot.slane %v2320_v54, 4  ;;  %v2325_v58 = vrot.slane %v2323_v34, 5  ;;  %v4765_v48 = vrot.slane %v7026_v4, 9 }
 0x2a7   :  { %v4810_v60 = vcombine.low %v2290_v7, %v2304_v35  ;;  %v2312_v18 = vor.u32 %v2311_v43, %v2308_v49  ;;  %v7043_v36 = vsel %vm6358_vm13, %v4764_v40, %v2546_v27  ;;  %v2703_v41 = vsel %vm5299_vm2, %v6481_v62, %v6826_v22  ;;  %v7049_v45 = vld [vmem:[#allocation2 + $0x84] sm:$0x1] }
 0x2a8   :  { %3635 = vrot.lane.b32.xlu1 %v6965_v46, %s5163_s23  ;;  %v2326_v9 = vor.u32 %v2325_v58, %v2322_v37  ;;  %v7055_v21 = vcombine.low %v2689_v47, %v2703_v41  ;;  %v4780_v54 = vrot.slane %v7035_v33, 9  ;;  %v4781_v34 = vrot.slane %v2829_v38, 9  ;;  %v7068_v58 = vld [vmem:[#allocation2] sm:$0xf] }
 0x2a9   :  { %v2168_v62 = vld [vmem:[#allocation2 + $0x7c] sm:$0x1]  ;;  %v2313_v22 = vrot.slane %v2312_v18, 4  ;;  %v8019_v43 = vrot.slane %v6533_v10, 4  ;;  %v2918_v46 = vrot.slane %v7049_v45, 5  ;;  %v3058_v47 = vsel %vm5299_vm2, %v6502_v52, %v6904_v17 }
 0x2aa   :  { %v2214_v8 = vld [vmem:[#allocation2 + $0x5c] sm:$0x1]  ;;  %v2327_v35 = vrot.slane %v2326_v9, 4  ;;  %v8020_v37 = vrot.slane %v6917_v13, 9  ;;  %v8021_v59 = vrot.slane %v6919_v24, 9 }
 0x2ab   :  { %v7051_v23 = vld [vmem:[#allocation2 + $0x5c] sm:$0x1]  ;;  %v2357_v40 = vshll.u32 %v2214_v8, 16  ;;  %v2534_v7 = vrot.slane %v2214_v8, 5  ;;  %v2169_v27 = vsel %vm6106_vm0, %v8019_v43, %v2168_v62  ;;  %v2318_v41 = vsel %vm5299_vm2, %v2313_v22, %v6713_v50  ;;  %v7083_v52 = vld [vmem:[#allocation2 + $0x8] sm:$0xf] }
 0x2ac   :  { %v2898_v49 = vrot.slane %v7051_v23, 5  ;;  %2170 = vst [vmem:[#allocation2 + $0x7c] sm:$0x1] %v2169_v27  ;;  %v7085_v17 = vld [vmem:[#allocation2 + $0x50] sm:$0xf]  ;;  %3365 = vrot.lane.b32.xlu1 %v4810_v60, %s5154_s12  ;;  %v2332_v24 = vsel %vm5299_vm2, %v2327_v35, %v6721_v39  ;;  %v7095_v9 = vsel %vm6358_vm13, %v4781_v34, %v2918_v46  ;;  %v2225_v60 = vshll.u32 %v7068_v58, 16 }
 0x2ad   :  { %v7070_v38 = vrot.slane %v2357_v40, 5  ;;  %v2535_v10 = vsel %vm6358_vm13, %v8020_v37, %v2534_v7  ;;  %v7097_v40 = vld [vmem:[#allocation2 + $0x58] sm:$0xf]  ;;  %v4811_v50 = vcombine.low %v2318_v41, %v2332_v24  ;;  %v2236_v39 = vshrl.u32 %v7083_v52, 16  ;;  %v5132_v62 = vld [vmem:[%s7927_s2] sm:$0xff]   ;;  %v5134_v37 = vld [vmem:[%s7927_s2 + $0x8] sm:$0xff]  }
 0x2ae   :  { %v2899_v18 = vsel %vm6358_vm13, %v8021_v59, %v2898_v49  ;;  %v4820_v8 = vcombine.low %v7015_v55, %v2535_v10  ;;  %v3072_v55 = vsel %vm5299_vm2, %v6296_v3, %v6906_v44  ;;  %v2239_v34 = vshll.u32 %v7083_v52, 16  ;;  %4988 = vmatprep.subr.bf16.mxu1 %v5132_v62 }
 0x2af   :  { %v4844_v13 = vcombine.low %v2899_v18, %v6972_v25  ;;  %v2222_v25 = vshrl.u32 %v7068_v58, 16  ;;  %v4859_v7 = vcombine.low %v3058_v47, %v3072_v55  ;;  %v2334_v49 = vshrl.u32 %v7085_v17, 16  ;;  %4989 = vmatpush3.bf16.msra.mxu1 %v5132_v62 }
 0x2b0   :  { %3409 = vrot.lane.b32.xlu0 %v4820_v8, %s5153_s20  ;;  %v2227_v43 = vrot.slane %v2225_v60, 5  ;;  %v2337_v3 = vshll.u32 %v7085_v17, 16  ;;  %v2348_v44 = vshrl.u32 %v7097_v40, 16  ;;  %3367 = vrot.lane.b32.xlu1 %v4811_v50, %s5154_s12  ;;  %v2238_v27 = vrot.slane %v2236_v39, 4  ;;  %v7134_v60 = vld [vmem:[#allocation2 + $0x60] sm:$0xf] }
 0x2b1   :  { %v2224_v22 = vrot.slane %v2222_v25, 4  ;;  %v2241_v35 = vrot.slane %v2239_v34, 5  ;;  %v2336_v46 = vrot.slane %v2334_v49, 4  ;;  %v2351_v47 = vshll.u32 %v7097_v40, 16  ;;  %4990 = vmatprep.subr.bf16.mxu1 %v5134_v37 }
 0x2b2   :  { %v2339_v59 = vrot.slane %v2337_v3, 5  ;;  %v2350_v18 = vrot.slane %v2348_v44, 4  ;;  %v2605_v41 = vsel %vm5299_vm2, %v6452_v16, %v6702_v0  ;;  %v2619_v25 = vsel %vm5299_vm2, %v6455_v26, %v6661_v20  ;;  %v8022_v0 = vld [vmem:[#allocation29_spill] sm:$0xff] }
 0x2b3   :  { %v2228_v10 = vor.u32 %v2227_v43, %v2224_v22  ;;  %v7124_v8 = vld [vmem:[#allocation2 + $0x7c] sm:$0x1]  ;;  %v2242_v55 = vor.u32 %v2241_v35, %v2238_v27  ;;  %v2974_v16 = vsel %vm5299_vm2, %v6473_v51, %v6723_v31  ;;  %v2353_v43 = vrot.slane %v2351_v47, 5  ;;  %v5135_v31 = vld [vmem:[%s7927_s2 + $0x10] sm:$0xff]   ;;  %v7171_v47 = vld [vmem:[#allocation2 + $0x68] sm:$0xf]  ;;  %4991 = vmatpush3.bf16.msra.mxu1 %v5134_v37 }
 0x2b4   :  { %3545 = vrot.lane.b32.xlu0 %v4844_v13, %s5161_s4  ;;  %v7126_v24 = vld [vmem:[#allocation2 + $0x7c] sm:$0x1]  ;;  %v8023_v13 = vld [vmem:[#allocation7_spill] sm:$0xff]  ;;  %v3279_v34 = vrot.slane %v7124_v8, 5  ;;  %3503 = vrot.lane.b32.xlu1 %v7055_v21, %s5158_s29  ;;  %v2340_v20 = vor.u32 %v2339_v59, %v2336_v46  ;;  %v7149_v51 = vcombine.low %v2605_v41, %v2619_v25  ;;  %v8024_v3 = vrot.slane %v6991_v28, 9 }
 0x2b5   :  { %v7128_v50 = vld [vmem:[#allocation2 + $0x7c] sm:$0x1]  ;;  %v2988_v39 = vsel %vm5299_vm2, %v8023_v13, %v8022_v0  ;;  %v2550_v49 = vrot.slane %v7126_v24, 5  ;;  %v2229_v22 = vrot.slane %v2228_v10, 4  ;;  %v2243_v26 = vrot.slane %v2242_v55, 4  ;;  %4992 = vmatprep.subr.bf16.mxu1 %v5135_v31 }
 0x2b6   :  { %v2914_v62 = vrot.slane %v7128_v50, 5  ;;  %v3280_v44 = vsel %vm6358_vm13, %v8024_v3, %v3279_v34  ;;  %v8025_v35 = vld [vmem:[#allocation6_spill] sm:$0xff]  ;;  %v8026_v28 = vcombine.low %v6980_v61, %v6986_v42  ;;  %v2341_v41 = vrot.slane %v2340_v20, 4 }
 0x2b7   :  { %v2551_v27 = vsel %vm6358_vm13, %v4765_v48, %v2550_v49  ;;  %v2234_v46 = vsel %vm5299_vm2, %v2229_v22, %v8025_v35  ;;  %v4869_v48 = vcombine.low %v7022_v30, %v3280_v44  ;;  %v2354_v37 = vor.u32 %v2353_v43, %v2350_v18  ;;  %v8028_v18 = vld [vmem:[#allocation12_spill] sm:$0xff]  ;;  %4993 = vmatpush3.bf16.msra.mxu1 %v5135_v31  ;;  %v8031_v43 = vld [vmem:[#allocation10_spill] sm:$0xff] }
 0x2b8   :  { %v7166_v21 = vsel %vm6358_vm13, %v4780_v54, %v2914_v62  ;;  %3681 = vrot.lane.b32.xlu0 %v8026_v28, %s5162_s14  ;;  %v4822_v4 = vcombine.low %v7043_v36, %v2551_v27  ;;  %v8027_v54 = vld [vmem:[#allocation26_spill] sm:$0xff]  ;;  %v2362_v55 = vshrl.u32 %v7134_v60, 16  ;;  %3639 = vrot.lane.b32.xlu1 %v4859_v7, %s5163_s23  ;;  %v2365_v61 = vshll.u32 %v7134_v60, 16  ;;  %v7200_v7 = vpop.permute.xlu1 %3459  ;;  %v8033_v28 = vld [vmem:[#allocation9_spill] sm:$0xff] }
 0x2b9   :  { %v4846_v33 = vcombine.low %v7166_v21, %v7095_v9  ;;  %v2248_v10 = vsel %vm5299_vm2, %v2243_v26, %v8027_v54  ;;  %v2376_v36 = vshrl.u32 %v7171_v47, 16  ;;  %v2379_v42 = vshll.u32 %v7171_v47, 16  ;;  %v5137_v62 = vld [vmem:[%s7927_s2 + $0x18] sm:$0xff]   ;;  %v8030_v26 = vld [vmem:[#allocation8_spill] sm:$0xff] }
 0x2ba   :  { %v7184_v59 = vcombine.low %v2234_v46, %v2248_v10  ;;  %v7191_v30 = vcombine.low %v2974_v16, %v2988_v39  ;;  %v2346_v9 = vsel %vm5299_vm2, %v2341_v41, %v7011_v1  ;;  %v2355_v25 = vrot.slane %v2354_v37, 4  ;;  %v8029_v39 = vld [vmem:[#allocation13_spill] sm:$0xff]  ;;  %4994 = vmatprep.subr.bf16.mxu1 %v5137_v62  ;;  %v8032_v46 = vld [vmem:[#allocation11_spill] sm:$0xff] }
 0x2bb   :  { %v2364_v0 = vrot.slane %v2362_v55, 4  ;;  %v2745_v13 = vsel %vm5299_vm2, %v8028_v18, %v6846_v15  ;;  %v2367_v34 = vrot.slane %v2365_v61, 5  ;;  %v2378_v49 = vrot.slane %v2376_v36, 4  ;;  %4995 = vmatpush3.bf16.msra.mxu1 %v5137_v62  ;;  %v8034_v61 = vld [vmem:[#allocation30_spill] sm:$0xff]  ;;  %v8035_v36 = vld [vmem:[#allocation31_spill] sm:$0xff] }
 0x2bc   :  { %3683 = vrot.lane.b32.xlu0 %v4869_v48, %s5162_s14  ;;  %v2381_v16 = vrot.slane %v2379_v42, 5  ;;  %v2759_v1 = vsel %vm5299_vm2, %v8029_v39, %v6848_v14  ;;  %v2360_v15 = vsel %vm5299_vm2, %v2355_v25, %v7070_v38  ;;  %v2661_v20 = vsel %vm5299_vm2, %v8030_v26, %v6850_v2  ;;  %v7221_v14 = vld [vmem:[#allocation2 + $0x70] sm:$0xf]  ;;  %v7235_v48 = vld [vmem:[#allocation2 + $0x78] sm:$0xf] }
 0x2bd   :  { %v4837_v22 = vcombine.low %v2745_v13, %v2759_v1  ;;  %v2675_v31 = vsel %vm5299_vm2, %v8031_v43, %v6866_v57  ;;  %v4812_v3 = vcombine.low %v2346_v9, %v2360_v15  ;;  %v2368_v44 = vor.u32 %v2367_v34, %v2364_v0  ;;  %v7253_v0 = vpop.permute.xlu0 %3457  ;;  %v8036_v13 = vld [vmem:[#allocation15_spill] sm:$0xff]  ;;  %v7263_v1 = vld [vmem:[#allocation2 + $0x88] sm:$0xf] }
 0x2be   :  { %v2382_v27 = vor.u32 %v2381_v16, %v2378_v49  ;;  %v7223_v21 = vcombine.low %v2661_v20, %v2675_v31  ;;  %v3111_v38 = vshll.u32 %v6989_v12, 16  ;;  %v3125_v35 = vshll.u32 %v7124_v8, 16  ;;  %v8037_v34 = vld [vmem:[#allocation19_spill] sm:$0xff] }
 0x2bf   :  { %v3030_v2 = vsel %vm5299_vm2, %v8032_v46, %v6882_v11  ;;  %v3044_v57 = vsel %vm5299_vm2, %v8033_v28, %v6884_v6  ;;  %3369 = vrot.lane.b32.xlu1 %v4812_v3, %s5154_s12  ;;  %v2369_v12 = vrot.slane %v2368_v44, 4  ;;  %v2390_v10 = vshrl.u32 %v7221_v14, 16  ;;  %v7244_v6 = vpop.permute.xlu1 %3595  ;;  %v7261_v39 = vld [vmem:[#allocation2 + $0x80] sm:$0xf] }
 0x2c0   :  { %3413 = vrot.lane.b32.xlu0 %v4822_v4, %s5153_s20  ;;  %v2383_v54 = vrot.slane %v2382_v27, 4  ;;  %v7239_v8 = vcombine.low %v3030_v2, %v3044_v57  ;;  %v3113_v41 = vrot.slane %v3111_v38, 5  ;;  %v3127_v11 = vrot.slane %v3125_v35, 5 }
 0x2c1   :  { %v2393_v37 = vshll.u32 %v7221_v14, 16  ;;  %v2399_v55 = vshll.u32 %v7018_v63, 16  ;;  %v2374_v4 = vsel %vm5299_vm2, %v2369_v12, %v8034_v61  ;;  %v2392_v9 = vrot.slane %v2390_v10, 4  ;;  %v7278_v10 = vpop.permute.xlu0 %3593 }
 0x2c2   :  { %v2388_v42 = vsel %vm5299_vm2, %v2383_v54, %v8035_v36  ;;  %v2404_v25 = vshrl.u32 %v7235_v48, 16  ;;  %v3114_v63 = vsel %vm5299_vm2, %v8036_v13, %v3113_v41  ;;  %v3128_v49 = vsel %vm5299_vm2, %v8037_v34, %v3127_v11  ;;  %v8038_v11 = vld [vmem:[#allocation14_spill] sm:$0xff]  ;;  %v8041_v13 = vld [vmem:[#allocation25_spill] sm:$0xff]  ;;  %v8042_v34 = vld [vmem:[#allocation35_spill] sm:$0xff] }
 0x2c3   :  { %v4813_v18 = vcombine.low %v2374_v4, %v2388_v42  ;;  %v2395_v16 = vrot.slane %v2393_v37, 5  ;;  %v4861_v62 = vcombine.low %v3114_v63, %v3128_v49  ;;  %v2401_v15 = vrot.slane %v2399_v55, 5  ;;  %v7274_v12 = vpop.permute.xlu1 %3463  ;;  %v8039_v55 = vld [vmem:[#allocation17_spill] sm:$0xff]  ;;  %v8043_v49 = vld [vmem:[#allocation27_spill] sm:$0xff] }
 0x2c4   :  { %3549 = vrot.lane.b32.xlu0 %v4846_v33, %s5161_s4  ;;  %v2406_v26 = vrot.slane %v2404_v25, 4  ;;  %v2407_v20 = vshll.u32 %v7235_v48, 16  ;;  %v2413_v31 = vshll.u32 %v7126_v24, 16  ;;  %v2714_v3 = vshll.u32 %v7051_v23, 16 }
 0x2c5   :  { %3371 = vrot.lane.b32.xlu1 %v4813_v18, %s5154_s12  ;;  %v2396_v43 = vor.u32 %v2395_v16, %v2392_v9  ;;  %v2728_v44 = vshll.u32 %v6932_v53, 16  ;;  %v2418_v38 = vshrl.u32 %v7261_v39, 16  ;;  %v2421_v35 = vshll.u32 %v7261_v39, 16  ;;  %v8040_v18 = vld [vmem:[#allocation34_spill] sm:$0xff] }
 0x2c6   :  { %v2409_v27 = vrot.slane %v2407_v20, 5  ;;  %v2432_v33 = vshrl.u32 %v7263_v1, 16  ;;  %v2415_v2 = vrot.slane %v2413_v31, 5  ;;  %v2716_v28 = vrot.slane %v2714_v3, 5  ;;  %v8044_v31 = vld [vmem:[#allocation32_spill] sm:$0xff] }
 0x2c7   :  { %v2397_v46 = vrot.slane %v2396_v43, 4  ;;  %v2730_v57 = vrot.slane %v2728_v44, 5  ;;  %v2420_v23 = vrot.slane %v2418_v38, 4  ;;  %v2423_v54 = vrot.slane %v2421_v35, 5  ;;  %v7306_v43 = vld [vmem:[#allocation2 + $0x84] sm:$0x1] }
 0x2c8   :  { %3361 = vrot.lane.b32.xlu0 %v7184_v59, %s5154_s12  ;;  %v2410_v24 = vor.u32 %v2409_v27, %v2406_v26  ;;  %v2434_v53 = vrot.slane %v2432_v33, 4  ;;  %v2717_v37 = vsel %vm5299_vm2, %v8038_v11, %v2716_v28  ;;  %v2435_v59 = vshll.u32 %v7263_v1, 16  ;;  %v7312_v33 = vld [vmem:[#allocation2 + $0x8c] sm:$0x1] }
 0x2c9   :  { %3507 = vrot.lane.b32.xlu1 %v4837_v22, %s5158_s29  ;;  %v2402_v41 = vsel %vm5299_vm2, %v2397_v46, %v2401_v15  ;;  %v2731_v61 = vsel %vm5299_vm2, %v8039_v55, %v2730_v57  ;;  %v2424_v42 = vor.u32 %v2423_v54, %v2420_v23  ;;  %v3083_v9 = vshll.u32 %v6936_v32, 16  ;;  %v1879_v15 = vld [vmem:[#allocation2 + $0x9c] sm:$0x1]  ;;  %v7322_v23 = vld [vmem:[#allocation2 + $0x94] sm:$0x1]  ;;  %v8048_v11 = vld [vmem:[#allocation16_spill] sm:$0xff] }
 0x2ca   :  { %v2411_v4 = vrot.slane %v2410_v24, 4  ;;  %v7290_v36 = vcombine.low %v2717_v37, %v2731_v61  ;;  %v2437_v22 = vrot.slane %v2435_v59, 5  ;;  %v3097_v25 = vshll.u32 %v6949_v19, 16  ;;  %v8047_v54 = vld [vmem:[#allocation33_spill] sm:$0xff]  ;;  %v8049_v59 = vld [vmem:[#allocation4_spill] sm:$0xff] }
 0x2cb   :  { %v2801_v63 = vsel %vm5299_vm2, %v8041_v13, %v8040_v18  ;;  %v2815_v16 = vsel %vm5299_vm2, %v8043_v49, %v8042_v34  ;;  %v2425_v26 = vrot.slane %v2424_v42, 4  ;;  %v3085_v20 = vrot.slane %v3083_v9, 5  ;;  %v8052_v13 = vld [vmem:[#allocation21_spill] sm:$0xff] }
 0x2cc   :  { %3497 = vrot.lane.b32.xlu0 %v7149_v51, %s5158_s29  ;;  %v2416_v32 = vsel %vm5299_vm2, %v2411_v4, %v2415_v2  ;;  %v4839_v19 = vcombine.low %v2801_v63, %v2815_v16  ;;  %v8045_v3 = vshll.u32 %v8044_v31, 16  ;;  %v2438_v27 = vor.u32 %v2437_v22, %v2434_v53  ;;  %v7314_v51 = vpop.permute.xlu1 %3599  ;;  %v8046_v2 = vld [vmem:[#allocation18_spill] sm:$0xff]  ;;  %v8050_v4 = vld [vmem:[#allocation5_spill] sm:$0xff]  ;;  %v8051_v22 = vld [vmem:[#allocation20_spill] sm:$0xff] }
 0x2cd   :  { %3643 = vrot.lane.b32.xlu1 %v4861_v62, %s5163_s23  ;;  %v3099_v38 = vrot.slane %v3097_v25, 5  ;;  %v2770_v35 = vshll.u32 %v7128_v50, 16  ;;  %v4814_v46 = vcombine.low %v2402_v41, %v2416_v32  ;;  %v3086_v28 = vsel %vm5299_vm2, %v8046_v2, %v3085_v20  ;;  %v7324_v62 = vpop.permute.xlu0 %3461  ;;  %v8053_v32 = vld [vmem:[#allocation24_spill] sm:$0xff] }
 0x2ce   :  { %v2443_v44 = vrot.slane %v8045_v3, 5  ;;  %v2784_v57 = vshll.u32 %v7049_v45, 16  ;;  %v1880_v24 = vsel %vm6114_vm1, 0, %v1879_v15  ;;  %v2430_v50 = vsel %vm5299_vm2, %v2425_v26, %v8047_v54  ;;  %v8054_v26 = vld [vmem:[#allocation23_spill] sm:$0xff]  ;;  %v8056_v3 = vld [vmem:[#allocation22_spill] sm:$0xff] }
 0x2cf   :  { %v2439_v53 = vrot.slane %v2438_v27, 4  ;;  %v3100_v41 = vsel %vm5299_vm2, %v8048_v11, %v3099_v38  ;;  %v2772_v37 = vrot.slane %v2770_v35, 5  ;;  %1881 = vst [vmem:[#allocation2 + $0x9c] sm:$0x1] %v1880_v24  ;;  %v3139_v55 = vshll.u32 %v7306_v43, 16  ;;  %v8057_v27 = vld [vmem:[#allocation28_spill] sm:$0xff] }
 0x2d0   :  { %3633 = vrot.lane.b32.xlu0 %v7191_v30, %s5163_s23  ;;  %v7334_v29 = vcombine.low %v3086_v28, %v3100_v41  ;;  %v2786_v45 = vrot.slane %v2784_v57, 5  ;;  %v3153_v61 = vshll.u32 %v7312_v33, 16  ;;  %v3178_v42 = vor.u32 %v8050_v4, %v8049_v59  ;;  %v7352_v15 = vpop.permute.xlu1 %3467  ;;  %v3199_v35 = vld [vmem:[#allocation2 + $0x90] sm:$0xe]  ;;  %v3200_v57 = vld [vmem:[#allocation2 + $0x98] sm:$0xe] }
 0x2d1   :  { %3373 = vrot.lane.b32.xlu1 %v4814_v46, %s5154_s12  ;;  %v2444_v9 = vsel %vm5299_vm2, %v2439_v53, %v2443_v44  ;;  %v2773_v25 = vsel %vm5299_vm2, %v8051_v22, %v2772_v37  ;;  %v3167_v30 = vshll.u32 %v7322_v23, 16  ;;  %v3141_v34 = vrot.slane %v3139_v55, 5  ;;  %v7365_v46 = vpop.permute.xlu0 %3597  ;;  %v5123_v53 = vld [vmem:[%s7922_s0 + $0x1c0] ss:$8 sps:$4 sm:$0xff]   ;;  %v5124_v37 = vld [vmem:[%s7922_s0 + $0x1d0] ss:$8 sps:$4 sm:$0xff]  }
 0x2d2   :  { %v4815_v18 = vcombine.low %v2430_v50, %v2444_v9  ;;  %v2787_v63 = vsel %vm5299_vm2, %v8052_v13, %v2786_v45  ;;  %v3155_v49 = vrot.slane %v3153_v61, 5  ;;  %v8055_v20 = vor.u32 %v8053_v32, %v8054_v26  ;;  %v5139_v45 = vld [vmem:[%s7927_s2 + $0x20] ss:$0 sps:$4 sm:$0xff]   ;;  %v8061_v13 = vld [vmem:[#allocation41_spill] sm:$0xff]  ;;  %v8067_v26 = vld [vmem:[#allocation36_spill] sm:$0xff] }
 0x2d3   :  { %v7350_v16 = vcombine.low %v2773_v25, %v2787_v63  ;;  %v3142_v44 = vsel %vm5299_vm2, %v8056_v3, %v3141_v34  ;;  %v3179_v2 = vrot.slane %v3178_v42, 4  ;;  %v3169_v54 = vrot.slane %v3167_v30, 5  ;;  %v8058_v4 = vld [vmem:[#allocation39_spill] sm:$0xff]  ;;  %v8059_v42 = vld [vmem:[#allocation38_spill] sm:$0xff] }
 0x2d4   :  { %v3165_v31 = vrot.slane %v8055_v20, 4  ;;  %3501 = vrot.lane.b32.xlu0 %v7223_v21, %s5158_s29  ;;  %v3156_v38 = vsel %vm5299_vm2, %v8057_v27, %v3155_v49  ;;  %v5150_v21 = vld [vmem:[%s7926_s7] sm:$0x3]  ;;  %v4798_v41 = vrot.slane %v3199_v35, 9  ;;  %v3291_v61 = vrot.slane %v7322_v23, 5  ;;  %v7389_v30 = vpop.permute.xlu1 %3603 }
 0x2d5   :  { %3375 = vrot.lane.b32.xlu1 %v4815_v18, %s5154_s12  ;;  %v4862_v28 = vcombine.low %v3142_v44, %v3156_v38  ;;  %v4167_v50 = vsel %vm1483_vm3, %v5150_v21, 0  ;;  %v4799_v59 = vrot.slane %v3200_v57, 9  ;;  %v8060_v18 = vld [vmem:[#allocation40_spill] sm:$0xff]  ;;  %v7395_v34 = vpop.permute.xlu0 %3465  ;;  %vm3882_vm3 = vcmask 1043456   ;;  %v3197_v35 = vld [vmem:[#allocation2 + $0x80] sm:$0xe] }
 0x2d6   :  { %v2960_v24 = vld [vmem:[#allocation2 + $0x9c] sm:$0x1]  ;;  %5015 = vmatpush3.bf16.msra.mxu0 %v4167_v50  ;;  %v3170_v55 = vsel %vm5299_vm2, %v3165_v31, %v3169_v54  ;;  %5040 = vmatprep.subr.msk.bf16.mxu1 %vm3882_vm3, %v5139_v45  ;;  %v3884_v32 = vsel %vm3882_vm3, %v5139_v45, 0  ;;  %v3292_v3 = vsel %vm6358_vm13, %v4798_v41, %v3291_v61  ;;  %v5125_v44 = vld [vmem:[%s7922_s0 + $0x1e0] ss:$8 sps:$4 sm:$0xff]   ;;  %v3283_v54 = vrot.slane %v7306_v43, 5 }
 0x2d7   :  { %v3181_v11 = vshll.u32 %v2960_v24, 16  ;;  %v3295_v25 = vrot.slane %v2960_v24, 5  ;;  %4997 = vmatpush3.bf16.msra.mxu1 %v3884_v32  ;;  %v4796_v24 = vrot.slane %v3197_v35, 9  ;;  %v3287_v50 = vrot.slane %v7312_v33, 5 }
 0x2d8   :  { %3637 = vrot.lane.b32.xlu0 %v7239_v8, %s5163_s23  ;;  %v7419_v27 = vpop.permute.xlu1 %3471  ;;  %vm3865_vm0 = vcmask 588800  }
 0x2d9   :  { %3511 = vrot.lane.b32.xlu1 %v4839_v19, %s5158_s29  ;;  %v3183_v22 = vrot.slane %v3181_v11, 5  ;;  %5017 = vmatmul.mubr.msk.bf16.vlgmr.msra.gmra.mrb[4].mxu0 %vm1302_vm4, %v5123_v53  ;;  %v3296_v56 = vsel %vm6358_vm13, %v4799_v59, %v3295_v25  ;;  %v7426_v57 = vpop.permute.xlu0 %3601  ;;  %v5127_v11 = vld [vmem:[%s7922_s0 + $0x208] ss:$8 sps:$4 sm:$0xff]   ;;  %v3284_v41 = vsel %vm6358_vm13, %v4796_v24, %v3283_v54 }
 0x2da   :  { %5020 = vmatprep.mubr.msk.bf16.mxu0 %vm1302_vm4, %v5124_v37  ;;  %v4871_v38 = vcombine.low %v3292_v3, %v3296_v56  ;;  %v5128_v37 = vld [vmem:[%s7922_s0 + $0x218] ss:$8 sps:$4 sm:$0xff]  }
 0x2db   :  { %v3184_v49 = vsel %vm5299_vm2, %v3179_v2, %v3183_v22  ;;  %v3198_v2 = vld [vmem:[#allocation2 + $0x88] sm:$0xe]  ;;  %vm3761_vm2 = vcmask 326656  }
 0x2dc   :  { %3505 = vrot.lane.b32.xlu0 %v7290_v36, %s5158_s29  ;;  %v4863_v20 = vcombine.low %v3170_v55, %v3184_v49  ;;  %v5126_v36 = vld [vmem:[%s7922_s0 + $0x1f8] ss:$8 sps:$4 sm:$0xff]   ;;  %v4797_v21 = vrot.slane %v3198_v2, 9  ;;  %v7432_v53 = vpop.permute.xlu1 %3607 }
 0x2dd   :  { %8062 = vst [vmem:[#allocation29_spill] sm:$0xff] %v7432_v53 }
 0x2de   :  { %3647 = vrot.lane.b32.xlu1 %v4863_v20, %s5163_s23  ;;  %v3288_v43 = vsel %vm6358_vm13, %v4797_v21, %v3287_v50 }
 0x2e0   :  { %3641 = vrot.lane.b32.xlu0 %v7334_v29, %s5163_s23  ;;  %v7437_v29 = vpop.permute.xlu0 %3469  ;;  %v3404_v33 = vpop.permute.xlu1 %3403 }
 0x2e1   :  { %5021 = vmatmul.mubr.msk.bf16.gmra.mrb[8].mxu0 %vm1302_vm4, %v5125_v44  ;;  %8063 = vst [vmem:[#allocation7_spill] sm:$0xff] %v7437_v29  ;;  %v8069_v29 = vcombine.low %v8061_v13, %v8060_v18 }
 0x2e2   :  { %3687 = vrot.lane.b32.xlu1 %v4871_v38, %s5162_s14  ;;  %5024 = vmatprep.mubr.msk.bf16.mxu0 %vm1302_vm4, %v5126_v36 }
 0x2e4   :  { %3509 = vrot.lane.b32.xlu0 %v7350_v16, %s5158_s29  ;;  %v4870_v16 = vcombine.low %v3284_v41, %v3288_v43  ;;  %v3540_v45 = vpop.permute.xlu1 %3539  ;;  %v7453_v55 = vpop.permute.xlu0 %3605 }
 0x2e5   :  { %8064 = vst [vmem:[#allocation6_spill] sm:$0xff] %v7453_v55 }
 0x2e8   :  { %3645 = vrot.lane.b32.xlu0 %v4862_v28, %s5163_s23  ;;  %v3408_v61 = vpop.permute.xlu1 %3407  ;;  %v3402_v59 = vpop.permute.xlu0 %3401 }
 0x2e9   :  { %5025 = vmatmul.mubr.msk.bf16.gmra.mrb[12].mxu0 %vm1302_vm4, %v5127_v11 }
 0x2ea   :  { %5028 = vmatprep.mubr.msk.bf16.mxu0 %vm1302_vm4, %v5128_v37 }
 0x2ec   :  { %3685 = vrot.lane.b32.xlu0 %v4870_v16, %s5162_s14  ;;  %v3538_v28 = vpop.permute.xlu0 %3537 }
 0x2f0   :  { %v3674_v49 = vpop.permute.xlu0 %3673 }
 0x2f1   :  { %5029 = vmatmul.mubr.msk.bf16.gmra.mrb[16].mxu0 %vm1302_vm4, %v5129_v5  ;;  %v8066_v5 = vld [vmem:[#allocation37_spill] sm:$0xff]  ;;  %vm3778_vm4 = vcmask 392192  }
 0x2f2   :  { %v3544_v22 = vpop.permute.xlu1 %3543  ;;  %v4801_v31 = vcombine.low %v8067_v26, %v8066_v5 }
 0x2f4   :  { %v3676_v20 = vpop.permute.xlu0 %3675 }
 0x2f8   :  { %v3412_v25 = vpop.permute.xlu1 %3411  ;;  %v3406_v56 = vpop.permute.xlu0 %3405 }
 0x2fc   :  { %v7459_v32 = vpop.permute.xlu1 %3547 }
 0x2fd   :  { %v7465_v36 = vpop.permute.xlu0 %3541 }
 0x300   :  { %v7461_v3 = vpop.permute.xlu1 %3415 }
 0x302   :  { %v7467_v35 = vpop.permute.xlu0 %3677 }
 0x305   :  { %v7463_v44 = vpop.permute.xlu1 %3551 }
 0x306   :  { %8065 = vst [vmem:[#allocation26_spill] sm:$0xff] %v7463_v44 }
 0x308   :  { %v7469_v24 = vpop.permute.xlu0 %3679 }
 0x312   :  { %v3364_v38 = vpop.permute.xlu1 %3363 }
 0x313   :  { %v3694_v19 = vsel %vm1327_vm5, %v4801_v31, %v3364_v38 }
 0x314   :  { %v3716_v63 = vsel %vm1361_vm7, %v3694_v19, %v3404_v33  ;;  %v8070_v19 = vcombine.low %v7068_v58, %v7083_v52 }
 0x315   :  { %v3732_v55 = vsel %vm1395_vm9, %v3716_v63, %v7200_v7 }
 0x316   :  { %v3500_v2 = vpop.permute.xlu1 %3499 }
 0x317   :  { %v3748_v5 = vsel %vm1429_vm11, %v3732_v55, %v3500_v2 }
 0x318   :  { %v3765_v63 = vsel %vm3761_vm2, %v3748_v5, %v3540_v45  ;;  %v8071_v45 = vcombine.low %v8059_v42, %v8058_v4 }
 0x319   :  { %v3782_v55 = vsel %vm3778_vm4, %v3765_v63, %v7244_v6 }
 0x31a   :  { %v3636_v54 = vpop.permute.xlu1 %3635 }
 0x31b   :  { %v3799_v2 = vsel %vm3795_vm14, %v3782_v55, %v3636_v54 }
 0x31e   :  { %v3366_v21 = vpop.permute.xlu1 %3365 }
 0x322   :  { %v7471_v50 = vpop.permute.xlu0 %3409  ;;  %v3368_v11 = vpop.permute.xlu1 %3367 }
 0x323   :  { %v3700_v26 = vsel %vm1327_vm5, %v8069_v29, %v3368_v11 }
 0x324   :  { %v3720_v38 = vsel %vm1361_vm7, %v3700_v26, %v3408_v61  ;;  %v3697_v61 = vsel %vm1327_vm5, %v8071_v45, %v3366_v21  ;;  %v8079_v45 = vld [vmem:[#allocation29_spill] sm:$0xff] }
 0x325   :  { %v3736_v13 = vsel %vm1395_vm9, %v3720_v38, %v7274_v12  ;;  %v3718_v4 = vsel %vm1361_vm7, %v3697_v61, %v3406_v56 }
 0x326   :  { %v7473_v41 = vpop.permute.xlu0 %3545  ;;  %v3504_v43 = vpop.permute.xlu1 %3503  ;;  %v3734_v56 = vsel %vm1395_vm9, %v3718_v4, %v7324_v62 }
 0x32a   :  { %v7475_v37 = vpop.permute.xlu0 %3681  ;;  %v3640_v16 = vpop.permute.xlu1 %3639 }
 0x32e   :  { %v7479_v23 = vpop.permute.xlu0 %3683 }
 0x331   :  { %v3370_v8 = vpop.permute.xlu1 %3369 }
 0x332   :  { %v7482_v9 = vpop.permute.xlu0 %3413 }
 0x336   :  { %v7487_v53 = vpop.permute.xlu0 %3549 }
 0x337   :  { %8068 = vst [vmem:[#allocation12_spill] sm:$0xff] %v7487_v53  ;;  %v3372_v44 = vpop.permute.xlu1 %3371 }
 0x33a   :  { %v3362_v31 = vpop.permute.xlu0 %3361 }
 0x33b   :  { %v3691_v33 = vsel %vm1327_vm5, %v8070_v19, %v3362_v31  ;;  %v3508_v7 = vpop.permute.xlu1 %3507  ;;  %v8075_v19 = vcombine.low %v7221_v14, %v7235_v48 }
 0x33c   :  { %v3714_v53 = vsel %vm1361_vm7, %v3691_v33, %v3402_v59 }
 0x33d   :  { %v3730_v18 = vsel %vm1395_vm9, %v3714_v53, %v7253_v0  ;;  %v8072_v0 = vcombine.low %v7134_v60, %v7171_v47  ;;  %v3752_v53 = vsel %vm1429_vm11, %v3736_v13, %v3504_v43 }
 0x33e   :  { %v3498_v29 = vpop.permute.xlu0 %3497  ;;  %v3769_v60 = vsel %vm3761_vm2, %v3752_v53, %v3544_v22 }
 0x33f   :  { %v3746_v58 = vsel %vm1429_vm11, %v3730_v18, %v3498_v29  ;;  %v3644_v52 = vpop.permute.xlu1 %3643  ;;  %v3706_v12 = vsel %vm1327_vm5, %v8072_v0, %v3372_v44  ;;  %v3816_v44 = vsel %vm3812_vm15, %v3799_v2, %v3676_v20  ;;  %v3786_v54 = vsel %vm3778_vm4, %v3769_v60, %v7314_v51 }
 0x340   :  { %v3763_v59 = vsel %vm3761_vm2, %v3746_v58, %v3538_v28  ;;  %v3724_v42 = vsel %vm1361_vm7, %v3706_v12, %v3412_v25  ;;  %v3803_v5 = vsel %vm3795_vm14, %v3786_v54, %v3640_v16 }
 0x341   :  { %v3780_v6 = vsel %vm3778_vm4, %v3763_v59, %v7278_v10  ;;  %v3740_v10 = vsel %vm1395_vm9, %v3724_v42, %v7352_v15 }
 0x342   :  { %v3634_v11 = vpop.permute.xlu0 %3633  ;;  %v3756_v26 = vsel %vm1429_vm11, %v3740_v10, %v3508_v7 }
 0x343   :  { %v3797_v28 = vsel %vm3795_vm14, %v3780_v6, %v3634_v11  ;;  %v3374_v21 = vpop.permute.xlu1 %3373 }
 0x344   :  { %v3814_v47 = vsel %vm3812_vm15, %v3797_v28, %v3674_v49  ;;  %v8073_v49 = vcombine.low %v7085_v17, %v7097_v40  ;;  %v8074_v17 = vcombine.low %v7261_v39, %v7263_v1 }
 0x345   :  { %4998 = vmatprep.mubr.msk.bf16.mxu1 %vm3865_vm0, %v3814_v47 }
 0x346   :  { %4999 = vmatmul.mubr.msk.bf16.vlgmr.msra.gmra.mrb[12].mxu1 %vm3865_vm0, %v3816_v44  ;;  %v3502_v25 = vpop.permute.xlu0 %3501  ;;  %v3703_v20 = vsel %vm1327_vm5, %v8073_v49, %v3370_v8  ;;  %v3773_v8 = vsel %vm3761_vm2, %v3756_v26, %v7459_v32 }
 0x347   :  { %v3750_v22 = vsel %vm1429_vm11, %v3734_v56, %v3502_v25  ;;  %v3376_v15 = vpop.permute.xlu1 %3375  ;;  %v3722_v51 = vsel %vm1361_vm7, %v3703_v20, %v7471_v50  ;;  %v3790_v1 = vsel %vm3778_vm4, %v3773_v8, %v7389_v30 }
 0x348   :  { %v3767_v43 = vsel %vm3761_vm2, %v3750_v22, %v7465_v36  ;;  %v3712_v40 = vsel %vm1327_vm5, %v8074_v17, %v3376_v15  ;;  %v3738_v50 = vsel %vm1395_vm9, %v3722_v51, %v7395_v34  ;;  %v3807_v7 = vsel %vm3795_vm14, %v3790_v1, %v3644_v52 }
 0x349   :  { %v3784_v62 = vsel %vm3778_vm4, %v3767_v43, %v7365_v46  ;;  %v3820_v46 = vsel %vm3812_vm15, %v3803_v5, %v7469_v24  ;;  %v3728_v39 = vsel %vm1361_vm7, %v3712_v40, %v7461_v3  ;;  %v3709_v24 = vsel %vm1327_vm5, %v8075_v19, %v3374_v21 }
 0x34a   :  { %v3638_v31 = vpop.permute.xlu0 %3637  ;;  %v3744_v3 = vsel %vm1395_vm9, %v3728_v39, %v7419_v27  ;;  %v3726_v63 = vsel %vm1361_vm7, %v3709_v24, %v7482_v9  ;;  %v8076_v27 = vld [vmem:[#allocation7_spill] sm:$0xff]  ;;  %v8077_v9 = vld [vmem:[#allocation26_spill] sm:$0xff] }
 0x34b   :  { %v3801_v38 = vsel %vm3795_vm14, %v3784_v62, %v3638_v31  ;;  %v3742_v13 = vsel %vm1395_vm9, %v3726_v63, %v8076_v27 }
 0x34c   :  { %v3818_v36 = vsel %vm3812_vm15, %v3801_v38, %v7467_v35  ;;  %v3512_v35 = vpop.permute.xlu1 %3511 }
 0x34d   :  { %5002 = vmatprep.mubr.msk.bf16.mxu1 %vm3865_vm0, %v3818_v36  ;;  %v3760_v48 = vsel %vm1429_vm11, %v3744_v3, %v3512_v35 }
 0x34e   :  { %5003 = vmatmul.mubr.msk.bf16.gmra.mrb[16].mxu1 %vm3865_vm0, %v3820_v46  ;;  %v3506_v16 = vpop.permute.xlu0 %3505  ;;  %v3777_v55 = vsel %vm3761_vm2, %v3760_v48, %v8077_v9 }
 0x34f   :  { %v3754_v32 = vsel %vm1429_vm11, %v3738_v50, %v3506_v16  ;;  %v3794_v61 = vsel %vm3778_vm4, %v3777_v55, %v8079_v45 }
 0x350   :  { %v3771_v33 = vsel %vm3761_vm2, %v3754_v32, %v7473_v41  ;;  %v3648_v41 = vpop.permute.xlu1 %3647 }
 0x351   :  { %v3788_v34 = vsel %vm3778_vm4, %v3771_v33, %v7426_v57  ;;  %v3824_v57 = vsel %vm3812_vm15, %v3807_v7, %v7479_v23  ;;  %v8080_v23 = vld [vmem:[#allocation6_spill] sm:$0xff]  ;;  %v3811_v53 = vsel %vm3795_vm14, %v3794_v61, %v3648_v41 }
 0x352   :  { %v3642_v30 = vpop.permute.xlu0 %3641 }
 0x353   :  { %v3805_v18 = vsel %vm3795_vm14, %v3788_v34, %v3642_v30 }
 0x354   :  { %v3822_v14 = vsel %vm3812_vm15, %v3805_v18, %v7475_v37  ;;  %v8078_v37 = vld [vmem:[#allocation12_spill] sm:$0xff]  ;;  %v3688_v12 = vpop.permute.xlu1 %3687 }
 0x355   :  { %5006 = vmatprep.mubr.msk.bf16.mxu1 %vm3865_vm0, %v3822_v14  ;;  %v3828_v2 = vsel %vm3812_vm15, %v3811_v53, %v3688_v12 }
 0x356   :  { %5007 = vmatmul.mubr.msk.bf16.gmra.mrb[20].mxu1 %vm3865_vm0, %v3824_v57  ;;  %v3510_v29 = vpop.permute.xlu0 %3509 }
 0x357   :  { %v3758_v58 = vsel %vm1429_vm11, %v3742_v13, %v3510_v29 }
 0x358   :  { %v3775_v52 = vsel %vm3761_vm2, %v3758_v58, %v8078_v37 }
 0x359   :  { %v3792_v0 = vsel %vm3778_vm4, %v3775_v52, %v8080_v23 }
 0x35a   :  { %v3646_v59 = vpop.permute.xlu0 %3645 }
 0x35b   :  { %v3809_v6 = vsel %vm3795_vm14, %v3792_v0, %v3646_v59 }
 0x35e   :  { %v3686_v11 = vpop.permute.xlu0 %3685 }
 0x35f   :  { %v3826_v4 = vsel %vm3812_vm15, %v3809_v6, %v3686_v11 }
 0x360   :  { %5010 = vmatprep.mubr.msk.bf16.mxu1 %vm3865_vm0, %v3826_v4 }
 0x361   :  { %5011 = vmatmul.mubr.msk.bf16.gmra.mrb[24].mxu1 %vm3865_vm0, %v3828_v2 }
 0x3ac   :  { %v7606_v42 = vpop.f32.mrb[4].mxu0 }
 0x3ad   :  { %v7608_v28 = vpop.f32.mrb[5].mxu0  ;;  %v4307_v21 = vmul.f32 %v7606_v42, %v7606_v42  ;;  %v4271_v10 = vsel %vm1327_vm5, %v7606_v42, 0.0 }
 0x3ae   :  { %v4268_v60 = vsel %vm1327_vm5, %v7608_v28, 0.0  ;;  %v4305_v47 = vmul.f32 %v7608_v28, %v7608_v28  ;;  %v7616_v44 = vpop.f32.mrb[6].mxu0 }
 0x3af   :  { %v7620_v56 = vpop.f32.mrb[7].mxu0  ;;  %v4308_v54 = vmul.f32 %v7616_v44, %v7616_v44  ;;  %v4324_v43 = vsel %vm1327_vm5, %v4307_v21, 0.0  ;;  %v4273_v15 = vsel %vm1327_vm5, %v7616_v44, 0.0 }
 0x3b0   :  { %v4321_v25 = vsel %vm1327_vm5, %v4305_v47, 0.0  ;;  %v4269_v22 = vsel %vm1327_vm5, %v7620_v56, 0.0  ;;  %v4306_v49 = vmul.f32 %v7620_v56, %v7620_v56 }
 0x3b1   :  { %v4270_v20 = vadd.f32 %v4269_v22, %v4268_v60  ;;  %v4326_v31 = vsel %vm1327_vm5, %v4308_v54, 0.0 }
 0x3b2   :  { %v4322_v26 = vsel %vm1327_vm5, %v4306_v49, 0.0 }
 0x3b3   :  { %v4272_v62 = vadd.f32 %v4271_v10, %v4270_v20  ;;  %v4323_v5 = vadd.f32 %v4322_v26, %v4321_v25 }
 0x3b4   :  { %v7634_v51 = vpop.f32.mrb[8].mxu0 }
 0x3b5   :  { %v4325_v38 = vadd.f32 %v4324_v43, %v4323_v5  ;;  %v7636_v17 = vpop.f32.mrb[9].mxu0  ;;  %v4274_v40 = vadd.f32 %v4273_v15, %v4272_v62  ;;  %v4311_v8 = vmul.f32 %v7634_v51, %v7634_v51  ;;  %v4279_v16 = vsel %vm1327_vm5, %v7634_v51, 0.0 }
 0x3b6   :  { %v4275_v36 = vsel %vm1327_vm5, %v7636_v17, 0.0  ;;  %v4309_v46 = vmul.f32 %v7636_v17, %v7636_v17  ;;  %v7644_v50 = vpop.f32.mrb[10].mxu0 }
 0x3b7   :  { %v4276_v39 = vadd.f32 %v4275_v36, %v4274_v40  ;;  %v4327_v1 = vadd.f32 %v4326_v31, %v4325_v38  ;;  %v7648_v32 = vpop.f32.mrb[11].mxu0  ;;  %v4312_v19 = vmul.f32 %v7644_v50, %v7644_v50  ;;  %v4332_v7 = vsel %vm1327_vm5, %v4311_v8, 0.0 }
 0x3b8   :  { %v4328_v35 = vsel %vm1327_vm5, %v4309_v46, 0.0  ;;  %v4277_v24 = vsel %vm1327_vm5, %v7648_v32, 0.0  ;;  %v4310_v33 = vmul.f32 %v7648_v32, %v7648_v32  ;;  %v4281_v30 = vsel %vm1327_vm5, %v7644_v50, 0.0 }
 0x3b9   :  { %v4329_v34 = vadd.f32 %v4328_v35, %v4327_v1  ;;  %v4278_v3 = vadd.f32 %v4277_v24, %v4276_v39  ;;  %v4334_v48 = vsel %vm1327_vm5, %v4312_v19, 0.0 }
 0x3ba   :  { %v4330_v63 = vsel %vm1327_vm5, %v4310_v33, 0.0 }
 0x3bb   :  { %v4280_v18 = vadd.f32 %v4279_v16, %v4278_v3  ;;  %v4331_v14 = vadd.f32 %v4330_v63, %v4329_v34 }
 0x3bc   :  { %v7662_v57 = vpop.f32.mrb[12].mxu0 }
 0x3bd   :  { %v4333_v41 = vadd.f32 %v4332_v7, %v4331_v14  ;;  %v7664_v27 = vpop.f32.mrb[13].mxu0  ;;  %v4282_v13 = vadd.f32 %v4281_v30, %v4280_v18  ;;  %v4315_v29 = vmul.f32 %v7662_v57, %v7662_v57  ;;  %v4287_v37 = vsel %vm1327_vm5, %v7662_v57, 0.0 }
 0x3be   :  { %v4283_v9 = vsel %vm1327_vm5, %v7664_v27, 0.0  ;;  %v4313_v55 = vmul.f32 %v7664_v27, %v7664_v27  ;;  %v7672_v58 = vpop.f32.mrb[14].mxu0 }
 0x3bf   :  { %v4284_v52 = vadd.f32 %v4283_v9, %v4282_v13  ;;  %v4335_v45 = vadd.f32 %v4334_v48, %v4333_v41  ;;  %v7676_v61 = vpop.f32.mrb[15].mxu0  ;;  %v4316_v23 = vmul.f32 %v7672_v58, %v7672_v58  ;;  %v4340_v2 = vsel %vm1327_vm5, %v4315_v29, 0.0 }
 0x3c0   :  { %v4336_v59 = vsel %vm1327_vm5, %v4313_v55, 0.0  ;;  %v4285_v0 = vsel %vm1327_vm5, %v7676_v61, 0.0  ;;  %v4314_v12 = vmul.f32 %v7676_v61, %v7676_v61  ;;  %v4289_v11 = vsel %vm1327_vm5, %v7672_v58, 0.0 }
 0x3c1   :  { %v4337_v53 = vadd.f32 %v4336_v59, %v4335_v45  ;;  %v4286_v6 = vadd.f32 %v4285_v0, %v4284_v52  ;;  %v4342_v47 = vsel %vm1327_vm5, %v4316_v23, 0.0 }
 0x3c2   :  { %v4338_v4 = vsel %vm1327_vm5, %v4314_v12, 0.0 }
 0x3c3   :  { %v4288_v21 = vadd.f32 %v4287_v37, %v4286_v6  ;;  %v4339_v60 = vadd.f32 %v4338_v4, %v4337_v53  ;;  %v4266_v6 = vld [vmem:[%s7928_s8] sm:$0x1] }
 0x3c4   :  { %v7690_v10 = vpop.f32.mrb[16].mxu0 }
 0x3c5   :  { %v4341_v25 = vadd.f32 %v4340_v2, %v4339_v60  ;;  %v7692_v54 = vpop.f32.mrb[17].mxu0  ;;  %v4290_v22 = vadd.f32 %v4289_v11, %v4288_v21  ;;  %v4319_v49 = vmul.f32 %v7690_v10, %v7690_v10  ;;  %v4295_v26 = vsel %vm1327_vm5, %v7690_v10, 0.0  ;;  %v8081_v21 = vld [vmem:[#allocation3_spill] sm:$0xff] }
 0x3c6   :  { %v4291_v20 = vsel %vm1327_vm5, %v7692_v54, 0.0  ;;  %v4317_v43 = vmul.f32 %v7692_v54, %v7692_v54  ;;  %v7700_v15 = vpop.f32.mrb[18].mxu0 }
 0x3c7   :  { %v4292_v62 = vadd.f32 %v4291_v20, %v4290_v22  ;;  %v4343_v5 = vadd.f32 %v4342_v47, %v4341_v25  ;;  %v4254_v31 = vpop.f32.mrb[19].mxu0  ;;  %v4320_v40 = vmul.f32 %v7700_v15, %v7700_v15  ;;  %v4348_v39 = vsel %vm1327_vm5, %v4319_v49, 0.0 }
 0x3c8   :  { %v4344_v38 = vsel %vm1327_vm5, %v4317_v43, 0.0  ;;  %v4293_v8 = vsel %vm1327_vm5, %v4254_v31, 0.0  ;;  %v4318_v36 = vmul.f32 %v4254_v31, %v4254_v31  ;;  %v4297_v1 = vsel %vm1327_vm5, %v7700_v15, 0.0 }
 0x3c9   :  { %v4345_v46 = vadd.f32 %v4344_v38, %v4343_v5  ;;  %v4294_v16 = vadd.f32 %v4293_v8, %v4292_v62  ;;  %v4350_v33 = vsel %vm1327_vm5, %v4320_v40, 0.0 }
 0x3ca   :  { %v4346_v35 = vsel %vm1327_vm5, %v4318_v36, 0.0 }
 0x3cb   :  { %v4296_v19 = vadd.f32 %v4295_v26, %v4294_v16  ;;  %v4347_v24 = vadd.f32 %v4346_v35, %v4345_v46 }
 0x3cd   :  { %v4298_v34 = vadd.f32 %v4297_v1, %v4296_v19  ;;  %v4349_v3 = vadd.f32 %v4348_v39, %v4347_v24 }
 0x3cf   :  { %v4299_v7 = vrot.slane %v4298_v34, 4  ;;  %v4351_v30 = vadd.f32 %v4350_v33, %v4349_v3 }
 0x3d1   :  { %v4300_v63 = vadd.f32 %v4299_v7, %v4298_v34  ;;  %v4352_v18 = vrot.slane %v4351_v30, 4 }
 0x3d3   :  { %v4301_v14 = vrot.slane %v4300_v63, 2  ;;  %v4353_v48 = vadd.f32 %v4352_v18, %v4351_v30 }
 0x3d5   :  { %v4302_v41 = vadd.f32 %v4301_v14, %v4300_v63  ;;  %v4354_v13 = vrot.slane %v4353_v48, 2 }
 0x3d7   :  { %v4303_v29 = vrot.slane %v4302_v41, 1  ;;  %v4355_v9 = vadd.f32 %v4354_v13, %v4353_v48 }
 0x3d9   :  { %v4304_v55 = vadd.f32 %v4303_v29, %v4302_v41  ;;  %v4356_v37 = vrot.slane %v4355_v9, 1 }
 0x3db   :  { %v4357_v52 = vadd.f32 %v4356_v37, %v4355_v9  ;;  %v4358_v45 = vmul.f32 0.0078125, %v4304_v55 }
 0x3dd   :  { %v4359_v59 = vmul.f32 0.0078125, %v4357_v52  ;;  %v4360_v23 = vmul.f32 %v4358_v45, %v4358_v45 }
 0x3df   :  { %v4361_v0 = vsub.f32 %v4359_v59, %v4360_v23 }
 0x3e1   :  { %v4362_v12 = vmax.f32 %v4361_v0, 0.0 }
 0x3e3   :  { %v4363_v53 = vadd.f32 1e-05, %v4362_v12 }
 0x3e5   :  { %5145 = vrsqrt.f32 %v4363_v53 }
 0x3ef   :  { %v5146_v2 = vpop.eup %5145 }
 0x3f0   :  { %v4365_v11 = vmul.f32 %v5146_v2, %v4266_v6 }
 0x3f2   :  { %v7716_v4 = vmul.f32 %v4365_v11, %v4358_v45  ;;  %v4394_v60 = vrot.slane %v4365_v11, %v8081_v21 }
 0x3f4   :  { %v7719_v47 = vmul.f32 %v4394_v60, %v4254_v31  ;;  %v7722_v25 = vmul.f32 %v4394_v60, %v7608_v28  ;;  %v7725_v22 = vmul.f32 %v4394_v60, %v7620_v56  ;;  %v7728_v49 = vmul.f32 %v7606_v42, %v4394_v60 }
 0x3f5   :  { %v7731_v20 = vmul.f32 %v7616_v44, %v4394_v60  ;;  %v7734_v43 = vmul.f32 %v4394_v60, %v7636_v17  ;;  %v7737_v26 = vmul.f32 %v4394_v60, %v7648_v32  ;;  %v7740_v62 = vmul.f32 %v7634_v51, %v4394_v60 }
 0x3f6   :  { %v7743_v28 = vmul.f32 %v7644_v50, %v4394_v60  ;;  %v7746_v56 = vmul.f32 %v4394_v60, %v7664_v27  ;;  %v7749_v42 = vmul.f32 %v4394_v60, %v7676_v61  ;;  %v7752_v44 = vmul.f32 %v7662_v57, %v4394_v60 }
 0x3f7   :  { %v7755_v17 = vmul.f32 %v7672_v58, %v4394_v60  ;;  %v7762_v51 = vmul.f32 %v4394_v60, %v7692_v54  ;;  %v7799_v18 = vmul.f32 %v7690_v10, %v4394_v60  ;;  %v7802_v14 = vmul.f32 %v7700_v15, %v4394_v60 }
 0x419   :  { %v7757_v32 = vpop.f32.mrb[12].mxu1 }
 0x41a   :  { %v7759_v5 = vpop.f32.mrb[13].mxu1  ;;  %v4024_v57 = vmul.f32 %v7757_v32, %v7757_v32  ;;  %v3988_v8 = vsel %vm1327_vm5, %v7757_v32, 0.0 }
 0x41b   :  { %v4022_v50 = vmul.f32 %v7759_v5, %v7759_v5  ;;  %v7766_v27 = vpop.f32.mrb[14].mxu1  ;;  %v3985_v58 = vsel %vm1327_vm5, %v7759_v5, 0.0 }
 0x41c   :  { %v7768_v61 = vpop.f32.mrb[15].mxu1  ;;  %v4025_v38 = vmul.f32 %v7766_v27, %v7766_v27  ;;  %v4041_v1 = vsel %vm1327_vm5, %v4024_v57, 0.0  ;;  %v3990_v35 = vsel %vm1327_vm5, %v7766_v27, 0.0 }
 0x41d   :  { %v3986_v31 = vsel %vm1327_vm5, %v7768_v61, 0.0  ;;  %v4023_v54 = vmul.f32 %v7768_v61, %v7768_v61  ;;  %v4038_v36 = vsel %vm1327_vm5, %v4022_v50, 0.0 }
 0x41e   :  { %v3987_v40 = vadd.f32 %v3986_v31, %v3985_v58  ;;  %v4043_v24 = vsel %vm1327_vm5, %v4025_v38, 0.0 }
 0x41f   :  { %v4039_v46 = vsel %vm1327_vm5, %v4023_v54, 0.0 }
 0x420   :  { %v3989_v16 = vadd.f32 %v3988_v8, %v3987_v40  ;;  %v4040_v39 = vadd.f32 %v4039_v46, %v4038_v36 }
 0x421   :  { %v7787_v19 = vpop.f32.mrb[16].mxu1 }
 0x422   :  { %v4042_v33 = vadd.f32 %v4041_v1, %v4040_v39  ;;  %v7790_v34 = vpop.f32.mrb[17].mxu1  ;;  %v3991_v3 = vadd.f32 %v3990_v35, %v3989_v16  ;;  %v4028_v29 = vmul.f32 %v7787_v19, %v7787_v19  ;;  %v3996_v15 = vsel %vm1327_vm5, %v7787_v19, 0.0 }
 0x423   :  { %v3992_v7 = vsel %vm1327_vm5, %v7790_v34, 0.0  ;;  %v4026_v30 = vmul.f32 %v7790_v34, %v7790_v34  ;;  %v7796_v63 = vpop.f32.mrb[18].mxu1 }
 0x424   :  { %v3993_v48 = vadd.f32 %v3992_v7, %v3991_v3  ;;  %v4044_v41 = vadd.f32 %v4043_v24, %v4042_v33  ;;  %v7804_v13 = vpop.f32.mrb[19].mxu1  ;;  %v4029_v45 = vmul.f32 %v7796_v63, %v7796_v63  ;;  %v4049_v12 = vsel %vm1327_vm5, %v4028_v29, 0.0 }
 0x425   :  { %v4045_v9 = vsel %vm1327_vm5, %v4026_v30, 0.0  ;;  %v3994_v55 = vsel %vm1327_vm5, %v7804_v13, 0.0  ;;  %v4027_v37 = vmul.f32 %v7804_v13, %v7804_v13  ;;  %v3998_v53 = vsel %vm1327_vm5, %v7796_v63, 0.0 }
 0x426   :  { %v4046_v10 = vadd.f32 %v4045_v9, %v4044_v41  ;;  %v3995_v52 = vadd.f32 %v3994_v55, %v3993_v48  ;;  %v4051_v50 = vsel %vm1327_vm5, %v4029_v45, 0.0 }
 0x427   :  { %v4047_v59 = vsel %vm1327_vm5, %v4027_v37, 0.0 }
 0x428   :  { %v3997_v23 = vadd.f32 %v3996_v15, %v3995_v52  ;;  %v4048_v0 = vadd.f32 %v4047_v59, %v4046_v10 }
 0x429   :  { %v7821_v6 = vpop.f32.mrb[20].mxu1 }
 0x42a   :  { %v4050_v2 = vadd.f32 %v4049_v12, %v4048_v0  ;;  %v7823_v11 = vpop.f32.mrb[21].mxu1  ;;  %v3999_v60 = vadd.f32 %v3998_v53, %v3997_v23  ;;  %v4032_v8 = vmul.f32 %v7821_v6, %v7821_v6  ;;  %v4004_v35 = vsel %vm1327_vm5, %v7821_v6, 0.0 }
 0x42b   :  { %v4000_v57 = vsel %vm1327_vm5, %v7823_v11, 0.0  ;;  %v4030_v58 = vmul.f32 %v7823_v11, %v7823_v11  ;;  %v7830_v31 = vpop.f32.mrb[22].mxu1 }
 0x42c   :  { %v4001_v54 = vadd.f32 %v4000_v57, %v3999_v60  ;;  %v4052_v38 = vadd.f32 %v4051_v50, %v4050_v2  ;;  %v7832_v40 = vpop.f32.mrb[23].mxu1  ;;  %v4033_v24 = vmul.f32 %v7830_v31, %v7830_v31  ;;  %v4057_v30 = vsel %vm1327_vm5, %v4032_v8, 0.0 }
 0x42d   :  { %v4053_v36 = vsel %vm1327_vm5, %v4030_v58, 0.0  ;;  %v4002_v46 = vsel %vm1327_vm5, %v7832_v40, 0.0  ;;  %v4031_v16 = vmul.f32 %v7832_v40, %v7832_v40  ;;  %v4006_v48 = vsel %vm1327_vm5, %v7830_v31, 0.0 }
 0x42e   :  { %v4054_v39 = vadd.f32 %v4053_v36, %v4052_v38  ;;  %v4003_v1 = vadd.f32 %v4002_v46, %v4001_v54  ;;  %v4059_v9 = vsel %vm1327_vm5, %v4033_v24, 0.0 }
 0x42f   :  { %v4055_v33 = vsel %vm1327_vm5, %v4031_v16, 0.0 }
 0x430   :  { %v4005_v3 = vadd.f32 %v4004_v35, %v4003_v1  ;;  %v4056_v7 = vadd.f32 %v4055_v33, %v4054_v39 }
 0x432   :  { %v4058_v41 = vadd.f32 %v4057_v30, %v4056_v7  ;;  %v4007_v29 = vadd.f32 %v4006_v48, %v4005_v3 }
 0x434   :  { %v7850_v55 = vpop.f32.mrb[24].mxu1  ;;  %v4060_v37 = vadd.f32 %v4059_v9, %v4058_v41 }
 0x435   :  { %v7852_v10 = vpop.f32.mrb[25].mxu1  ;;  %v4036_v0 = vmul.f32 %v7850_v55, %v7850_v55  ;;  %v4012_v57 = vsel %vm1327_vm5, %v7850_v55, 0.0 }
 0x436   :  { %v4008_v52 = vsel %vm1327_vm5, %v7852_v10, 0.0  ;;  %v4034_v15 = vmul.f32 %v7852_v10, %v7852_v10  ;;  %v7858_v45 = vpop.f32.mrb[26].mxu1 }
 0x437   :  { %v4009_v59 = vadd.f32 %v4008_v52, %v4007_v29  ;;  %v3971_v23 = vpop.f32.mrb[27].mxu1  ;;  %v4037_v58 = vmul.f32 %v7858_v45, %v7858_v45  ;;  %v4065_v36 = vsel %vm1327_vm5, %v4036_v0, 0.0  ;;  %v4014_v46 = vsel %vm1327_vm5, %v7858_v45, 0.0 }
 0x438   :  { %v4061_v12 = vsel %vm1327_vm5, %v4034_v15, 0.0  ;;  %v4010_v53 = vsel %vm1327_vm5, %v3971_v23, 0.0  ;;  %v4035_v2 = vmul.f32 %v3971_v23, %v3971_v23 }
 0x439   :  { %v4062_v60 = vadd.f32 %v4061_v12, %v4060_v37  ;;  %v4011_v50 = vadd.f32 %v4010_v53, %v4009_v59  ;;  %v4067_v1 = vsel %vm1327_vm5, %v4037_v58, 0.0  ;;  %v4267_v58 = vld [vmem:[%s7930_s9] sm:$0x1] }
 0x43a   :  { %v4063_v54 = vsel %vm1327_vm5, %v4035_v2, 0.0 }
 0x43b   :  { %v4013_v38 = vadd.f32 %v4012_v57, %v4011_v50  ;;  %v4064_v8 = vadd.f32 %v4063_v54, %v4062_v60  ;;  %v3983_v50 = vld [vmem:[%s7929_s5] sm:$0x1] }
 0x43d   :  { %v4015_v16 = vadd.f32 %v4014_v46, %v4013_v38  ;;  %v4066_v39 = vadd.f32 %v4065_v36, %v4064_v8  ;;  %v3984_v38 = vld [vmem:[%s7931_s6] sm:$0x1]  ;;  %v4367_v46 = vsub.f32 %v4267_v58, %v7716_v4 }
 0x43f   :  { %v4016_v35 = vrot.slane %v4015_v16, 4  ;;  %v4068_v24 = vadd.f32 %v4067_v1, %v4066_v39 }
 0x441   :  { %v4017_v33 = vadd.f32 %v4016_v35, %v4015_v16  ;;  %v4069_v3 = vrot.slane %v4068_v24, 4 }
 0x443   :  { %v4018_v7 = vrot.slane %v4017_v33, 2  ;;  %v4070_v30 = vadd.f32 %v4069_v3, %v4068_v24 }
 0x445   :  { %v4019_v48 = vadd.f32 %v4018_v7, %v4017_v33  ;;  %v4071_v41 = vrot.slane %v4070_v30, 2 }
 0x447   :  { %v4020_v29 = vrot.slane %v4019_v48, 1  ;;  %v4072_v9 = vadd.f32 %v4071_v41, %v4070_v30 }
 0x449   :  { %v4021_v37 = vadd.f32 %v4020_v29, %v4019_v48  ;;  %v4073_v52 = vrot.slane %v4072_v9, 1 }
 0x44b   :  { %v4074_v15 = vadd.f32 %v4073_v52, %v4072_v9  ;;  %v4075_v59 = vmul.f32 0.0078125, %v4021_v37 }
 0x44d   :  { %v4076_v0 = vmul.f32 0.0078125, %v4074_v15  ;;  %v4077_v12 = vmul.f32 %v4075_v59, %v4075_v59 }
 0x44f   :  { %v4078_v53 = vsub.f32 %v4076_v0, %v4077_v12 }
 0x451   :  { %v4079_v2 = vmax.f32 %v4078_v53, 0.0 }
 0x453   :  { %v4080_v60 = vadd.f32 1e-05, %v4079_v2 }
 0x455   :  { %5147 = vrsqrt.f32 %v4080_v60 }
 0x45f   :  { %v5148_v57 = vpop.eup %5147 }
 0x460   :  { %v4082_v54 = vmul.f32 %v5148_v57, %v3983_v50 }
 0x462   :  { %v4083_v8 = vmul.f32 %v4082_v54, %v4075_v59  ;;  %v4372_v36 = vrot.slane %v4082_v54, %v8081_v21 }
 0x464   :  { %v4084_v16 = vsub.f32 %v3984_v38, %v4083_v8  ;;  %v4387_v39 = vmul.f32 %v4372_v36, %v3971_v23  ;;  %v4374_v1 = vmul.f32 %v4372_v36, %v7759_v5  ;;  %v4375_v35 = vmul.f32 %v4372_v36, %v7768_v61 }
 0x465   :  { %v4376_v24 = vmul.f32 %v7757_v32, %v4372_v36  ;;  %v4377_v33 = vmul.f32 %v7766_v27, %v4372_v36  ;;  %v4378_v3 = vmul.f32 %v4372_v36, %v7790_v34  ;;  %v4379_v7 = vmul.f32 %v4372_v36, %v7804_v13 }
 0x466   :  { %v4425_v30 = vadd.f32 %v7719_v47, %v4387_v39  ;;  %v4428_v48 = vadd.f32 %v4367_v46, %v4084_v16  ;;  %v4412_v41 = vadd.f32 %v7722_v25, %v4374_v1  ;;  %v4413_v4 = vadd.f32 %v7725_v22, %v4375_v35 }
 0x467   :  { %v4414_v23 = vadd.f32 %v7728_v49, %v4376_v24  ;;  %v4415_v5 = vadd.f32 %v7731_v20, %v4377_v33  ;;  %v4416_v61 = vadd.f32 %v7734_v43, %v4378_v3  ;;  %v4417_v32 = vadd.f32 %v7737_v26, %v4379_v7 }
 0x468   :  { %v4433_v27 = vrot.slane %v4428_v48, %v8081_v21  ;;  %v4380_v34 = vmul.f32 %v7787_v19, %v4372_v36  ;;  %v4381_v13 = vmul.f32 %v7796_v63, %v4372_v36  ;;  %v4382_v47 = vmul.f32 %v4372_v36, %v7823_v11 }
 0x469   :  { %v4383_v25 = vmul.f32 %v4372_v36, %v7832_v40  ;;  %v4384_v22 = vmul.f32 %v7821_v6, %v4372_v36  ;;  %v4385_v49 = vmul.f32 %v7830_v31, %v4372_v36  ;;  %v4386_v20 = vmul.f32 %v4372_v36, %v7852_v10 }
 0x46a   :  { %v4435_v29 = vadd.f32 %v4433_v27, %v4412_v41  ;;  %v4436_v43 = vadd.f32 %v4433_v27, %v4413_v4  ;;  %v4437_v9 = vadd.f32 %v4433_v27, %v4414_v23  ;;  %v4438_v26 = vadd.f32 %v4433_v27, %v4415_v5 }
 0x46b   :  { %v4439_v37 = vadd.f32 %v4433_v27, %v4416_v61  ;;  %v4440_v21 = vadd.f32 %v4433_v27, %v4417_v32  ;;  %v4418_v19 = vadd.f32 %v7740_v62, %v4380_v34  ;;  %v4419_v63 = vadd.f32 %v7743_v28, %v4381_v13 }
 0x46c   :  { %4500 = vxpose.xlu1.b32.start [1/16] (narrow) %v4435_v29, 8  ;;  %v4451_v11 = vmax.f32 %v4435_v29, 0.0  ;;  %v4420_v6 = vadd.f32 %v7746_v56, %v4382_v47  ;;  %v4421_v31 = vadd.f32 %v7749_v42, %v4383_v25  ;;  %v4422_v10 = vadd.f32 %v7752_v44, %v4384_v22 }
 0x46d   :  { %v4441_v52 = vadd.f32 %v4433_v27, %v4418_v19  ;;  %v4442_v40 = vadd.f32 %v4433_v27, %v4419_v63  ;;  %v4423_v15 = vadd.f32 %v7755_v17, %v4385_v49  ;;  %v4452_v59 = vmax.f32 %v4436_v43, 0.0 }
 0x46e   :  { %4467 = vxpose.xlu0.b32.start [1/16] (narrow) %v4451_v11, 8  ;;  %v4424_v0 = vadd.f32 %v7762_v51, %v4386_v20  ;;  %v4448_v12 = vadd.f32 %v4433_v27, %v4425_v30  ;;  %v4443_v62 = vadd.f32 %v4433_v27, %v4420_v6  ;;  %v4444_v28 = vadd.f32 %v4433_v27, %v4421_v31 }
 0x46f   :  { %v4445_v53 = vadd.f32 %v4433_v27, %v4422_v10  ;;  %v4446_v2 = vadd.f32 %v4433_v27, %v4423_v15  ;;  %v4388_v50 = vmul.f32 %v7850_v55, %v4372_v36  ;;  %v4389_v56 = vmul.f32 %v7858_v45, %v4372_v36 }
 0x470   :  { %4501 = vxpose.xlu1.b32.cont [2/16] (narrow) %v4436_v43, 8  ;;  %v4447_v60 = vadd.f32 %v4433_v27, %v4424_v0  ;;  %v4453_v17 = vmax.f32 %v4437_v9, 0.0  ;;  %v4454_v58 = vmax.f32 %v4438_v26, 0.0  ;;  %v4455_v54 = vmax.f32 %v4439_v37, 0.0 }
 0x471   :  { %v4426_v42 = vadd.f32 %v7799_v18, %v4388_v50  ;;  %v4427_v44 = vadd.f32 %v7802_v14, %v4389_v56  ;;  %v4456_v55 = vmax.f32 %v4440_v21, 0.0  ;;  %v4457_v45 = vmax.f32 %v4441_v52, 0.0 }
 0x472   :  { %4468 = vxpose.xlu0.b32.cont [2/16] (narrow) %v4452_v59, 8  ;;  %v4458_v18 = vmax.f32 %v4442_v40, 0.0  ;;  %v4459_v14 = vmax.f32 %v4443_v62, 0.0  ;;  %v4460_v38 = vmax.f32 %v4444_v28, 0.0  ;;  %v4461_v8 = vmax.f32 %v4445_v53, 0.0 }
 0x473   :  { %v4449_v57 = vadd.f32 %v4433_v27, %v4426_v42  ;;  %v4450_v51 = vadd.f32 %v4433_v27, %v4427_v44  ;;  %v4462_v36 = vmax.f32 %v4446_v2, 0.0  ;;  %v4463_v46 = vmax.f32 %v4447_v60, 0.0 }
 0x474   :  { %4502 = vxpose.xlu1.b32.cont [3/16] (narrow) %v4437_v9, 8  ;;  %v4464_v16 = vmax.f32 %v4448_v12, 0.0 }
 0x475   :  { %v4465_v39 = vmax.f32 %v4449_v57, 0.0  ;;  %v4466_v1 = vmax.f32 %v4450_v51, 0.0 }
 0x476   :  { %4469 = vxpose.xlu0.b32.cont [3/16] (narrow) %v4453_v17, 8 }
 0x478   :  { %4503 = vxpose.xlu1.b32.cont [4/16] (narrow) %v4438_v26, 8 }
 0x47a   :  { %4470 = vxpose.xlu0.b32.cont [4/16] (narrow) %v4454_v58, 8 }
 0x47c   :  { %4504 = vxpose.xlu1.b32.cont [5/16] (narrow) %v4439_v37, 8 }
 0x47e   :  { %4471 = vxpose.xlu0.b32.cont [5/16] (narrow) %v4455_v54, 8 }
 0x480   :  { %4505 = vxpose.xlu1.b32.cont [6/16] (narrow) %v4440_v21, 8 }
 0x482   :  { %4472 = vxpose.xlu0.b32.cont [6/16] (narrow) %v4456_v55, 8 }
 0x484   :  { %4506 = vxpose.xlu1.b32.cont [7/16] (narrow) %v4441_v52, 8 }
 0x486   :  { %4473 = vxpose.xlu0.b32.cont [7/16] (narrow) %v4457_v45, 8 }
 0x488   :  { %4507 = vxpose.xlu1.b32.cont [8/16] (narrow) %v4442_v40, 8 }
 0x48a   :  { %4474 = vxpose.xlu0.b32.cont [8/16] (narrow) %v4458_v18, 8 }
 0x48c   :  { %4508 = vxpose.xlu1.b32.cont [9/16] (narrow) %v4443_v62, 8 }
 0x48e   :  { %4475 = vxpose.xlu0.b32.cont [9/16] (narrow) %v4459_v14, 8 }
 0x490   :  { %4509 = vxpose.xlu1.b32.cont [10/16] (narrow) %v4444_v28, 8 }
 0x492   :  { %4476 = vxpose.xlu0.b32.cont [10/16] (narrow) %v4460_v38, 8 }
 0x494   :  { %4510 = vxpose.xlu1.b32.cont [11/16] (narrow) %v4445_v53, 8 }
 0x496   :  { %4477 = vxpose.xlu0.b32.cont [11/16] (narrow) %v4461_v8, 8 }
 0x498   :  { %4511 = vxpose.xlu1.b32.cont [12/16] (narrow) %v4446_v2, 8 }
 0x49a   :  { %4478 = vxpose.xlu0.b32.cont [12/16] (narrow) %v4462_v36, 8 }
 0x49c   :  { %4512 = vxpose.xlu1.b32.cont [13/16] (narrow) %v4447_v60, 8 }
 0x49e   :  { %4479 = vxpose.xlu0.b32.cont [13/16] (narrow) %v4463_v46, 8 }
 0x4a0   :  { %4513 = vxpose.xlu1.b32.cont [14/16] (narrow) %v4448_v12, 8 }
 0x4a2   :  { %4480 = vxpose.xlu0.b32.cont [14/16] (narrow) %v4464_v16, 8 }
 0x4a4   :  { %4514 = vxpose.xlu1.b32.cont [15/16] (narrow) %v4449_v57, 8 }
 0x4a6   :  { %4481 = vxpose.xlu0.b32.cont [15/16] (narrow) %v4465_v39, 8 }
 0x4a8   :  { %4515 = vxpose.xlu1.b32.end [16/16] (narrow) %v4450_v51, 8 }
 0x4aa   :  { %4482 = vxpose.xlu0.b32.end [16/16] (narrow) %v4466_v1, 8 }
 0x4ec   :  { %v4516_v35 = vpop.trf.xlu1 }
 0x4ed   :  { %4532 = vst [vmem:[%s7932_s11] sm:$0xff] %v4516_v35 }
 0x4ee   :  { %v4483_v24 = vpop.trf.xlu0 }
 0x4ef   :  { %4499 = vst [vmem:[%s7933_s10] sm:$0xff] %v4483_v24 }

</bundles_post_ra>
